<compile_context>
chip_gen: v6e
topology: v6e:2x2x1
jax: 0.10.0
libtpu: 0.0.40
codegen_flags: <defaults>
</compile_context>

<pallas_src>
import numpy as np
import jax
import jax.numpy as jnp
from jax import lax
from jax.experimental import pallas as pl
from jax.experimental.pallas import tpu as pltpu

# ------------------------- config (small, consistent with the module) --------
DIM = 128            # "dim" in the module (default 384)
TOKEN_DIM = 64       # token_dim
IMG_SIZE = 64        # img_size
RATIO = 8            # ratio
KH, KW = 3, 3        # kernel_size
STRIDE = 2
PAD = 1
B = 2

H_OUT = IMG_SIZE // RATIO                          # fold output side  (8)
P = H_OUT * H_OUT                                  # output tokens     (64)
L_SIDE = (H_OUT + 2 * PAD - KH) // STRIDE + 1      # input token side  (4)
L = L_SIDE * L_SIDE                                # input tokens      (16)
KK = KH * KW                                       # kernel positions  (9)
LK = L * KK                                        # fold patch rows   (144)
M_PRM = int(TOKEN_DIM * 0.5)                       # performer random features (32)
EPS_LN = 1e-5
EPS_PERF = 1e-8

F32 = jnp.float32
BF16 = jnp.bfloat16


# ------------------------- in-kernel math helpers -----------------------------
def _gelu(x):
    # tanh-approximate GELU: 1 EUP tanh + a few VALU ops (vs ~10 dependent
    # VALU ops for the erf polynomial).
    c = np.float32(0.7978845608028654)   # sqrt(2/pi)
    return 0.5 * x * (1.0 + jnp.tanh(c * (x + np.float32(0.044715) * x * x * x)))


def _layernorm(x, g, b):
    mu = jnp.mean(x, axis=-1, keepdims=True)
    var = jnp.mean((x - mu) ** 2, axis=-1, keepdims=True)
    return (x - mu) * lax.rsqrt(var + EPS_LN) * g + b


def _mm(a, w, b=None):
    # bf16 operands -> native MXU path; f32 accumulation.
    out = jnp.dot(a.astype(BF16), w, preferred_element_type=F32)
    return out if b is None else out + b


# ------------------------- the single fused kernel -----------------------------
def decoder_fused_kernel(
    dec_ref, enc_ref, fold_ref,
    ln_g, ln_b, mw1, mb1, mw2, mb2,
    pw, pb,
    cw1, cb1, cw2, cb2,
    g1, b1, wkqv, bkqv, wprm, wpr, bpr,
    g2, b2, wm1, bm1, wm2, bm2,
    o_ref,
):
    # ---------------- stage 1: norm(dim) -> mlp -> project --------------------
    x = dec_ref[0]                                   # (L, DIM) f32
    xn = _layernorm(x, ln_g[...], ln_b[...])
    h = _gelu(_mm(xn, mw1[...], mb1[...]))           # (L, C)
    h = _mm(h, mw2[...], mb2[...])                   # (L, C)
    # project weight columns are pre-permuted to (kernel-pos, channel) order:
    # proj[l, k*C + c] == torch_project_out[l, c*9 + k]
    proj = _mm(h, pw[...], pb[...])                  # (L, 9*C)

    # ---------------- stage 2: nn.Fold as one matmul ---------------------------
    # patches row order (k, l): row k*L + l  <-  proj[l, k*C:(k+1)*C]
    patches = jnp.concatenate(
        [proj[:, k * TOKEN_DIM:(k + 1) * TOKEN_DIM] for k in range(KK)], axis=0
    )                                                # (9*L, C)
    # fold_ref[p, k*L + l] = 1 iff window l / kernel offset k lands on pixel p.
    fold_out = jnp.dot(fold_ref[...], patches.astype(BF16),
                       preferred_element_type=F32)   # (P, C)

    # ---------------- stage 3: concatFuse --------------------------------------
    cat = jnp.concatenate([fold_out, enc_ref[0]], axis=-1)   # (P, 2C), K=128 matmul
    hc = _gelu(_mm(cat, cw1[...], cb1[...]))
    z = _mm(hc, cw2[...], cb2[...])                  # (P, C)

    # ---------------- stage 4: Token_performer ---------------------------------
    zn = _layernorm(z, g1[...], b1[...])
    kqv = _mm(zn, wkqv[...], bkqv[...])              # (P, 3C): one fat matmul
    k = kqv[:, 0:TOKEN_DIM]
    q = kqv[:, TOKEN_DIM:2 * TOKEN_DIM]
    v = kqv[:, 2 * TOKEN_DIM:3 * TOKEN_DIM]

    # prm_exp on stacked [k; q]: one (2P, C) @ (C, m) matmul, exp in f32.
    kq = jnp.concatenate([k, q], axis=0)                               # (2P, C)
    xd = 0.5 * jnp.sum(kq * kq, axis=-1, keepdims=True)                # (2P, 1)
    wtx = _mm(kq, wprm[...])                                           # (2P, m)
    prm = jnp.exp(wtx - xd) * np.float32(1.0 / np.sqrt(M_PRM))
    kp = prm[0:P, :]                                                   # (P, m)
    qp = prm[P:2 * P, :]                                               # (P, m)

    ksum = jnp.sum(kp, axis=0, keepdims=True)                          # (1, m)
    d = jnp.sum(qp * ksum, axis=-1, keepdims=True)                     # (P, 1)
    # A[i, n] = sum_t kp[t, i] * v[t, n] : single transposed-lhs contraction,
    # then y = qp @ A is a plain (no-transpose) matmul.
    a_mat = lax.dot_general(kp.astype(BF16), v.astype(BF16),
                            (((0,), (0,)), ((), ())),
                            preferred_element_type=F32)                # (m, C)
    y = _mm(qp, a_mat.astype(BF16)) / (d + EPS_PERF)                   # (P, C)
    # dropout = identity (eval); v is the skip connection
    y = v + _mm(y, wpr[...], bpr[...])

    yn = _layernorm(y, g2[...], b2[...])
    hm = _gelu(_mm(yn, wm1[...], bm1[...]))
    hm = _mm(hm, wm2[...], bm2[...])
    o_ref[0] = y + hm


# ------------------------- pallas_call wrapper ----------------------------------
def _bcast_spec(shape):
    nd = len(shape)
    return pl.BlockSpec(tuple(shape), lambda b, nd=nd: (0,) * nd)


def decoder_forward(dec_fea, enc_fea, params, fold_m):
    # dec_fea: (B, L, DIM)   enc_fea: (B, P, TOKEN_DIM)
    bn = dec_fea.shape[0]
    args = (
        dec_fea, enc_fea, fold_m,
        params["ln_g"], params["ln_b"],
        params["mlp_w1"], params["mlp_b1"], params["mlp_w2"], params["mlp_b2"],
        params["proj_w"], params["proj_b"],
        params["cf_w1"], params["cf_b1"], params["cf_w2"], params["cf_b2"],
        params["tp_g1"], params["tp_b1"], params["tp_wkqv"], params["tp_bkqv"],
        params["tp_wprm"], params["tp_wpr"], params["tp_bpr"],
        params["tp_g2"], params["tp_b2"],
        params["tp_wm1"], params["tp_bm1"], params["tp_wm2"], params["tp_bm2"],
    )
    in_specs = [
        pl.BlockSpec((1, L, DIM), lambda b: (b, 0, 0)),
        pl.BlockSpec((1, P, TOKEN_DIM), lambda b: (b, 0, 0)),
    ] + [_bcast_spec(a.shape) for a in args[2:]]
    return pl.pallas_call(
        decoder_fused_kernel,
        grid=(bn,),
        in_specs=in_specs,
        out_specs=pl.BlockSpec((1, P, TOKEN_DIM), lambda b: (b, 0, 0)),
        out_shape=jax.ShapeDtypeStruct((bn, P, TOKEN_DIM), jnp.float32),
        compiler_params=pltpu.CompilerParams(dimension_semantics=("parallel",)),
    )(*args)


# ------------------------- host-side setup ---------------------------------------
def build_fold_matrix():
    # M[p, k*L + l] = 1 iff window l, kernel offset k lands on pixel p
    # (column order (k, l) matches the in-kernel patch construction).
    m = np.zeros((P, LK), dtype=np.float32)
    for li in range(L_SIDE):
        for lj in range(L_SIDE):
            l = li * L_SIDE + lj
            for kh in range(KH):
                for kw in range(KW):
                    y = li * STRIDE - PAD + kh
                    x = lj * STRIDE - PAD + kw
                    if 0 <= y < H_OUT and 0 <= x < H_OUT:
                        kpos = kh * KW + kw
                        m[y * H_OUT + x, kpos * L + l] = 1.0
    return jnp.asarray(m, BF16)   # entries 0/1: exact in bf16


def init_params(key):
    keys = jax.random.split(key, 23)

    def lin(k, fi, fo, s=0.02):
        return jax.random.normal(k, (fi, fo), jnp.float32) * s

    def bias(k, fo, s=0.01):
        return jax.random.normal(k, (1, fo), jnp.float32) * s

    p = {}
    # decoder_module.norm (LayerNorm(dim)) + .mlp
    p["ln_g"] = jnp.ones((1, DIM), F32)
    p["ln_b"] = jnp.zeros((1, DIM), F32)
    p["mlp_w1"] = lin(keys[0], DIM, TOKEN_DIM).astype(BF16)
    p["mlp_b1"] = bias(keys[1], TOKEN_DIM)
    p["mlp_w2"] = lin(keys[2], TOKEN_DIM, TOKEN_DIM).astype(BF16)
    p["mlp_b2"] = bias(keys[3], TOKEN_DIM)

    # .project — natural (torch/Fold) column order is d = c*9 + k; permute the
    # columns once so the kernel sees (k, c) order and needs no transpose.
    wp = lin(keys[4], TOKEN_DIM, TOKEN_DIM * KK)
    bp = bias(keys[5], TOKEN_DIM * KK)
    perm = np.array([(j % TOKEN_DIM) * KK + (j // TOKEN_DIM)
                     for j in range(TOKEN_DIM * KK)])
    p["proj_w"] = wp[:, perm].astype(BF16)
    p["proj_b"] = bp[:, perm]

    # .concatFuse — full Linear(2C -> C): rows [0:C) multiply the fold output,
    # rows [C:2C) multiply enc_fea (matches torch.cat([dec, enc], dim=2)).
    p["cf_w1"] = lin(keys[6], 2 * TOKEN_DIM, TOKEN_DIM).astype(BF16)
    p["cf_b1"] = bias(keys[7], TOKEN_DIM)
    p["cf_w2"] = lin(keys[8], TOKEN_DIM, TOKEN_DIM).astype(BF16)
    p["cf_b2"] = bias(keys[9], TOKEN_DIM)

    # .att = Token_performer(dim=token_dim, in_dim=token_dim, kernel_ratio=0.5)
    p["tp_g1"] = jnp.ones((1, TOKEN_DIM), F32)
    p["tp_b1"] = jnp.zeros((1, TOKEN_DIM), F32)
    wk = lin(keys[10], TOKEN_DIM, TOKEN_DIM); bk = bias(keys[11], TOKEN_DIM)
    wq = lin(keys[12], TOKEN_DIM, TOKEN_DIM); bq = bias(keys[13], TOKEN_DIM)
    wv = lin(keys[14], TOKEN_DIM, TOKEN_DIM); bv = bias(keys[15], TOKEN_DIM)
    p["tp_wkqv"] = jnp.concatenate([wk, wq, wv], axis=1).astype(BF16)   # (C, 3C)
    p["tp_bkqv"] = jnp.concatenate([bk, bq, bv], axis=1)                # (1, 3C)
    # random-feature matrix: orthogonal columns * sqrt(m); stored transposed (C, m)
    a = jax.random.normal(keys[16], (TOKEN_DIM, M_PRM), jnp.float32)
    qmat, _ = jnp.linalg.qr(a)
    p["tp_wprm"] = (qmat * np.float32(np.sqrt(M_PRM))).astype(BF16)
    p["tp_wpr"] = lin(keys[17], TOKEN_DIM, TOKEN_DIM).astype(BF16)
    p["tp_bpr"] = bias(keys[18], TOKEN_DIM)
    p["tp_g2"] = jnp.ones((1, TOKEN_DIM), F32)
    p["tp_b2"] = jnp.zeros((1, TOKEN_DIM), F32)
    p["tp_wm1"] = lin(keys[19], TOKEN_DIM, TOKEN_DIM).astype(BF16)
    p["tp_bm1"] = bias(keys[20], TOKEN_DIM)
    p["tp_wm2"] = lin(keys[21], TOKEN_DIM, TOKEN_DIM).astype(BF16)
    p["tp_bm2"] = bias(keys[22], TOKEN_DIM)
    return p


if __name__ == "__main__":
    key = jax.random.PRNGKey(0)
    kparam, kdec, kenc = jax.random.split(key, 3)
    params = init_params(kparam)
    dec_fea = jax.random.normal(kdec, (B, L, DIM), jnp.float32)          # (2, 16, 128)
    enc_fea = jax.random.normal(kenc, (B, P, TOKEN_DIM), jnp.float32)    # (2, 64, 64)
    fold_m = build_fold_matrix()

    fwd = jax.jit(decoder_forward)
    out = jax.block_until_ready(fwd(dec_fea, enc_fea, params, fold_m))
    assert out.shape == (B, P, TOKEN_DIM), out.shape
    assert bool(jnp.all(jnp.isfinite(out)))
    print("KERNEL_OK")
</pallas_src>

<mosaic_0001>
module attributes {stable_mosaic.version = 11 : i64} {
  func.func @decoder_fused_kernel(%arg0: i32, %arg1: memref<1x16x128xf32, #tpu.memory_space<vmem>>, %arg2: memref<1x64x64xf32, #tpu.memory_space<vmem>>, %arg3: memref<64x144xbf16, #tpu.memory_space<vmem>>, %arg4: memref<1x128xf32, #tpu.memory_space<vmem>>, %arg5: memref<1x128xf32, #tpu.memory_space<vmem>>, %arg6: memref<128x64xbf16, #tpu.memory_space<vmem>>, %arg7: memref<1x64xf32, #tpu.memory_space<vmem>>, %arg8: memref<64x64xbf16, #tpu.memory_space<vmem>>, %arg9: memref<1x64xf32, #tpu.memory_space<vmem>>, %arg10: memref<64x576xbf16, #tpu.memory_space<vmem>>, %arg11: memref<1x576xf32, #tpu.memory_space<vmem>>, %arg12: memref<128x64xbf16, #tpu.memory_space<vmem>>, %arg13: memref<1x64xf32, #tpu.memory_space<vmem>>, %arg14: memref<64x64xbf16, #tpu.memory_space<vmem>>, %arg15: memref<1x64xf32, #tpu.memory_space<vmem>>, %arg16: memref<1x64xf32, #tpu.memory_space<vmem>>, %arg17: memref<1x64xf32, #tpu.memory_space<vmem>>, %arg18: memref<64x192xbf16, #tpu.memory_space<vmem>>, %arg19: memref<1x192xf32, #tpu.memory_space<vmem>>, %arg20: memref<64x32xbf16, #tpu.memory_space<vmem>>, %arg21: memref<64x64xbf16, #tpu.memory_space<vmem>>, %arg22: memref<1x64xf32, #tpu.memory_space<vmem>>, %arg23: memref<1x64xf32, #tpu.memory_space<vmem>>, %arg24: memref<1x64xf32, #tpu.memory_space<vmem>>, %arg25: memref<64x64xbf16, #tpu.memory_space<vmem>>, %arg26: memref<1x64xf32, #tpu.memory_space<vmem>>, %arg27: memref<64x64xbf16, #tpu.memory_space<vmem>>, %arg28: memref<1x64xf32, #tpu.memory_space<vmem>>, %arg29: memref<1x64x64xf32, #tpu.memory_space<vmem>>) attributes {dimension_semantics = [#tpu.dimension_semantics<parallel>], iteration_bounds = array<i64: 2>, scalar_prefetch = 0 : i64, scratch_operands = 0 : i64, tpu.core_type = #tpu.core_type<tc>, window_params = [{transform_indices = @transform_0, window_bounds = array<i64: 1, 16, 128>}, {transform_indices = @transform_1, window_bounds = array<i64: 1, 64, 64>}, {pipeline_mode = #tpu.pipeline_mode<synchronous>, transform_indices = @transform_2, window_bounds = array<i64: 64, 144>}, {pipeline_mode = #tpu.pipeline_mode<synchronous>, transform_indices = @transform_3, window_bounds = array<i64: 1, 128>}, {pipeline_mode = #tpu.pipeline_mode<synchronous>, transform_indices = @transform_4, window_bounds = array<i64: 1, 128>}, {pipeline_mode = #tpu.pipeline_mode<synchronous>, transform_indices = @transform_5, window_bounds = array<i64: 128, 64>}, {pipeline_mode = #tpu.pipeline_mode<synchronous>, transform_indices = @transform_6, window_bounds = array<i64: 1, 64>}, {pipeline_mode = #tpu.pipeline_mode<synchronous>, transform_indices = @transform_7, window_bounds = array<i64: 64, 64>}, {pipeline_mode = #tpu.pipeline_mode<synchronous>, transform_indices = @transform_8, window_bounds = array<i64: 1, 64>}, {pipeline_mode = #tpu.pipeline_mode<synchronous>, transform_indices = @transform_9, window_bounds = array<i64: 64, 576>}, {pipeline_mode = #tpu.pipeline_mode<synchronous>, transform_indices = @transform_10, window_bounds = array<i64: 1, 576>}, {pipeline_mode = #tpu.pipeline_mode<synchronous>, transform_indices = @transform_11, window_bounds = array<i64: 128, 64>}, {pipeline_mode = #tpu.pipeline_mode<synchronous>, transform_indices = @transform_12, window_bounds = array<i64: 1, 64>}, {pipeline_mode = #tpu.pipeline_mode<synchronous>, transform_indices = @transform_13, window_bounds = array<i64: 64, 64>}, {pipeline_mode = #tpu.pipeline_mode<synchronous>, transform_indices = @transform_14, window_bounds = array<i64: 1, 64>}, {pipeline_mode = #tpu.pipeline_mode<synchronous>, transform_indices = @transform_15, window_bounds = array<i64: 1, 64>}, {pipeline_mode = #tpu.pipeline_mode<synchronous>, transform_indices = @transform_16, window_bounds = array<i64: 1, 64>}, {pipeline_mode = #tpu.pipeline_mode<synchronous>, transform_indices = @transform_17, window_bounds = array<i64: 64, 192>}, {pipeline_mode = #tpu.pipeline_mode<synchronous>, transform_indices = @transform_18, window_bounds = array<i64: 1, 192>}, {pipeline_mode = #tpu.pipeline_mode<synchronous>, transform_indices = @transform_19, window_bounds = array<i64: 64, 32>}, {pipeline_mode = #tpu.pipeline_mode<synchronous>, transform_indices = @transform_20, window_bounds = array<i64: 64, 64>}, {pipeline_mode = #tpu.pipeline_mode<synchronous>, transform_indices = @transform_21, window_bounds = array<i64: 1, 64>}, {pipeline_mode = #tpu.pipeline_mode<synchronous>, transform_indices = @transform_22, window_bounds = array<i64: 1, 64>}, {pipeline_mode = #tpu.pipeline_mode<synchronous>, transform_indices = @transform_23, window_bounds = array<i64: 1, 64>}, {pipeline_mode = #tpu.pipeline_mode<synchronous>, transform_indices = @transform_24, window_bounds = array<i64: 64, 64>}, {pipeline_mode = #tpu.pipeline_mode<synchronous>, transform_indices = @transform_25, window_bounds = array<i64: 1, 64>}, {pipeline_mode = #tpu.pipeline_mode<synchronous>, transform_indices = @transform_26, window_bounds = array<i64: 64, 64>}, {pipeline_mode = #tpu.pipeline_mode<synchronous>, transform_indices = @transform_27, window_bounds = array<i64: 1, 64>}, {transform_indices = @transform_28, window_bounds = array<i64: 1, 64, 64>}]} {
    %c0 = arith.constant 0 : index
    %c0_0 = arith.constant 0 : index
    %c0_1 = arith.constant 0 : index
    %0 = vector.load %arg1[%c0, %c0_0, %c0_1] : memref<1x16x128xf32, #tpu.memory_space<vmem>>, vector<1x16x128xf32>
    %1 = vector.shape_cast %0 : vector<1x16x128xf32> to vector<16x128xf32>
    %c0_2 = arith.constant 0 : index
    %c0_3 = arith.constant 0 : index
    %2 = vector.load %arg4[%c0_2, %c0_3] : memref<1x128xf32, #tpu.memory_space<vmem>>, vector<1x128xf32>
    %c0_4 = arith.constant 0 : index
    %c0_5 = arith.constant 0 : index
    %3 = vector.load %arg5[%c0_4, %c0_5] : memref<1x128xf32, #tpu.memory_space<vmem>>, vector<1x128xf32>
    %cst = arith.constant dense<0.000000e+00> : vector<16xf32>
    %4 = vector.multi_reduction <add>, %1, %cst [1] : vector<16x128xf32> to vector<16xf32>
    %5 = vector.shape_cast %4 : vector<16xf32> to vector<16x1xf32>
    %cst_6 = arith.constant 1.280000e+02 : f32
    %6 = vector.broadcast %cst_6 : f32 to vector<16x1xf32>
    %7 = arith.divf %5, %6 : vector<16x1xf32>
    %8 = vector.broadcast %7 : vector<16x1xf32> to vector<16x128xf32>
    %9 = arith.subf %1, %8 : vector<16x128xf32>
    %10 = arith.mulf %9, %9 : vector<16x128xf32>
    %cst_7 = arith.constant dense<0.000000e+00> : vector<16xf32>
    %11 = vector.multi_reduction <add>, %10, %cst_7 [1] : vector<16x128xf32> to vector<16xf32>
    %12 = vector.shape_cast %11 : vector<16xf32> to vector<16x1xf32>
    %cst_8 = arith.constant 1.280000e+02 : f32
    %13 = vector.broadcast %cst_8 : f32 to vector<16x1xf32>
    %14 = arith.divf %12, %13 : vector<16x1xf32>
    %15 = vector.broadcast %7 : vector<16x1xf32> to vector<16x128xf32>
    %16 = arith.subf %1, %15 : vector<16x128xf32>
    %cst_9 = arith.constant 9.99999974E-6 : f32
    %17 = vector.broadcast %cst_9 : f32 to vector<16x1xf32>
    %18 = arith.addf %14, %17 : vector<16x1xf32>
    %19 = math.rsqrt %18 : vector<16x1xf32>
    %20 = vector.broadcast %19 : vector<16x1xf32> to vector<16x128xf32>
    %21 = arith.mulf %16, %20 : vector<16x128xf32>
    %22 = vector.broadcast %2 : vector<1x128xf32> to vector<16x128xf32>
    %23 = arith.mulf %21, %22 : vector<16x128xf32>
    %24 = vector.broadcast %3 : vector<1x128xf32> to vector<16x128xf32>
    %25 = arith.addf %23, %24 : vector<16x128xf32>
    %c0_10 = arith.constant 0 : index
    %c0_11 = arith.constant 0 : index
    %26 = vector.load %arg6[%c0_10, %c0_11] : memref<128x64xbf16, #tpu.memory_space<vmem>>, vector<128x64xbf16>
    %c0_12 = arith.constant 0 : index
    %c0_13 = arith.constant 0 : index
    %27 = vector.load %arg7[%c0_12, %c0_13] : memref<1x64xf32, #tpu.memory_space<vmem>>, vector<1x64xf32>
    %28 = arith.truncf %25 : vector<16x128xf32> to vector<16x128xbf16>
    %cst_14 = arith.constant dense<0.000000e+00> : vector<16x64xf32>
    %29 = tpu.matmul %28, %26, %cst_14 {dimension_numbers = #tpu.dot_dimension_numbers<[1], [0], [0], [1], [0, 0, 1, 1], [], []>} : vector<16x128xbf16>, vector<128x64xbf16>, vector<16x64xf32> -> vector<16x64xf32>
    %30 = vector.broadcast %27 : vector<1x64xf32> to vector<16x64xf32>
    %31 = arith.addf %29, %30 : vector<16x64xf32>
    %cst_15 = arith.constant 5.000000e-01 : f32
    %32 = vector.broadcast %cst_15 : f32 to vector<16x64xf32>
    %33 = arith.mulf %32, %31 : vector<16x64xf32>
    %cst_16 = arith.constant 4.471500e-02 : f32
    %34 = vector.broadcast %cst_16 : f32 to vector<16x64xf32>
    %35 = arith.mulf %34, %31 : vector<16x64xf32>
    %36 = arith.mulf %35, %31 : vector<16x64xf32>
    %37 = arith.mulf %36, %31 : vector<16x64xf32>
    %38 = arith.addf %31, %37 : vector<16x64xf32>
    %cst_17 = arith.constant 0.797884583 : f32
    %39 = vector.broadcast %cst_17 : f32 to vector<16x64xf32>
    %40 = arith.mulf %39, %38 : vector<16x64xf32>
    %41 = math.tanh %40 : vector<16x64xf32>
    %cst_18 = arith.constant 1.000000e+00 : f32
    %42 = vector.broadcast %cst_18 : f32 to vector<16x64xf32>
    %43 = arith.addf %42, %41 : vector<16x64xf32>
    %44 = arith.mulf %33, %43 : vector<16x64xf32>
    %c0_19 = arith.constant 0 : index
    %c0_20 = arith.constant 0 : index
    %45 = vector.load %arg8[%c0_19, %c0_20] : memref<64x64xbf16, #tpu.memory_space<vmem>>, vector<64x64xbf16>
    %c0_21 = arith.constant 0 : index
    %c0_22 = arith.constant 0 : index
    %46 = vector.load %arg9[%c0_21, %c0_22] : memref<1x64xf32, #tpu.memory_space<vmem>>, vector<1x64xf32>
    %47 = arith.truncf %44 : vector<16x64xf32> to vector<16x64xbf16>
    %cst_23 = arith.constant dense<0.000000e+00> : vector<16x64xf32>
    %48 = tpu.matmul %47, %45, %cst_23 {dimension_numbers = #tpu.dot_dimension_numbers<[1], [0], [0], [1], [0, 0, 1, 1], [], []>} : vector<16x64xbf16>, vector<64x64xbf16>, vector<16x64xf32> -> vector<16x64xf32>
    %49 = vector.broadcast %46 : vector<1x64xf32> to vector<16x64xf32>
    %50 = arith.addf %48, %49 : vector<16x64xf32>
    %c0_24 = arith.constant 0 : index
    %c0_25 = arith.constant 0 : index
    %51 = vector.load %arg10[%c0_24, %c0_25] : memref<64x576xbf16, #tpu.memory_space<vmem>>, vector<64x576xbf16>
    %c0_26 = arith.constant 0 : index
    %c0_27 = arith.constant 0 : index
    %52 = vector.load %arg11[%c0_26, %c0_27] : memref<1x576xf32, #tpu.memory_space<vmem>>, vector<1x576xf32>
    %53 = arith.truncf %50 : vector<16x64xf32> to vector<16x64xbf16>
    %cst_28 = arith.constant dense<0.000000e+00> : vector<16x576xf32>
    %54 = tpu.matmul %53, %51, %cst_28 {dimension_numbers = #tpu.dot_dimension_numbers<[1], [0], [0], [1], [0, 0, 1, 1], [], []>} : vector<16x64xbf16>, vector<64x576xbf16>, vector<16x576xf32> -> vector<16x576xf32>
    %55 = vector.broadcast %52 : vector<1x576xf32> to vector<16x576xf32>
    %56 = arith.addf %54, %55 : vector<16x576xf32>
    %57 = vector.extract_strided_slice %56 {offsets = [0, 0], sizes = [16, 64], strides = [1, 1]} : vector<16x576xf32> to vector<16x64xf32>
    %58 = vector.extract_strided_slice %56 {offsets = [0, 64], sizes = [16, 64], strides = [1, 1]} : vector<16x576xf32> to vector<16x64xf32>
    %59 = vector.extract_strided_slice %56 {offsets = [0, 128], sizes = [16, 64], strides = [1, 1]} : vector<16x576xf32> to vector<16x64xf32>
    %60 = vector.extract_strided_slice %56 {offsets = [0, 192], sizes = [16, 64], strides = [1, 1]} : vector<16x576xf32> to vector<16x64xf32>
    %61 = vector.extract_strided_slice %56 {offsets = [0, 256], sizes = [16, 64], strides = [1, 1]} : vector<16x576xf32> to vector<16x64xf32>
    %62 = vector.extract_strided_slice %56 {offsets = [0, 320], sizes = [16, 64], strides = [1, 1]} : vector<16x576xf32> to vector<16x64xf32>
    %63 = vector.extract_strided_slice %56 {offsets = [0, 384], sizes = [16, 64], strides = [1, 1]} : vector<16x576xf32> to vector<16x64xf32>
    %64 = vector.extract_strided_slice %56 {offsets = [0, 448], sizes = [16, 64], strides = [1, 1]} : vector<16x576xf32> to vector<16x64xf32>
    %65 = vector.extract_strided_slice %56 {offsets = [0, 512], sizes = [16, 64], strides = [1, 1]} : vector<16x576xf32> to vector<16x64xf32>
    %66 = tpu.concatenate %57, %58, %59, %60, %61, %62, %63, %64, %65 in 0 : vector<16x64xf32>, vector<16x64xf32>, vector<16x64xf32>, vector<16x64xf32>, vector<16x64xf32>, vector<16x64xf32>, vector<16x64xf32>, vector<16x64xf32>, vector<16x64xf32> -> vector<144x64xf32>
    %c0_29 = arith.constant 0 : index
    %c0_30 = arith.constant 0 : index
    %67 = vector.load %arg3[%c0_29, %c0_30] : memref<64x144xbf16, #tpu.memory_space<vmem>>, vector<64x144xbf16>
    %68 = arith.truncf %66 : vector<144x64xf32> to vector<144x64xbf16>
    %cst_31 = arith.constant dense<0.000000e+00> : vector<64x64xf32>
    %69 = tpu.matmul %67, %68, %cst_31 {dimension_numbers = #tpu.dot_dimension_numbers<[1], [0], [0], [1], [0, 0, 1, 1], [], []>} : vector<64x144xbf16>, vector<144x64xbf16>, vector<64x64xf32> -> vector<64x64xf32>
    %c0_32 = arith.constant 0 : index
    %c0_33 = arith.constant 0 : index
    %c0_34 = arith.constant 0 : index
    %70 = vector.load %arg2[%c0_32, %c0_33, %c0_34] : memref<1x64x64xf32, #tpu.memory_space<vmem>>, vector<1x64x64xf32>
    %71 = vector.shape_cast %70 : vector<1x64x64xf32> to vector<64x64xf32>
    %72 = tpu.concatenate %69, %71 in 1 : vector<64x64xf32>, vector<64x64xf32> -> vector<64x128xf32>
    %c0_35 = arith.constant 0 : index
    %c0_36 = arith.constant 0 : index
    %73 = vector.load %arg12[%c0_35, %c0_36] : memref<128x64xbf16, #tpu.memory_space<vmem>>, vector<128x64xbf16>
    %c0_37 = arith.constant 0 : index
    %c0_38 = arith.constant 0 : index
    %74 = vector.load %arg13[%c0_37, %c0_38] : memref<1x64xf32, #tpu.memory_space<vmem>>, vector<1x64xf32>
    %75 = arith.truncf %72 : vector<64x128xf32> to vector<64x128xbf16>
    %cst_39 = arith.constant dense<0.000000e+00> : vector<64x64xf32>
    %76 = tpu.matmul %75, %73, %cst_39 {dimension_numbers = #tpu.dot_dimension_numbers<[1], [0], [0], [1], [0, 0, 1, 1], [], []>} : vector<64x128xbf16>, vector<128x64xbf16>, vector<64x64xf32> -> vector<64x64xf32>
    %77 = vector.broadcast %74 : vector<1x64xf32> to vector<64x64xf32>
    %78 = arith.addf %76, %77 : vector<64x64xf32>
    %cst_40 = arith.constant 5.000000e-01 : f32
    %79 = vector.broadcast %cst_40 : f32 to vector<64x64xf32>
    %80 = arith.mulf %79, %78 : vector<64x64xf32>
    %cst_41 = arith.constant 4.471500e-02 : f32
    %81 = vector.broadcast %cst_41 : f32 to vector<64x64xf32>
    %82 = arith.mulf %81, %78 : vector<64x64xf32>
    %83 = arith.mulf %82, %78 : vector<64x64xf32>
    %84 = arith.mulf %83, %78 : vector<64x64xf32>
    %85 = arith.addf %78, %84 : vector<64x64xf32>
    %cst_42 = arith.constant 0.797884583 : f32
    %86 = vector.broadcast %cst_42 : f32 to vector<64x64xf32>
    %87 = arith.mulf %86, %85 : vector<64x64xf32>
    %88 = math.tanh %87 : vector<64x64xf32>
    %cst_43 = arith.constant 1.000000e+00 : f32
    %89 = vector.broadcast %cst_43 : f32 to vector<64x64xf32>
    %90 = arith.addf %89, %88 : vector<64x64xf32>
    %91 = arith.mulf %80, %90 : vector<64x64xf32>
    %c0_44 = arith.constant 0 : index
    %c0_45 = arith.constant 0 : index
    %92 = vector.load %arg14[%c0_44, %c0_45] : memref<64x64xbf16, #tpu.memory_space<vmem>>, vector<64x64xbf16>
    %c0_46 = arith.constant 0 : index
    %c0_47 = arith.constant 0 : index
    %93 = vector.load %arg15[%c0_46, %c0_47] : memref<1x64xf32, #tpu.memory_space<vmem>>, vector<1x64xf32>
    %94 = arith.truncf %91 : vector<64x64xf32> to vector<64x64xbf16>
    %cst_48 = arith.constant dense<0.000000e+00> : vector<64x64xf32>
    %95 = tpu.matmul %94, %92, %cst_48 {dimension_numbers = #tpu.dot_dimension_numbers<[1], [0], [0], [1], [0, 0, 1, 1], [], []>} : vector<64x64xbf16>, vector<64x64xbf16>, vector<64x64xf32> -> vector<64x64xf32>
    %96 = vector.broadcast %93 : vector<1x64xf32> to vector<64x64xf32>
    %97 = arith.addf %95, %96 : vector<64x64xf32>
    %c0_49 = arith.constant 0 : index
    %c0_50 = arith.constant 0 : index
    %98 = vector.load %arg16[%c0_49, %c0_50] : memref<1x64xf32, #tpu.memory_space<vmem>>, vector<1x64xf32>
    %c0_51 = arith.constant 0 : index
    %c0_52 = arith.constant 0 : index
    %99 = vector.load %arg17[%c0_51, %c0_52] : memref<1x64xf32, #tpu.memory_space<vmem>>, vector<1x64xf32>
    %cst_53 = arith.constant dense<0.000000e+00> : vector<64xf32>
    %100 = vector.multi_reduction <add>, %97, %cst_53 [1] : vector<64x64xf32> to vector<64xf32>
    %101 = vector.shape_cast %100 : vector<64xf32> to vector<64x1xf32>
    %cst_54 = arith.constant 6.400000e+01 : f32
    %102 = vector.broadcast %cst_54 : f32 to vector<64x1xf32>
    %103 = arith.divf %101, %102 : vector<64x1xf32>
    %104 = vector.broadcast %103 : vector<64x1xf32> to vector<64x64xf32>
    %105 = arith.subf %97, %104 : vector<64x64xf32>
    %106 = arith.mulf %105, %105 : vector<64x64xf32>
    %cst_55 = arith.constant dense<0.000000e+00> : vector<64xf32>
    %107 = vector.multi_reduction <add>, %106, %cst_55 [1] : vector<64x64xf32> to vector<64xf32>
    %108 = vector.shape_cast %107 : vector<64xf32> to vector<64x1xf32>
    %cst_56 = arith.constant 6.400000e+01 : f32
    %109 = vector.broadcast %cst_56 : f32 to vector<64x1xf32>
    %110 = arith.divf %108, %109 : vector<64x1xf32>
    %111 = vector.broadcast %103 : vector<64x1xf32> to vector<64x64xf32>
    %112 = arith.subf %97, %111 : vector<64x64xf32>
    %cst_57 = arith.constant 9.99999974E-6 : f32
    %113 = vector.broadcast %cst_57 : f32 to vector<64x1xf32>
    %114 = arith.addf %110, %113 : vector<64x1xf32>
    %115 = math.rsqrt %114 : vector<64x1xf32>
    %116 = vector.broadcast %115 : vector<64x1xf32> to vector<64x64xf32>
    %117 = arith.mulf %112, %116 : vector<64x64xf32>
    %118 = vector.broadcast %98 : vector<1x64xf32> to vector<64x64xf32>
    %119 = arith.mulf %117, %118 : vector<64x64xf32>
    %120 = vector.broadcast %99 : vector<1x64xf32> to vector<64x64xf32>
    %121 = arith.addf %119, %120 : vector<64x64xf32>
    %c0_58 = arith.constant 0 : index
    %c0_59 = arith.constant 0 : index
    %122 = vector.load %arg18[%c0_58, %c0_59] : memref<64x192xbf16, #tpu.memory_space<vmem>>, vector<64x192xbf16>
    %c0_60 = arith.constant 0 : index
    %c0_61 = arith.constant 0 : index
    %123 = vector.load %arg19[%c0_60, %c0_61] : memref<1x192xf32, #tpu.memory_space<vmem>>, vector<1x192xf32>
    %124 = arith.truncf %121 : vector<64x64xf32> to vector<64x64xbf16>
    %cst_62 = arith.constant dense<0.000000e+00> : vector<64x192xf32>
    %125 = tpu.matmul %124, %122, %cst_62 {dimension_numbers = #tpu.dot_dimension_numbers<[1], [0], [0], [1], [0, 0, 1, 1], [], []>} : vector<64x64xbf16>, vector<64x192xbf16>, vector<64x192xf32> -> vector<64x192xf32>
    %126 = vector.broadcast %123 : vector<1x192xf32> to vector<64x192xf32>
    %127 = arith.addf %125, %126 : vector<64x192xf32>
    %128 = vector.extract_strided_slice %127 {offsets = [0, 0], sizes = [64, 64], strides = [1, 1]} : vector<64x192xf32> to vector<64x64xf32>
    %129 = vector.extract_strided_slice %127 {offsets = [0, 64], sizes = [64, 64], strides = [1, 1]} : vector<64x192xf32> to vector<64x64xf32>
    %130 = vector.extract_strided_slice %127 {offsets = [0, 128], sizes = [64, 64], strides = [1, 1]} : vector<64x192xf32> to vector<64x64xf32>
    %131 = tpu.concatenate %128, %129 in 0 : vector<64x64xf32>, vector<64x64xf32> -> vector<128x64xf32>
    %132 = arith.mulf %131, %131 : vector<128x64xf32>
    %cst_63 = arith.constant dense<0.000000e+00> : vector<128xf32>
    %133 = vector.multi_reduction <add>, %132, %cst_63 [1] : vector<128x64xf32> to vector<128xf32>
    %134 = vector.shape_cast %133 : vector<128xf32> to vector<128x1xf32>
    %cst_64 = arith.constant 5.000000e-01 : f32
    %135 = vector.broadcast %cst_64 : f32 to vector<128x1xf32>
    %136 = arith.mulf %135, %134 : vector<128x1xf32>
    %c0_65 = arith.constant 0 : index
    %c0_66 = arith.constant 0 : index
    %137 = vector.load %arg20[%c0_65, %c0_66] : memref<64x32xbf16, #tpu.memory_space<vmem>>, vector<64x32xbf16>
    %138 = arith.truncf %131 : vector<128x64xf32> to vector<128x64xbf16>
    %cst_67 = arith.constant dense<0.000000e+00> : vector<128x32xf32>
    %139 = tpu.matmul %138, %137, %cst_67 {dimension_numbers = #tpu.dot_dimension_numbers<[1], [0], [0], [1], [0, 0, 1, 1], [], []>} : vector<128x64xbf16>, vector<64x32xbf16>, vector<128x32xf32> -> vector<128x32xf32>
    %140 = vector.broadcast %136 : vector<128x1xf32> to vector<128x32xf32>
    %141 = arith.subf %139, %140 : vector<128x32xf32>
    %142 = math.exp %141 : vector<128x32xf32>
    %cst_68 = arith.constant 0.176776692 : f32
    %143 = vector.broadcast %cst_68 : f32 to vector<128x32xf32>
    %144 = arith.mulf %142, %143 : vector<128x32xf32>
    %145 = vector.extract_strided_slice %144 {offsets = [0, 0], sizes = [64, 32], strides = [1, 1]} : vector<128x32xf32> to vector<64x32xf32>
    %146 = vector.extract_strided_slice %144 {offsets = [64, 0], sizes = [64, 32], strides = [1, 1]} : vector<128x32xf32> to vector<64x32xf32>
    %cst_69 = arith.constant dense<0.000000e+00> : vector<32xf32>
    %147 = vector.multi_reduction <add>, %145, %cst_69 [0] : vector<64x32xf32> to vector<32xf32>
    %148 = vector.shape_cast %147 : vector<32xf32> to vector<1x32xf32>
    %149 = vector.broadcast %148 : vector<1x32xf32> to vector<64x32xf32>
    %150 = arith.mulf %146, %149 : vector<64x32xf32>
    %cst_70 = arith.constant dense<0.000000e+00> : vector<64xf32>
    %151 = vector.multi_reduction <add>, %150, %cst_70 [1] : vector<64x32xf32> to vector<64xf32>
    %152 = vector.shape_cast %151 : vector<64xf32> to vector<64x1xf32>
    %153 = arith.truncf %145 : vector<64x32xf32> to vector<64x32xbf16>
    %154 = arith.truncf %130 : vector<64x64xf32> to vector<64x64xbf16>
    %cst_71 = arith.constant dense<0.000000e+00> : vector<32x64xf32>
    %155 = tpu.matmul %153, %154, %cst_71 {dimension_numbers = #tpu.dot_dimension_numbers<[0], [0], [1], [1], [0, 1, 1, 1], [], []>} : vector<64x32xbf16>, vector<64x64xbf16>, vector<32x64xf32> -> vector<32x64xf32>
    %156 = arith.truncf %155 : vector<32x64xf32> to vector<32x64xbf16>
    %157 = arith.truncf %146 : vector<64x32xf32> to vector<64x32xbf16>
    %cst_72 = arith.constant dense<0.000000e+00> : vector<64x64xf32>
    %158 = tpu.matmul %157, %156, %cst_72 {dimension_numbers = #tpu.dot_dimension_numbers<[1], [0], [0], [1], [0, 0, 1, 1], [], []>} : vector<64x32xbf16>, vector<32x64xbf16>, vector<64x64xf32> -> vector<64x64xf32>
    %cst_73 = arith.constant 9.99999993E-9 : f32
    %159 = vector.broadcast %cst_73 : f32 to vector<64x1xf32>
    %160 = arith.addf %152, %159 : vector<64x1xf32>
    %161 = vector.broadcast %160 : vector<64x1xf32> to vector<64x64xf32>
    %162 = arith.divf %158, %161 : vector<64x64xf32>
    %c0_74 = arith.constant 0 : index
    %c0_75 = arith.constant 0 : index
    %163 = vector.load %arg21[%c0_74, %c0_75] : memref<64x64xbf16, #tpu.memory_space<vmem>>, vector<64x64xbf16>
    %c0_76 = arith.constant 0 : index
    %c0_77 = arith.constant 0 : index
    %164 = vector.load %arg22[%c0_76, %c0_77] : memref<1x64xf32, #tpu.memory_space<vmem>>, vector<1x64xf32>
    %165 = arith.truncf %162 : vector<64x64xf32> to vector<64x64xbf16>
    %cst_78 = arith.constant dense<0.000000e+00> : vector<64x64xf32>
    %166 = tpu.matmul %165, %163, %cst_78 {dimension_numbers = #tpu.dot_dimension_numbers<[1], [0], [0], [1], [0, 0, 1, 1], [], []>} : vector<64x64xbf16>, vector<64x64xbf16>, vector<64x64xf32> -> vector<64x64xf32>
    %167 = vector.broadcast %164 : vector<1x64xf32> to vector<64x64xf32>
    %168 = arith.addf %166, %167 : vector<64x64xf32>
    %169 = arith.addf %130, %168 : vector<64x64xf32>
    %c0_79 = arith.constant 0 : index
    %c0_80 = arith.constant 0 : index
    %170 = vector.load %arg23[%c0_79, %c0_80] : memref<1x64xf32, #tpu.memory_space<vmem>>, vector<1x64xf32>
    %c0_81 = arith.constant 0 : index
    %c0_82 = arith.constant 0 : index
    %171 = vector.load %arg24[%c0_81, %c0_82] : memref<1x64xf32, #tpu.memory_space<vmem>>, vector<1x64xf32>
    %cst_83 = arith.constant dense<0.000000e+00> : vector<64xf32>
    %172 = vector.multi_reduction <add>, %169, %cst_83 [1] : vector<64x64xf32> to vector<64xf32>
    %173 = vector.shape_cast %172 : vector<64xf32> to vector<64x1xf32>
    %cst_84 = arith.constant 6.400000e+01 : f32
    %174 = vector.broadcast %cst_84 : f32 to vector<64x1xf32>
    %175 = arith.divf %173, %174 : vector<64x1xf32>
    %176 = vector.broadcast %175 : vector<64x1xf32> to vector<64x64xf32>
    %177 = arith.subf %169, %176 : vector<64x64xf32>
    %178 = arith.mulf %177, %177 : vector<64x64xf32>
    %cst_85 = arith.constant dense<0.000000e+00> : vector<64xf32>
    %179 = vector.multi_reduction <add>, %178, %cst_85 [1] : vector<64x64xf32> to vector<64xf32>
    %180 = vector.shape_cast %179 : vector<64xf32> to vector<64x1xf32>
    %cst_86 = arith.constant 6.400000e+01 : f32
    %181 = vector.broadcast %cst_86 : f32 to vector<64x1xf32>
    %182 = arith.divf %180, %181 : vector<64x1xf32>
    %183 = vector.broadcast %175 : vector<64x1xf32> to vector<64x64xf32>
    %184 = arith.subf %169, %183 : vector<64x64xf32>
    %cst_87 = arith.constant 9.99999974E-6 : f32
    %185 = vector.broadcast %cst_87 : f32 to vector<64x1xf32>
    %186 = arith.addf %182, %185 : vector<64x1xf32>
    %187 = math.rsqrt %186 : vector<64x1xf32>
    %188 = vector.broadcast %187 : vector<64x1xf32> to vector<64x64xf32>
    %189 = arith.mulf %184, %188 : vector<64x64xf32>
    %190 = vector.broadcast %170 : vector<1x64xf32> to vector<64x64xf32>
    %191 = arith.mulf %189, %190 : vector<64x64xf32>
    %192 = vector.broadcast %171 : vector<1x64xf32> to vector<64x64xf32>
    %193 = arith.addf %191, %192 : vector<64x64xf32>
    %c0_88 = arith.constant 0 : index
    %c0_89 = arith.constant 0 : index
    %194 = vector.load %arg25[%c0_88, %c0_89] : memref<64x64xbf16, #tpu.memory_space<vmem>>, vector<64x64xbf16>
    %c0_90 = arith.constant 0 : index
    %c0_91 = arith.constant 0 : index
    %195 = vector.load %arg26[%c0_90, %c0_91] : memref<1x64xf32, #tpu.memory_space<vmem>>, vector<1x64xf32>
    %196 = arith.truncf %193 : vector<64x64xf32> to vector<64x64xbf16>
    %cst_92 = arith.constant dense<0.000000e+00> : vector<64x64xf32>
    %197 = tpu.matmul %196, %194, %cst_92 {dimension_numbers = #tpu.dot_dimension_numbers<[1], [0], [0], [1], [0, 0, 1, 1], [], []>} : vector<64x64xbf16>, vector<64x64xbf16>, vector<64x64xf32> -> vector<64x64xf32>
    %198 = vector.broadcast %195 : vector<1x64xf32> to vector<64x64xf32>
    %199 = arith.addf %197, %198 : vector<64x64xf32>
    %cst_93 = arith.constant 5.000000e-01 : f32
    %200 = vector.broadcast %cst_93 : f32 to vector<64x64xf32>
    %201 = arith.mulf %200, %199 : vector<64x64xf32>
    %cst_94 = arith.constant 4.471500e-02 : f32
    %202 = vector.broadcast %cst_94 : f32 to vector<64x64xf32>
    %203 = arith.mulf %202, %199 : vector<64x64xf32>
    %204 = arith.mulf %203, %199 : vector<64x64xf32>
    %205 = arith.mulf %204, %199 : vector<64x64xf32>
    %206 = arith.addf %199, %205 : vector<64x64xf32>
    %cst_95 = arith.constant 0.797884583 : f32
    %207 = vector.broadcast %cst_95 : f32 to vector<64x64xf32>
    %208 = arith.mulf %207, %206 : vector<64x64xf32>
    %209 = math.tanh %208 : vector<64x64xf32>
    %cst_96 = arith.constant 1.000000e+00 : f32
    %210 = vector.broadcast %cst_96 : f32 to vector<64x64xf32>
    %211 = arith.addf %210, %209 : vector<64x64xf32>
    %212 = arith.mulf %201, %211 : vector<64x64xf32>
    %c0_97 = arith.constant 0 : index
    %c0_98 = arith.constant 0 : index
    %213 = vector.load %arg27[%c0_97, %c0_98] : memref<64x64xbf16, #tpu.memory_space<vmem>>, vector<64x64xbf16>
    %c0_99 = arith.constant 0 : index
    %c0_100 = arith.constant 0 : index
    %214 = vector.load %arg28[%c0_99, %c0_100] : memref<1x64xf32, #tpu.memory_space<vmem>>, vector<1x64xf32>
    %215 = arith.truncf %212 : vector<64x64xf32> to vector<64x64xbf16>
    %cst_101 = arith.constant dense<0.000000e+00> : vector<64x64xf32>
    %216 = tpu.matmul %215, %213, %cst_101 {dimension_numbers = #tpu.dot_dimension_numbers<[1], [0], [0], [1], [0, 0, 1, 1], [], []>} : vector<64x64xbf16>, vector<64x64xbf16>, vector<64x64xf32> -> vector<64x64xf32>
    %217 = vector.broadcast %214 : vector<1x64xf32> to vector<64x64xf32>
    %218 = arith.addf %216, %217 : vector<64x64xf32>
    %219 = arith.addf %169, %218 : vector<64x64xf32>
    %c0_102 = arith.constant 0 : index
    %c0_103 = arith.constant 0 : index
    %c0_104 = arith.constant 0 : index
    %220 = vector.load %arg29[%c0_102, %c0_103, %c0_104] : memref<1x64x64xf32, #tpu.memory_space<vmem>>, vector<1x64x64xf32>
    %221 = vector.shape_cast %220 : vector<1x64x64xf32> to vector<64x64xf32>
    %222 = vector.shape_cast %219 : vector<64x64xf32> to vector<1x64x64xf32>
    tpu.vector_store %arg29[%c0_102, %c0_103, %c0_104], %222 {strides = array<i32>} : memref<1x64x64xf32, #tpu.memory_space<vmem>>, vector<1x64x64xf32>,
    return
  }
  func.func @transform_0(%arg0: i32) -> (i32, i32, i32) {
    %c0_i32 = arith.constant 0 : i32
    %c0_i32_0 = arith.constant 0 : i32
    %c0_i32_1 = arith.constant 0 : i32
    return %arg0, %c0_i32, %c0_i32_0 : i32, i32, i32
  }
  func.func @transform_1(%arg0: i32) -> (i32, i32, i32) {
    %c0_i32 = arith.constant 0 : i32
    %c0_i32_0 = arith.constant 0 : i32
    %c0_i32_1 = arith.constant 0 : i32
    return %arg0, %c0_i32, %c0_i32_0 : i32, i32, i32
  }
  func.func @transform_2(%arg0: i32) -> (i32, i32) {
    %c0_i32 = arith.constant 0 : i32
    %c0_i32_0 = arith.constant 0 : i32
    %c0_i32_1 = arith.constant 0 : i32
    return %c0_i32, %c0_i32_0 : i32, i32
  }
  func.func @transform_3(%arg0: i32) -> (i32, i32) {
    %c0_i32 = arith.constant 0 : i32
    %c0_i32_0 = arith.constant 0 : i32
    %c0_i32_1 = arith.constant 0 : i32
    return %c0_i32, %c0_i32_0 : i32, i32
  }
  func.func @transform_4(%arg0: i32) -> (i32, i32) {
    %c0_i32 = arith.constant 0 : i32
    %c0_i32_0 = arith.constant 0 : i32
    %c0_i32_1 = arith.constant 0 : i32
    return %c0_i32, %c0_i32_0 : i32, i32
  }
  func.func @transform_5(%arg0: i32) -> (i32, i32) {
    %c0_i32 = arith.constant 0 : i32
    %c0_i32_0 = arith.constant 0 : i32
    %c0_i32_1 = arith.constant 0 : i32
    return %c0_i32, %c0_i32_0 : i32, i32
  }
  func.func @transform_6(%arg0: i32) -> (i32, i32) {
    %c0_i32 = arith.constant 0 : i32
    %c0_i32_0 = arith.constant 0 : i32
    %c0_i32_1 = arith.constant 0 : i32
    return %c0_i32, %c0_i32_0 : i32, i32
  }
  func.func @transform_7(%arg0: i32) -> (i32, i32) {
    %c0_i32 = arith.constant 0 : i32
    %c0_i32_0 = arith.constant 0 : i32
    %c0_i32_1 = arith.constant 0 : i32
    return %c0_i32, %c0_i32_0 : i32, i32
  }
  func.func @transform_8(%arg0: i32) -> (i32, i32) {
    %c0_i32 = arith.constant 0 : i32
    %c0_i32_0 = arith.constant 0 : i32
    %c0_i32_1 = arith.constant 0 : i32
    return %c0_i32, %c0_i32_0 : i32, i32
  }
  func.func @transform_9(%arg0: i32) -> (i32, i32) {
    %c0_i32 = arith.constant 0 : i32
    %c0_i32_0 = arith.constant 0 : i32
    %c0_i32_1 = arith.constant 0 : i32
    return %c0_i32, %c0_i32_0 : i32, i32
  }
  func.func @transform_10(%arg0: i32) -> (i32, i32) {
    %c0_i32 = arith.constant 0 : i32
    %c0_i32_0 = arith.constant 0 : i32
    %c0_i32_1 = arith.constant 0 : i32
    return %c0_i32, %c0_i32_0 : i32, i32
  }
  func.func @transform_11(%arg0: i32) -> (i32, i32) {
    %c0_i32 = arith.constant 0 : i32
    %c0_i32_0 = arith.constant 0 : i32
    %c0_i32_1 = arith.constant 0 : i32
    return %c0_i32, %c0_i32_0 : i32, i32
  }
  func.func @transform_12(%arg0: i32) -> (i32, i32) {
    %c0_i32 = arith.constant 0 : i32
    %c0_i32_0 = arith.constant 0 : i32
    %c0_i32_1 = arith.constant 0 : i32
    return %c0_i32, %c0_i32_0 : i32, i32
  }
  func.func @transform_13(%arg0: i32) -> (i32, i32) {
    %c0_i32 = arith.constant 0 : i32
    %c0_i32_0 = arith.constant 0 : i32
    %c0_i32_1 = arith.constant 0 : i32
    return %c0_i32, %c0_i32_0 : i32, i32
  }
  func.func @transform_14(%arg0: i32) -> (i32, i32) {
    %c0_i32 = arith.constant 0 : i32
    %c0_i32_0 = arith.constant 0 : i32
    %c0_i32_1 = arith.constant 0 : i32
    return %c0_i32, %c0_i32_0 : i32, i32
  }
  func.func @transform_15(%arg0: i32) -> (i32, i32) {
    %c0_i32 = arith.constant 0 : i32
    %c0_i32_0 = arith.constant 0 : i32
    %c0_i32_1 = arith.constant 0 : i32
    return %c0_i32, %c0_i32_0 : i32, i32
  }
  func.func @transform_16(%arg0: i32) -> (i32, i32) {
    %c0_i32 = arith.constant 0 : i32
    %c0_i32_0 = arith.constant 0 : i32
    %c0_i32_1 = arith.constant 0 : i32
    return %c0_i32, %c0_i32_0 : i32, i32
  }
  func.func @transform_17(%arg0: i32) -> (i32, i32) {
    %c0_i32 = arith.constant 0 : i32
    %c0_i32_0 = arith.constant 0 : i32
    %c0_i32_1 = arith.constant 0 : i32
    return %c0_i32, %c0_i32_0 : i32, i32
  }
  func.func @transform_18(%arg0: i32) -> (i32, i32) {
    %c0_i32 = arith.constant 0 : i32
    %c0_i32_0 = arith.constant 0 : i32
    %c0_i32_1 = arith.constant 0 : i32
    return %c0_i32, %c0_i32_0 : i32, i32
  }
  func.func @transform_19(%arg0: i32) -> (i32, i32) {
    %c0_i32 = arith.constant 0 : i32
    %c0_i32_0 = arith.constant 0 : i32
    %c0_i32_1 = arith.constant 0 : i32
    return %c0_i32, %c0_i32_0 : i32, i32
  }
  func.func @transform_20(%arg0: i32) -> (i32, i32) {
    %c0_i32 = arith.constant 0 : i32
    %c0_i32_0 = arith.constant 0 : i32
    %c0_i32_1 = arith.constant 0 : i32
    return %c0_i32, %c0_i32_0 : i32, i32
  }
  func.func @transform_21(%arg0: i32) -> (i32, i32) {
    %c0_i32 = arith.constant 0 : i32
    %c0_i32_0 = arith.constant 0 : i32
    %c0_i32_1 = arith.constant 0 : i32
    return %c0_i32, %c0_i32_0 : i32, i32
  }
  func.func @transform_22(%arg0: i32) -> (i32, i32) {
    %c0_i32 = arith.constant 0 : i32
    %c0_i32_0 = arith.constant 0 : i32
    %c0_i32_1 = arith.constant 0 : i32
    return %c0_i32, %c0_i32_0 : i32, i32
  }
  func.func @transform_23(%arg0: i32) -> (i32, i32) {
    %c0_i32 = arith.constant 0 : i32
    %c0_i32_0 = arith.constant 0 : i32
    %c0_i32_1 = arith.constant 0 : i32
    return %c0_i32, %c0_i32_0 : i32, i32
  }
  func.func @transform_24(%arg0: i32) -> (i32, i32) {
    %c0_i32 = arith.constant 0 : i32
    %c0_i32_0 = arith.constant 0 : i32
    %c0_i32_1 = arith.constant 0 : i32
    return %c0_i32, %c0_i32_0 : i32, i32
  }
  func.func @transform_25(%arg0: i32) -> (i32, i32) {
    %c0_i32 = arith.constant 0 : i32
    %c0_i32_0 = arith.constant 0 : i32
    %c0_i32_1 = arith.constant 0 : i32
    return %c0_i32, %c0_i32_0 : i32, i32
  }
  func.func @transform_26(%arg0: i32) -> (i32, i32) {
    %c0_i32 = arith.constant 0 : i32
    %c0_i32_0 = arith.constant 0 : i32
    %c0_i32_1 = arith.constant 0 : i32
    return %c0_i32, %c0_i32_0 : i32, i32
  }
  func.func @transform_27(%arg0: i32) -> (i32, i32) {
    %c0_i32 = arith.constant 0 : i32
    %c0_i32_0 = arith.constant 0 : i32
    %c0_i32_1 = arith.constant 0 : i32
    return %c0_i32, %c0_i32_0 : i32, i32
  }
  func.func @transform_28(%arg0: i32) -> (i32, i32, i32) {
    %c0_i32 = arith.constant 0 : i32
    %c0_i32_0 = arith.constant 0 : i32
    %c0_i32_1 = arith.constant 0 : i32
    return %arg0, %c0_i32, %c0_i32_0 : i32, i32, i32
  }
}

</mosaic_0001>

<bundles_post_ra>
// kernel: decoder_forward.1
= control target key start
LH: loop header
LB: loop body
LE: loop exit
PB: predicated region body
PF: predicated region fallthrough
CT: control target
= control target key end

     0   :  { %s6731_s0 = inlined_call_operand.vmem [shape: f32[2,16,128], index: 0, kind: input, shape index: {}]   ;;  %s6732_s1 = inlined_call_operand.hbm [shape: f32[2,64,64], index: 1, kind: input, shape index: {}]   ;;  %s6733_s2 = inlined_call_operand.vmem [shape: bf16[64,144], index: 2, kind: input, shape index: {}]   ;;  %s6734_s3 = inlined_call_operand.hbm [shape: f32[1,128], index: 3, kind: input, shape index: {}]   ;;  %s6735_s4 = inlined_call_operand.hbm [shape: f32[1,128], index: 4, kind: input, shape index: {}]   ;;  %s6736_s5 = inlined_call_operand.vmem [shape: bf16[128,64], index: 5, kind: input, shape index: {}]   ;;  %s6737_s6 = inlined_call_operand.hbm [shape: f32[1,64], index: 6, kind: input, shape index: {}]   ;;  %s6738_s7 = inlined_call_operand.hbm [shape: bf16[64,64], index: 7, kind: input, shape index: {}]   ;;  %s6739_s8 = inlined_call_operand.hbm [shape: f32[1,64], index: 8, kind: input, shape index: {}]   ;;  %s6740_s9 = inlined_call_operand.vmem [shape: bf16[64,576], index: 9, kind: input, shape index: {}]   ;;  %s6741_s10 = inlined_call_operand.hbm [shape: f32[1,576], index: 10, kind: input, shape index: {}]   ;;  %s6742_s11 = inlined_call_operand.vmem [shape: bf16[128,64], index: 11, kind: input, shape index: {}]   ;;  %s6743_s12 = inlined_call_operand.hbm [shape: f32[1,64], index: 12, kind: input, shape index: {}]   ;;  %s6744_s13 = inlined_call_operand.hbm [shape: bf16[64,64], index: 13, kind: input, shape index: {}]   ;;  %s6745_s14 = inlined_call_operand.hbm [shape: f32[1,64], index: 14, kind: input, shape index: {}]   ;;  %s6746_s15 = inlined_call_operand.vmem [shape: f32[1,64], index: 15, kind: input, shape index: {}]   ;;  %s6747_s16 = inlined_call_operand.hbm [shape: f32[1,64], index: 16, kind: input, shape index: {}]   ;;  %s6748_s17 = inlined_call_operand.hbm [shape: bf16[64,192], index: 17, kind: input, shape index: {}]   ;;  %s6749_s18 = inlined_call_operand.hbm [shape: f32[1,192], index: 18, kind: input, shape index: {}]   ;;  %s6750_s19 = inlined_call_operand.vmem [shape: bf16[64,32], index: 19, kind: input, shape index: {}]   ;;  %s6751_s20 = inlined_call_operand.hbm [shape: bf16[64,64], index: 20, kind: input, shape index: {}]   ;;  %s6752_s21 = inlined_call_operand.hbm [shape: f32[1,64], index: 21, kind: input, shape index: {}]   ;;  %s6753_s22 = inlined_call_operand.vmem [shape: f32[1,64], index: 22, kind: input, shape index: {}]   ;;  %s6754_s23 = inlined_call_operand.hbm [shape: f32[1,64], index: 23, kind: input, shape index: {}]   ;;  %s6755_s24 = inlined_call_operand.hbm [shape: bf16[64,64], index: 24, kind: input, shape index: {}]   ;;  %s6756_s25 = inlined_call_operand.hbm [shape: f32[1,64], index: 25, kind: input, shape index: {}]   ;;  %s6757_s26 = inlined_call_operand.hbm [shape: bf16[64,64], index: 26, kind: input, shape index: {}]   ;;  %s6758_s27 = inlined_call_operand.hbm [shape: f32[1,64], index: 27, kind: input, shape index: {}]   ;;  %s6759_s28 = inlined_call_operand.hbm [shape: f32[2,64,64], index: 28, kind: output, shape index: {}]  }
   0x1   :  { %6777 = sst [smem:[#allocation47_spill]] %s6731_s0 }
   0x2   :  { %6778 = sst [smem:[#allocation48_spill]] %s6732_s1 }
   0x3   :  { %6779 = sst [smem:[#allocation49_spill]] %s6733_s2 }
   0x4   :  { %6780 = sst [smem:[#allocation50_spill]] %s6734_s3 }
   0x5   :  { %6781 = sst [smem:[#allocation51_spill]] %s6735_s4 }
   0x6   :  { %6782 = sst [smem:[#allocation52_spill]] %s6736_s5 }
   0x7   :  { %6783 = sst [smem:[#allocation53_spill]] %s6737_s6 }
   0x8   :  { %6784 = sst [smem:[#allocation54_spill]] %s6738_s7 }
   0x9   :  { %6785 = sst [smem:[#allocation55_spill]] %s6739_s8 }
   0xa   :  { %6786 = sst [smem:[#allocation56_spill]] %s6740_s9 }
   0xb   :  { %6787 = sst [smem:[#allocation57_spill]] %s6741_s10 }
   0xc   :  { %6788 = sst [smem:[#allocation58_spill]] %s6742_s11 }
   0xd   :  { %6789 = sst [smem:[#allocation59_spill]] %s6743_s12 }
   0xe   :  { %6790 = sst [smem:[#allocation60_spill]] %s6744_s13 }
   0xf   :  { %6791 = sst [smem:[#allocation61_spill]] %s6745_s14 }
  0x10   :  { %6792 = sst [smem:[#allocation62_spill]] %s6746_s15 }
  0x11   :  { %6793 = sst [smem:[#allocation63_spill]] %s6747_s16 }
  0x12   :  { %6794 = sst [smem:[#allocation64_spill]] %s6748_s17 }
  0x13   :  { %6795 = sst [smem:[#allocation65_spill]] %s6749_s18 }
  0x14   :  { %6796 = sst [smem:[#allocation66_spill]] %s6751_s20 }
  0x15   :  { %6797 = sst [smem:[#allocation67_spill]] %s6752_s21 }
  0x16   :  { %6798 = sst [smem:[#allocation68_spill]] %s6753_s22 }
  0x17   :  { %6799 = sst [smem:[#allocation69_spill]] %s6759_s28 }
  0x18   :  { %33 = vsyncpa [#allocation3], 0 }
  0x19   :  { %35 = vsyncpa [#allocation3 + $0x1], 0 }
  0x1a   :  { %36 = vsyncpa [#allocation6], 0 }
  0x1b   :  { %37 = vsyncpa [#allocation9], 0 }
  0x1c   :  { %38 = vsyncpa [#allocation12], 0 }
  0x1d   :  { %39 = vsyncpa [#allocation15], 0 }
  0x1e   :  { %40 = vsyncpa [#allocation18], 0 }
  0x1f   :  { %41 = vsyncpa [#allocation21], 0 }
  0x20   :  { %42 = vsyncpa [#allocation24], 0 }
  0x21   :  { %43 = vsyncpa [#allocation27], 0 }
  0x22   :  { %44 = vsyncpa [#allocation30], 0 }
  0x23   :  { %45 = vsyncpa [#allocation33], 0 }
  0x24   :  { %46 = vsyncpa [#allocation4], 0 }
  0x25   :  { %48 = vsyncpa [#allocation4 + $0x1], 0  ;;  %s5712_s8 = smov 0   ;;  %s5714_s5 = smov 0  }
  0x26   :  { %s5716_s9 = smov 0   ;;  %s5718_s30 = smov 0  }
  0x27 LB: > { %s5536_s3 = smov [#allocation5]   ;;  %s5733_s10 = sadd.s32 4294967295, %s5534_s30   ;;  %s5534_s30 = sphi %s5718_s30, %s6864_s30   ;;  %s5530_s9 = sphi %s5716_s9, %s6863_s9   ;;  %s5526_s5 = sphi %s5714_s5, %s6862_s5   ;;  %s5522_s8 = sphi %s5712_s8, %s6861_s8  }
  0x28   : > { %s699_s6 = sshll.u32 %s5536_s3, 4  ;;  %p3955_p0 = scmp.ge.s32.totalorder %s5534_s30, 1  ;;  %s700_s6 = int_to_ptr.vmem [resolvable:$true] %s699_s6 }
  0x29   : > { %p6766_p1 = scmp.eq.s32.totalorder %s5733_s10, 0  ;;  %p683_p2 = scmp.lt.s32.totalorder %s5534_s30, 3 }
  0x2a   : > { %s5537_s11 = smov [#allocation8]   ;;  %s5538_s2 = smov [#allocation11]  }
  0x2b   : > { %p5738_p3 = pnand %p3955_p0, %p683_p2  ;;  %s724_s29 = sshll.u32 %s5537_s11, 4  ;;  %s5745_s29 = int_to_ptr.vmem [resolvable:$true] %s724_s29 }
  0x2c   : > { %s748_s7 = sshll.u32 %s5538_s2, 4  ;;  %s5539_s1 = smov [#allocation14]   ;;  %s5753_s7 = int_to_ptr.vmem [resolvable:$true] %s748_s7 }
  0x2d   : > { %s6800_s0 = scalar_select %p5738_p3, 1, 0 }
  0x2e   : > { %p4489_p5 = pneg %p5738_p3  ;;  %s5755_s4 = sshll.u32 %s5539_s1, 4  ;;  %s777_s4 = int_to_ptr.vmem [resolvable:$true] %s5755_s4 }
  0x2f   : > { %s4919_s11 = scalar_lea.vmem %s700_s6, 16  ;;  %s4926_s2 = scalar_lea.vmem %s700_s6, 32 }
  0x30   : > { %p5749_p6 = pnand %p4489_p5, %p6766_p1  ;;  %p4920_p8 = scmp.ne.s32.totalorder %s700_s6, %s4919_s11 }
  0x31   : > { %p4927_p11 = scmp.lt.s32.totalorder %s700_s6, %s700_s6  ;;  %p4928_p12 = scmp.lt.s32.totalorder %s4926_s2, %s4919_s11 }
  0x32   : > { %p5759_p7 = pneg %p5749_p6 }
  0x33   : > { %p4929_p13 = por %p4928_p12, %p4927_p11 }
  0x34   : > { %p4922_p9 = pnand %p4920_p8, %p5759_p7 }
  0x36   : > { %p4923_p10 = pneg %p4922_p9 }
  0x38   : > { %p4930_p0 = pnand %p4929_p13, %p4923_p10 }
  0x3a   : > { %4933 = shalt.err (!%p4930_p0)
}
  0x3b   : > { %s6803_s22 = sld [smem:[#allocation50_spill]]  ;;  %s4945_s15 = scalar_lea.vmem %s5745_s29, 16 }
  0x3c   : > { %p4946_p2 = scmp.ne.s32.totalorder %s5745_s29, %s4945_s15  ;;  %s4952_s11 = scalar_lea.vmem %s5745_s29, 32 }
  0x3d   : > { %p4953_p9 = scmp.lt.s32.totalorder %s5745_s29, %s5745_s29  ;;  %p4954_p10 = scmp.lt.s32.totalorder %s4952_s11, %s4945_s15 }
  0x3e   : > { %p4948_p5 = pnand %p4946_p2, %p5759_p7 }
  0x3f   : > { %p4955_p11 = por %p4954_p10, %p4953_p9 }
  0x40   : > { %p4949_p8 = pneg %p4948_p5 }
  0x41   : > { %4492 = dma.hbm_to_vmem [thread:$0]  (!%p5749_p6), %s6803_s22, 16, %s700_s6, [#allocation6]  }
  0x42   : > { %p4956_p12 = pnand %p4955_p11, %p4949_p8 }
  0x44   : > { %4959 = shalt.err (!%p4956_p12)
}
  0x45   : > { %s6804_s1 = sld [smem:[#allocation53_spill]]  ;;  %s4971_s22 = scalar_lea.vmem %s5753_s7, 16 }
  0x46   : > { %p4972_p13 = scmp.ne.s32.totalorder %s5753_s7, %s4971_s22  ;;  %s4978_s15 = scalar_lea.vmem %s5753_s7, 32 }
  0x47   : > { %p4979_p5 = scmp.lt.s32.totalorder %s5753_s7, %s5753_s7  ;;  %p4980_p8 = scmp.lt.s32.totalorder %s4978_s15, %s4971_s22 }
  0x48   : > { %p4974_p0 = pnand %p4972_p13, %p5759_p7 }
  0x49   : > { %p4981_p9 = por %p4980_p8, %p4979_p5 }
  0x4a   : > { %p4975_p2 = pneg %p4974_p0 }
  0x4b   : > { %4498 = dma.hbm_to_vmem [thread:$0]  (!%p5749_p6), %s6804_s1, 16, %s5745_s29, [#allocation9]  }
  0x4c   : > { %p4982_p10 = pnand %p4981_p9, %p4975_p2 }
  0x4e   : > { %4985 = shalt.err (!%p4982_p10)
}
  0x4f   : > { %s6805_s28 = sld [smem:[#allocation55_spill]]  ;;  %s5540_s29 = smov [#allocation17]  }
  0x50   : > { %s800_s2 = sshll.u32 %s5540_s29, 4  ;;  %s4997_s1 = scalar_lea.vmem %s777_s4, 16  ;;  %s801_s2 = int_to_ptr.vmem [resolvable:$true] %s800_s2 }
  0x51   : > { %p4998_p11 = scmp.ne.s32.totalorder %s777_s4, %s4997_s1  ;;  %s5004_s22 = scalar_lea.vmem %s777_s4, 32 }
  0x52   : > { %p5005_p0 = scmp.lt.s32.totalorder %s777_s4, %s777_s4  ;;  %p5006_p2 = scmp.lt.s32.totalorder %s5004_s22, %s4997_s1 }
  0x53   : > { %p5000_p12 = pnand %p4998_p11, %p5759_p7 }
  0x54   : > { %p5007_p5 = por %p5006_p2, %p5005_p0 }
  0x55   : > { %4504 = dma.hbm_to_vmem [thread:$0]  (!%p5749_p6), %s6805_s28, 16, %s5753_s7, [#allocation12]  }
  0x56   : > { %p5001_p13 = pneg %p5000_p12 }
  0x58   : > { %p5008_p8 = pnand %p5007_p5, %p5001_p13 }
  0x5a   : > { %5011 = shalt.err (!%p5008_p8)
}
  0x5b   : > { %s6806_s11 = sld [smem:[#allocation59_spill]]  ;;  %s5023_s7 = scalar_lea.vmem %s801_s2, 16 }
  0x5c   : > { %p5024_p9 = scmp.ne.s32.totalorder %s801_s2, %s5023_s7  ;;  %s5030_s28 = scalar_lea.vmem %s801_s2, 32 }
  0x5d   : > { %p5031_p12 = scmp.lt.s32.totalorder %s801_s2, %s801_s2  ;;  %p5032_p4 = scmp.lt.s32.totalorder %s5030_s28, %s5023_s7 }
  0x5e   : > { %p5026_p10 = pnand %p5024_p9, %p5759_p7 }
  0x5f   : > { %p5033_p1 = por %p5032_p4, %p5031_p12 }
  0x60   : > { %p5027_p11 = pneg %p5026_p10 }
  0x61   : > { %4510 = dma.hbm_to_vmem [thread:$0]  (!%p5749_p6), %s6806_s11, 16, %s777_s4, [#allocation15]  }
  0x62   : > { %p5034_p0 = pnand %p5033_p1, %p5027_p11 }
  0x64   : > { %5037 = shalt.err (!%p5034_p0)
}
  0x65   : > { %s6807_s14 = sld [smem:[#allocation61_spill]]  ;;  %s5541_s4 = smov [#allocation20]  }
  0x66   : > { %s824_s22 = sshll.u32 %s5541_s4, 4  ;;  %s825_s22 = int_to_ptr.vmem [resolvable:$true] %s824_s22 }
  0x67   : > { %s5049_s15 = scalar_lea.vmem %s825_s22, 1024  ;;  %p5057_p8 = scmp.lt.s32.totalorder %s825_s22, %s825_s22 }
  0x68   : > { %p5050_p13 = scmp.ne.s32.totalorder %s825_s22, %s5049_s15  ;;  %p5058_p9 = scmp.lt.s32.totalorder %s5049_s15, %s5049_s15 }
  0x6a   : > { %p5052_p2 = pnand %p5050_p13, %p5759_p7  ;;  %p5059_p4 = por %p5058_p9, %p5057_p8 }
  0x6b   : > { %4516 = dma.hbm_to_vmem [thread:$0]  (!%p5749_p6), %s6807_s14, 16, %s801_s2, [#allocation18]  }
  0x6c   : > { %p5053_p5 = pneg %p5052_p2 }
  0x6e   : > { %p5060_p1 = pnand %p5059_p4, %p5053_p5 }
  0x70   : > { %5063 = shalt.err (!%p5060_p1)
}
  0x71   : > { %s6767_s6 = smov 128   ;;  %s6768_s11 = smov 8  }
  0x72   : > { %s6808_s17 = sld [smem:[#allocation64_spill]]  ;;  %s5544_s28 = smov [#allocation23]  }
  0x73   : > { %s851_s29 = sshll.u32 %s5544_s28, 4  ;;  %s5545_s1 = smov [#allocation26]   ;;  %s852_s29 = int_to_ptr.vmem [resolvable:$true] %s851_s29 }
  0x74   : > { %s879_s4 = sshll.u32 %s5545_s1, 4  ;;  %s5075_s15 = scalar_lea.vmem %s852_s29, 512  ;;  %s880_s4 = int_to_ptr.vmem [resolvable:$true] %s879_s4 }
  0x75   : > { %p5076_p10 = scmp.ne.s32.totalorder %s852_s29, %s5075_s15  ;;  %p5083_p0 = scmp.lt.s32.totalorder %s852_s29, %s852_s29 }
  0x76   : > { %p5084_p13 = scmp.lt.s32.totalorder %s5075_s15, %s5075_s15 }
  0x77   : > { %p5078_p11 = pnand %p5076_p10, %p5759_p7 }
  0x78   : > { %4522 = dma.hbm_to_vmem [thread:$0]  (!%p5749_p6), %s6808_s17, 1024, %s825_s22, [#allocation21], %s6767_s6, %s6767_s6, %s6768_s11  }
  0x79   : > { %p5079_p12 = pneg %p5078_p11  ;;  %p5085_p2 = por %p5084_p13, %p5083_p0 }
  0x7b   : > { %p5086_p5 = pnand %p5085_p2, %p5079_p12 }
  0x7d   : > { %5089 = shalt.err (!%p5086_p5)
}
  0x7e   : > { %s6769_s14 = smov 64   ;;  %s6772_s22 = smov 4  }
  0x7f   : > { %s6809_s20 = sld [smem:[#allocation66_spill]]  ;;  %s5101_s28 = scalar_lea.vmem %s880_s4, 16 }
  0x80   : > { %p5102_p8 = scmp.ne.s32.totalorder %s880_s4, %s5101_s28  ;;  %s5108_s1 = scalar_lea.vmem %s880_s4, 32 }
  0x81   : > { %p5109_p1 = scmp.lt.s32.totalorder %s880_s4, %s880_s4  ;;  %p5110_p10 = scmp.lt.s32.totalorder %s5108_s1, %s5101_s28 }
  0x82   : > { %p5104_p9 = pnand %p5102_p8, %p5759_p7 }
  0x83   : > { %p5111_p11 = por %p5110_p10, %p5109_p1 }
  0x84   : > { %p5105_p4 = pneg %p5104_p9 }
  0x85   : > { %4528 = dma.hbm_to_vmem [thread:$0]  (!%p5749_p6), %s6809_s20, 512, %s852_s29, [#allocation24], %s6769_s14, %s6769_s14, %s6772_s22  }
  0x86   : > { %p5112_p12 = pnand %p5111_p11, %p5105_p4 }
  0x88   : > { %5115 = shalt.err (!%p5112_p12)
}
  0x89   : > { %4534 = dma.hbm_to_vmem [thread:$0]  (!%p5749_p6), %s6754_s23, 16, %s880_s4, [#allocation27]  }
  0x8a   : > { %s5548_s2 = smov [#allocation29]   ;;  %s5549_s7 = smov [#allocation7]  }
  0x8b   : > { %s903_s29 = sshll.u32 %s5548_s2, 4  ;;  %s710_s11 = sshll.u32 %s5549_s7, 4  ;;  %s904_s29 = int_to_ptr.vmem [resolvable:$true] %s903_s29  ;;  %s711_s11 = int_to_ptr.vmem [resolvable:$true] %s710_s11 }
  0x8c   : > { %s5127_s14 = scalar_lea.vmem %s904_s29, 16  ;;  %s5134_s28 = scalar_lea.vmem %s904_s29, 32 }
  0x8d   : > { %p5128_p0 = scmp.ne.s32.totalorder %s904_s29, %s5127_s14  ;;  %p5135_p5 = scmp.lt.s32.totalorder %s904_s29, %s904_s29 }
  0x8e   : > { %p5136_p8 = scmp.lt.s32.totalorder %s5134_s28, %s5127_s14 }
  0x8f   : > { %p5130_p13 = pnand %p5128_p0, %p5759_p7 }
  0x90   : > { %p5137_p9 = por %p5136_p8, %p5135_p5 }
  0x91   : > { %p5131_p2 = pneg %p5130_p13 }
  0x93   : > { %p5138_p4 = pnand %p5137_p9, %p5131_p2 }
  0x95   : > { %5141 = shalt.err (!%p5138_p4)
}
  0x96   : > { %4540 = dma.hbm_to_vmem [thread:$0]  (!%p5749_p6), %s6756_s25, 16, %s904_s29, [#allocation30]  }
  0x97   : > { %s5153_s1 = scalar_lea.vmem %s711_s11, 16  ;;  %s5160_s15 = scalar_lea.vmem %s711_s11, 32 }
  0x98   : > { %p5154_p1 = scmp.ne.s32.totalorder %s711_s11, %s5153_s1  ;;  %p5161_p12 = scmp.lt.s32.totalorder %s711_s11, %s711_s11 }
  0x99   : > { %p5162_p0 = scmp.lt.s32.totalorder %s5160_s15, %s5153_s1 }
  0x9a   : > { %p5156_p10 = pnand %p5154_p1, %p5759_p7 }
  0x9b   : > { %p5163_p13 = por %p5162_p0, %p5161_p12 }
  0x9c   : > { %p5157_p11 = pneg %p5156_p10 }
  0x9e   : > { %p5164_p3 = pnand %p5163_p13, %p5157_p11 }
  0xa0   : > { %5167 = shalt.err (!%p5164_p3)
}
  0xa1   : > { %s6810_s7 = sld [smem:[#allocation51_spill]]  ;;  %s5550_s28 = smov [#allocation10]  }
  0xa2   : > { %s734_s29 = sshll.u32 %s5550_s28, 4  ;;  %s5551_s6 = smov [#allocation13]   ;;  %s735_s29 = int_to_ptr.vmem [resolvable:$true] %s734_s29 }
  0xa3   : > { %s762_s4 = sshll.u32 %s5551_s6, 4  ;;  %s5179_s22 = scalar_lea.vmem %s735_s29, 512  ;;  %s763_s4 = int_to_ptr.vmem [resolvable:$true] %s762_s4 }
  0xa4   : > { %p5180_p2 = scmp.ne.s32.totalorder %s735_s29, %s5179_s22  ;;  %p5187_p9 = scmp.lt.s32.totalorder %s735_s29, %s735_s29 }
  0xa5   : > { %p5188_p3 = scmp.lt.s32.totalorder %s5179_s22, %s5179_s22 }
  0xa6   : > { %p5182_p5 = pnand %p5180_p2, %p5759_p7 }
  0xa7   : > { %4495 = dma.hbm_to_vmem [thread:$0]  (!%p5749_p6), %s6810_s7, 16, %s711_s11, [#allocation6]  }
  0xa8   : > { %p5183_p8 = pneg %p5182_p5  ;;  %p5189_p4 = por %p5188_p3, %p5187_p9 }
  0xaa   : > { %p5190_p1 = pnand %p5189_p4, %p5183_p8 }
  0xac   : > { %5193 = shalt.err (!%p5190_p1)
}
  0xad   : > { %s6811_s1 = smov 4   ;;  %s6812_s11 = smov 64  }
  0xae   : > { %s6813_s2 = sld [smem:[#allocation54_spill]]  ;;  %s5205_s7 = scalar_lea.vmem %s763_s4, 80 }
  0xaf   : > { %p5206_p10 = scmp.ne.s32.totalorder %s763_s4, %s5205_s7  ;;  %s5212_s28 = scalar_lea.vmem %s763_s4, 96 }
  0xb0   : > { %p5213_p0 = scmp.lt.s32.totalorder %s763_s4, %s763_s4  ;;  %p5214_p13 = scmp.lt.s32.totalorder %s5212_s28, %s5205_s7 }
  0xb1   : > { %p5208_p11 = pnand %p5206_p10, %p5759_p7 }
  0xb2   : > { %p5215_p2 = por %p5214_p13, %p5213_p0 }
  0xb3   : > { %p5209_p12 = pneg %p5208_p11 }
  0xb4   : > { %4501 = dma.hbm_to_vmem [thread:$0]  (!%p5749_p6), %s6813_s2, 512, %s735_s29, [#allocation9], %s6812_s11, %s6812_s11, %s6811_s1  }
  0xb5   : > { %p5216_p5 = pnand %p5215_p2, %p5209_p12 }
  0xb7   : > { %5219 = shalt.err (!%p5216_p5)
}
  0xb8   : > { %s6814_s17 = sld [smem:[#allocation57_spill]]  ;;  %s5552_s15 = smov [#allocation16]  }
  0xb9   : > { %s786_s29 = sshll.u32 %s5552_s15, 4  ;;  %s5553_s14 = smov [#allocation19]   ;;  %s787_s29 = int_to_ptr.vmem [resolvable:$true] %s786_s29 }
  0xba   : > { %s814_s2 = sshll.u32 %s5553_s14, 4  ;;  %s5231_s20 = scalar_lea.vmem %s787_s29, 512  ;;  %s815_s2 = int_to_ptr.vmem [resolvable:$true] %s814_s2 }
  0xbb   : > { %p5232_p8 = scmp.ne.s32.totalorder %s787_s29, %s5231_s20  ;;  %p5239_p4 = scmp.lt.s32.totalorder %s787_s29, %s787_s29 }
  0xbc   : > { %p5240_p1 = scmp.lt.s32.totalorder %s5231_s20, %s5231_s20 }
  0xbd   : > { %p5234_p9 = pnand %p5232_p8, %p5759_p7 }
  0xbe   : > { %4507 = dma.hbm_to_vmem [thread:$0]  (!%p5749_p6), %s6814_s17, 80, %s763_s4, [#allocation12]  }
  0xbf   : > { %p5235_p3 = pneg %p5234_p9  ;;  %p5241_p10 = por %p5240_p1, %p5239_p4 }
  0xc1   : > { %p5242_p11 = pnand %p5241_p10, %p5235_p3 }
  0xc3   : > { %5245 = shalt.err (!%p5242_p11)
}
  0xc4   : > { %s6815_s13 = sld [smem:[#allocation60_spill]]  ;;  %s5257_s7 = scalar_lea.vmem %s815_s2, 16 }
  0xc5   : > { %p5258_p12 = scmp.ne.s32.totalorder %s815_s2, %s5257_s7  ;;  %s5264_s28 = scalar_lea.vmem %s815_s2, 32 }
  0xc6   : > { %p5265_p2 = scmp.lt.s32.totalorder %s815_s2, %s815_s2  ;;  %p5266_p5 = scmp.lt.s32.totalorder %s5264_s28, %s5257_s7 }
  0xc7   : > { %p5260_p0 = pnand %p5258_p12, %p5759_p7 }
  0xc8   : > { %p5267_p8 = por %p5266_p5, %p5265_p2 }
  0xc9   : > { %p5261_p13 = pneg %p5260_p0 }
  0xca   : > { %4513 = dma.hbm_to_vmem [thread:$0]  (!%p5749_p6), %s6815_s13, 512, %s787_s29, [#allocation15], %s6812_s11, %s6812_s11, %s6811_s1  }
  0xcb   : > { %p5268_p9 = pnand %p5267_p8, %p5261_p13 }
  0xcd   : > { %5271 = shalt.err (!%p5268_p9)
}
  0xce   : > { %s6816_s16 = sld [smem:[#allocation63_spill]]  ;;  %s5554_s6 = smov [#allocation22]  }
  0xcf   : > { %s838_s15 = sshll.u32 %s5554_s6, 4  ;;  %s5555_s29 = smov [#allocation25]   ;;  %s839_s15 = int_to_ptr.vmem [resolvable:$true] %s838_s15 }
  0xd0   : > { %s865_s14 = sshll.u32 %s5555_s29, 4  ;;  %s5283_s17 = scalar_lea.vmem %s839_s15, 32  ;;  %s866_s14 = int_to_ptr.vmem [resolvable:$true] %s865_s14 }
  0xd1   : > { %p5284_p3 = scmp.ne.s32.totalorder %s839_s15, %s5283_s17  ;;  %p5291_p10 = scmp.lt.s32.totalorder %s839_s15, %s839_s15 }
  0xd2   : > { %p5292_p11 = scmp.lt.s32.totalorder %s5283_s17, %s5283_s17 }
  0xd3   : > { %p5286_p4 = pnand %p5284_p3, %p5759_p7 }
  0xd4   : > { %4519 = dma.hbm_to_vmem [thread:$0]  (!%p5749_p6), %s6816_s16, 16, %s815_s2, [#allocation18]  }
  0xd5   : > { %p5287_p1 = pneg %p5286_p4  ;;  %p5293_p12 = por %p5292_p11, %p5291_p10 }
  0xd7   : > { %p5294_p0 = pnand %p5293_p12, %p5287_p1 }
  0xd9   : > { %5297 = shalt.err (!%p5294_p0)
}
  0xda   : > { %s6817_s18 = sld [smem:[#allocation65_spill]]  ;;  %s5309_s7 = scalar_lea.vmem %s866_s14, 16 }
  0xdb   : > { %p5310_p13 = scmp.ne.s32.totalorder %s866_s14, %s5309_s7  ;;  %s5316_s28 = scalar_lea.vmem %s866_s14, 32 }
  0xdc   : > { %p5317_p8 = scmp.lt.s32.totalorder %s866_s14, %s866_s14  ;;  %p5318_p9 = scmp.lt.s32.totalorder %s5316_s28, %s5309_s7 }
  0xdd   : > { %p5312_p2 = pnand %p5310_p13, %p5759_p7 }
  0xde   : > { %p5319_p3 = por %p5318_p9, %p5317_p8 }
  0xdf   : > { %p5313_p5 = pneg %p5312_p2 }
  0xe0   : > { %4525 = dma.hbm_to_vmem [thread:$0]  (!%p5749_p6), %s6817_s18, 32, %s839_s15, [#allocation21]  }
  0xe1   : > { %p5320_p4 = pnand %p5319_p3, %p5313_p5 }
  0xe3   : > { %5323 = shalt.err (!%p5320_p4)
}
  0xe4   : > { %s6818_s21 = sld [smem:[#allocation67_spill]]  ;;  %s5556_s6 = smov [#allocation28]  }
  0xe5   : > { %s889_s15 = sshll.u32 %s5556_s6, 4  ;;  %s5557_s29 = smov [#allocation31]   ;;  %s890_s15 = int_to_ptr.vmem [resolvable:$true] %s889_s15 }
  0xe6   : > { %s913_s17 = sshll.u32 %s5557_s29, 4  ;;  %s5335_s4 = scalar_lea.vmem %s890_s15, 512  ;;  %s914_s17 = int_to_ptr.vmem [resolvable:$true] %s913_s17 }
  0xe7   : > { %p5336_p1 = scmp.ne.s32.totalorder %s890_s15, %s5335_s4  ;;  %p5343_p12 = scmp.lt.s32.totalorder %s890_s15, %s890_s15 }
  0xe8   : > { %p5344_p0 = scmp.lt.s32.totalorder %s5335_s4, %s5335_s4 }
  0xe9   : > { %p5338_p10 = pnand %p5336_p1, %p5759_p7 }
  0xea   : > { %4531 = dma.hbm_to_vmem [thread:$0]  (!%p5749_p6), %s6818_s21, 16, %s866_s14, [#allocation24]  }
  0xeb   : > { %p5339_p11 = pneg %p5338_p10  ;;  %p5345_p13 = por %p5344_p0, %p5343_p12 }
  0xed   : > { %p5346_p2 = pnand %p5345_p13, %p5339_p11 }
  0xef   : > { %5349 = shalt.err (!%p5346_p2)
}
  0xf0   : > { %4537 = dma.hbm_to_vmem [thread:$0]  (!%p5749_p6), %s6755_s24, 512, %s890_s15, [#allocation27], %s6812_s11, %s6812_s11, %s6811_s1  }
  0xf1   : > { %s5361_s7 = scalar_lea.vmem %s914_s17, 512  ;;  %p5369_p3 = scmp.lt.s32.totalorder %s914_s17, %s914_s17 }
  0xf2   : > { %p5362_p5 = scmp.ne.s32.totalorder %s914_s17, %s5361_s7  ;;  %p5370_p4 = scmp.lt.s32.totalorder %s5361_s7, %s5361_s7 }
  0xf4   : > { %p5364_p8 = pnand %p5362_p5, %p5759_p7  ;;  %p5371_p1 = por %p5370_p4, %p5369_p3 }
  0xf6   : > { %p5365_p9 = pneg %p5364_p8 }
  0xf8   : > { %p5372_p10 = pnand %p5371_p1, %p5365_p9 }
  0xfa   : > { %5375 = shalt.err (!%p5372_p10)
}
  0xfb   : > { %4543 = dma.hbm_to_vmem [thread:$0]  (!%p5749_p6), %s6757_s26, 512, %s914_s17, [#allocation30], %s6812_s11, %s6812_s11, %s6811_s1  }
  0xfc   : > { %s5558_s22 = smov [#allocation32]  }
  0xfd   : > { %s927_s6 = sshll.u32 %s5558_s22, 4  ;;  %s928_s6 = int_to_ptr.vmem [resolvable:$true] %s927_s6 }
  0xfe   : > { %s5387_s15 = scalar_lea.vmem %s928_s6, 16  ;;  %s5394_s29 = scalar_lea.vmem %s928_s6, 32 }
  0xff   : > { %p5388_p11 = scmp.ne.s32.totalorder %s928_s6, %s5387_s15  ;;  %p5395_p13 = scmp.lt.s32.totalorder %s928_s6, %s928_s6 }
 0x100   : > { %p5396_p2 = scmp.lt.s32.totalorder %s5394_s29, %s5387_s15 }
 0x101   : > { %p5390_p12 = pnand %p5388_p11, %p5759_p7 }
 0x102   : > { %p5397_p5 = por %p5396_p2, %p5395_p13 }
 0x103   : > { %p5391_p0 = pneg %p5390_p12 }
 0x105   : > { %p5398_p8 = pnand %p5397_p5, %p5391_p0 }
 0x107   : > { %5401 = shalt.err (!%p5398_p8)
}
 0x108   : > { %4546 = dma.hbm_to_vmem [thread:$0]  (!%p5749_p6), %s6758_s27, 16, %s928_s6, [#allocation33]  }
 0x109   : > { %s3954_s3 = sadd.s32 4294967294, %s5534_s30   ;;  %s5929_s12 = sadd.s32 1, %s5534_s30  }
 0x10a   : > { %s87_s1 = sadd.s32 1, %s5530_s9  ;;  %s84_s11 = ssub.s32 %s5534_s30, %s5929_s12 }
 0x10b   : > { %p94_p7 = scmp.ne.s32.totalorder %s5530_s9, %s5526_s5  ;;  %p85_p9 = scmp.eq.s32.totalorder %s84_s11, 0 }
 0x10c   : > { %p95_p3 = scmp.eq.s32.totalorder %s5534_s30, 0  ;;  %p100_p4 = scmp.ne.s32.totalorder %s5526_s5, %s5522_s8 }
 0x10d   : > { %p670_p1 = scmp.eq.s32.totalorder %s5733_s10, 1  ;;  %p6819_p11 = scmp.eq.s32.totalorder %s5733_s10, 0 }
 0x10e   : > { %s5941_s17 = scalar_select %p85_p9, %s5530_s9, %s87_s1  }
 0x10f   : > { %p96_p10 = por %p95_p3, %p94_p7  ;;  %p5945_p12 = por %p6819_p11, %p100_p4 }
 0x110   : > { %p5949_p6 = por %p670_p1, %p94_p7  ;;  %p676_p0 = scmp.eq.s32.totalorder %s3954_s3, 1 }
 0x111   : > { %s6820_s2 = scalar_select %p5945_p12, 1, 0 }
 0x112   : > { %s6821_s7 = scalar_select %p5949_p6, 1, 0 }
 0x113   : > { %p4574_p13 = scmp.lt.s32.totalorder %s5534_s30, 2  ;;  %s946_s28 = sand.u32 1, %s5530_s9  }
 0x114   : > { %p5955_p2 = por %p676_p0, %p100_p4  ;;  %s3976_s22 = sshll.u32 %s946_s28, 6 }
 0x115   : > { %s4139_s6 = sshll.u32 %s5534_s30, 10  ;;  %s6823_s4 = sld [smem:[#allocation48_spill]] }
 0x116   : > { %s6822_s20 = scalar_select %p5955_p2, 1, 0 }
 0x117   : > { %s950_s1 = scalar_lea.vmem [#allocation2], %s3976_s22  ;;  %p5965_p5 = pnand %p4574_p13, %p96_p10 }
 0x118   : > { %s957_s11 = sshll.u32 %s950_s1, 4  ;;  %s5971_s13 = scalar_lea.sflag [#allocation3], %s946_s28  ;;  %s5969_s11 = int_to_ptr.vmem [resolvable:$true] %s957_s11 }
 0x119   : > { %p5404_p7 = pneg %p5965_p5 }
 0x11b   : > { %s5963_s14 = scalar_lea.hbm %s6823_s4, %s4139_s6  ;;  %s5407_s22 = scalar_lea.hbm %s6823_s4, 2048 }
 0x11c   : > { %s5402_s16 = scalar_lea.hbm %s5963_s14, 1024  ;;  %p5408_p4 = scmp.lt.s32.totalorder %s5963_s14, %s6823_s4 }
 0x11d   : > { %p5403_p8 = scmp.ne.s32.totalorder %s5963_s14, %s5402_s16  ;;  %p5409_p1 = scmp.lt.s32.totalorder %s5407_s22, %s5402_s16 }
 0x11f   : > { %p5405_p9 = pnand %p5404_p7, %p5403_p8  ;;  %p5410_p10 = por %p5409_p1, %p5408_p4 }
 0x121   : > { %p5406_p3 = pneg %p5405_p9 }
 0x123   : > { %p5411_p11 = pnand %p5410_p10, %p5406_p3 }
 0x125   : > { %5414 = shalt.err (!%p5411_p11)
}
 0x126   : > { %s5415_s28 = scalar_lea.vmem %s5969_s11, 1024  ;;  %s5559_s18 = smov [#allocation2]  }
 0x127   : > { %p5416_p0 = scmp.ne.s32.totalorder %s5969_s11, %s5415_s28  ;;  %s5420_s21 = sshll.u32 %s5559_s18, 4  ;;  %s5421_s21 = int_to_ptr.vmem [resolvable:$false] %s5420_s21 }
 0x128   : > { %s5422_s6 = scalar_lea.vmem %s5421_s21, 2048  ;;  %p5423_p9 = scmp.lt.s32.totalorder %s5969_s11, %s5421_s21 }
 0x129   : > { %p5418_p13 = pnand %p5416_p0, %p5404_p7  ;;  %p5424_p2 = scmp.lt.s32.totalorder %s5422_s6, %s5415_s28 }
 0x12b   : > { %p5419_p8 = pneg %p5418_p13  ;;  %p5425_p6 = por %p5424_p2, %p5423_p9 }
 0x12d   : > { %p5426_p12 = pnand %p5425_p6, %p5419_p8 }
 0x12f   : > { %5429 = shalt.err (!%p5426_p12)
}
 0x130   : > { %s6825_s16 = smov 8   ;;  %s6826_s15 = smov 128  }
 0x131   : > { %4550 = dma.hbm_to_vmem [thread:$0]  (!%p5965_p5), %s5963_s14, 1024, %s5969_s11, %s5971_s13, %s6826_s15, %s6826_s15, %s6825_s16  }
 0x132   : > { %p6827_p7 = scmp.ne.s32.totalorder %s6800_s0, 0 }
 0x133   : > { %s5998_s18 = sand.u32 (!%p6827_p7), 1, %s5526_s5   ;;  %p6828_p12 = scmp.ne.s32.totalorder (!%p6827_p7), %s6820_s2, 0 }
 0x134   : > { %969 = sbr.rel (%p6827_p7) target bundleno = 4333 (0x10ed), region = 132  ;;  %s3980_s21 = sshll.u32 (!%p6827_p7), %s5998_s18, 6 }
 0x135   : > { %s972_s22 = scalar_lea.sflag (!%p6827_p7), [#allocation3], %s5998_s18  ;;  %s6004_s3 = scalar_lea.vmem (!%p6827_p7), [#allocation2], %s3980_s21 }
 0x139   : > { %5473 = dma.done.wait (%p6828_p12), %s972_s22, 1024  }
 0x13a   : > { %5475 = vsyncadd (%p6828_p12), %s972_s22, 4294966272  ;;  %p6829_p6 = scmp.eq.s32.totalorder %s5733_s10, 0 }
 0x13c   : > { %5477 = dma.done.wait (%p6829_p6), [#allocation6], 32   ;;  %p6830_p2 = pmov %p6829_p6 }
 0x13e   : > { %5479 = vsyncadd (%p6830_p2), [#allocation6], 4294967264  ;;  %p6831_p5 = pmov %p6830_p2 }
 0x13f   : > { %p6832_p3 = pmov %p6830_p2 }
 0x140   : > { %5481 = dma.done.wait (%p6831_p5), [#allocation9], 528  }
 0x141   : > { %5483 = vsyncadd (%p6832_p3), [#allocation9], 4294966768  ;;  %p6833_p4 = pmov %p6830_p2 }
 0x142   : > { %p6834_p1 = pmov %p6830_p2 }
 0x143   : > { %5485 = dma.done.wait (%p6833_p4), [#allocation12], 96  }
 0x144   : > { %5487 = vsyncadd (%p6834_p1), [#allocation12], 4294967200  ;;  %p6835_p10 = pmov %p6834_p1 }
 0x145   : > { %p6836_p11 = pmov %p6834_p1 }
 0x146   : > { %5489 = dma.done.wait (%p6835_p10), [#allocation15], 528  }
 0x147   : > { %5491 = vsyncadd (%p6836_p11), [#allocation15], 4294966768  ;;  %p6837_p0 = pmov %p6834_p1 }
 0x149   : > { %5493 = dma.done.wait (%p6837_p0), [#allocation18], 32   ;;  %p6838_p13 = pmov %p6837_p0 }
 0x14a   : > { %p6839_p8 = pmov %p6837_p0 }
 0x14b   : > { %5495 = vsyncadd (%p6838_p13), [#allocation18], 4294967264 }
 0x14c   : > { %5497 = dma.done.wait (%p6839_p8), [#allocation21], 1056   ;;  %p6840_p9 = pmov %p6837_p0 }
 0x14d   : > { %p6841_p7 = pmov %p6837_p0 }
 0x14e   : > { %5499 = vsyncadd (%p6840_p9), [#allocation21], 4294966240 }
 0x14f   : > { %5501 = dma.done.wait (%p6841_p7), [#allocation24], 528   ;;  %p6842_p12 = pmov %p6837_p0 }
 0x150   : > { %p6843_p6 = pmov %p6837_p0 }
 0x151   : > { %5503 = vsyncadd (%p6842_p12), [#allocation24], 4294966768 }
 0x152   : > { %5505 = dma.done.wait (%p6843_p6), [#allocation27], 528   ;;  %p6844_p2 = pmov %p6837_p0 }
 0x153   : > { %p6845_p5 = pmov %p6837_p0 }
 0x154   : > { %5507 = vsyncadd (%p6844_p2), [#allocation27], 4294966768 }
 0x155   : > { %5509 = dma.done.wait (%p6845_p5), [#allocation30], 528   ;;  %p6846_p3 = pmov %p6837_p0 }
 0x156   : > { %p6847_p4 = pmov %p6837_p0 }
 0x157   : > { %5511 = vsyncadd (%p6846_p3), [#allocation30], 4294966768 }
 0x158   : > { %5513 = dma.done.wait (%p6847_p4), [#allocation33], 16   ;;  %p6848_p1 = pmov %p6837_p0 }
 0x159   : > { %p1129_p10 = scmp.lt.s32.totalorder %s5733_s10, 1  ;;  %s6849_s11 = sld [smem:[#allocation47_spill]]  ;;  %v5560_v3 = vmov 0.0   ;;  %vm5561_vm0 = vmmov 0   ;;  %v4003_v27 = vld [vmem:[#allocation5] ss:$0 sm:$0xff] }
 0x15a   : > { %5515 = vsyncadd (%p6848_p1), [#allocation33], 4294967280  ;;  %s6850_s6 = sld [smem:[#allocation52_spill]]  ;;  %4229 = vmatprep.subr.bf16.mxu0 %v5560_v3  ;;  %4249 = vmatprep.subr.bf16.mxu1 %v5560_v3  ;;  %v4004_v31 = vld [vmem:[#allocation7] ss:$0 sm:$0xff]  ;;  %v4705_v37 = vld [vmem:[#allocation10 + $0x10] sm:$0xff]  }
 0x15b   : > { %s1130_s13 = scalar_select %p1129_p10, %s5733_s10, 1  ;;  %4245 = vmatprep.mubr.msk.bf16.mxu0 %vm5561_vm0, %v5560_v3  ;;  %4257 = vmatprep.mubr.msk.bf16.mxu1 %vm5561_vm0, %v5560_v3  ;;  %v4704_v36 = vld [vmem:[#allocation10 + $0x18] sm:$0xff]   ;;  %v4706_v38 = vld [vmem:[#allocation10 + $0x8] sm:$0xff]   ;;  %v4707_v39 = vld [vmem:[#allocation10] sm:$0xff]   ;;  %vm1349_vm1 = vcmask 523264   ;;  %vm1765_vm2 = vcmask 130048  }
 0x15c   : > { %4250 = vmatpush3.bf16.msra.mxu1 %v4704_v36  ;;  %s6851_s2 = sld [smem:[#allocation56_spill]]  ;;  %v4005_v45 = vld [vmem:[#allocation8] ss:$0 sm:$0xff]  ;;  %v1418_v36 = vld [vmem:[#allocation13] sm:$0x1f]  ;;  %vm2844_vm3 = vcmask 261120  }
 0x15d   : > { %s4140_s0 = sshll.u32 %s1130_s13, 4  ;;  %4251 = vmatprep.subr.bf16.mxu1 %v5560_v3  ;;  %s5563_s13 = smov 64  }
 0x15e   : > { %s6853_s28 = sld [smem:[#allocation58_spill]]  ;;  %s1128_s15 = scalar_lea.vmem [#allocation34], %s3980_s21 }
 0x15f   : > { %s1133_s29 = scalar_lea.vmem %s6849_s11, %s4140_s0  ;;  %s6852_s11 = sld [smem:[#allocation49_spill]] }
 0x160   : > { %v1135_v0 = vld [vmem:[%s1133_s29] sm:$0xff]  ;;  %v1136_v1 = vld [vmem:[%s1133_s29 + $0x8] sm:$0xff]  ;;  %v4696_v2 = vld [vmem:[%s6850_s6 + $0x38] sm:$0xff]   ;;  %4252 = vmatpush3.bf16.msra.mxu1 %v4705_v37  ;;  %s6854_s16 = sld [smem:[#allocation62_spill]]  ;;  %s4141_s21 = sshll.u32 %s5733_s10, 10 }
 0x161   : > { %1139 = vadd.xlane.f32.xlu0 %v1135_v0  ;;  %4230 = vmatpush3.bf16.msra.mxu0 %v4696_v2  ;;  %v4697_v12 = vld [vmem:[%s6850_s6 + $0x30] sm:$0xff]   ;;  %v4698_v13 = vld [vmem:[%s6850_s6 + $0x28] sm:$0xff]   ;;  %v4699_v14 = vld [vmem:[%s6850_s6 + $0x20] sm:$0xff]   ;;  %s3688_s22 = sshll.u32 %s1128_s15, 4  ;;  %s6856_s14 = sld [smem:[#allocation69_spill]]  ;;  %s6685_s22 = int_to_ptr.vmem [resolvable:$true] %s3688_s22 }
 0x162   : > { %4231 = vmatprep.subr.bf16.mxu0 %v5560_v3  ;;  %v4700_v15 = vld [vmem:[%s6850_s6 + $0x18] sm:$0xff]   ;;  %v4701_v16 = vld [vmem:[%s6850_s6 + $0x10] sm:$0xff]   ;;  %v4702_v17 = vld [vmem:[%s6850_s6 + $0x8] sm:$0xff]   ;;  %4253 = vmatprep.subr.bf16.mxu1 %v5560_v3  ;;  %p6857_p0 = scmp.ne.s32.totalorder %s6821_s7, 0  ;;  %s5564_s1 = smov [#allocation34]  }
 0x163   : > { %v4703_v18 = vld [vmem:[%s6850_s6] sm:$0xff]   ;;  %v4710_v40 = vld [vmem:[%s6851_s2 + $0x7c] ss:$20 sps:$4 sm:$0xff]   ;;  %v4717_v43 = vld [vmem:[%s6851_s2 + $0x58] ss:$20 sps:$4 sm:$0xff]  }
 0x164   : > { %4254 = vmatpush3.bf16.msra.mxu1 %v4706_v38  ;;  %v4711_v41 = vld [vmem:[%s6851_s2 + $0x80] ss:$20 sps:$4 sm:$0xff]   ;;  %v4713_v42 = vld [vmem:[%s6851_s2 + $0x84] ss:$20 sps:$4 sm:$0xff]   ;;  %v4719_v44 = vld [vmem:[%s6851_s2 + $0x5c] ss:$20 sps:$4 sm:$0xff]  }
 0x165   : > { %1141 = vadd.xlane.f32.xlu0 %v1136_v1  ;;  %4232 = vmatpush3.bf16.msra.mxu0 %v4697_v12  ;;  %v4720_v12 = vld [vmem:[%s6851_s2 + $0x28] ss:$20 sps:$4 sm:$0xff]  }
 0x166   : > { %4233 = vmatprep.subr.bf16.mxu0 %v5560_v3  ;;  %4255 = vmatprep.subr.bf16.mxu1 %v5560_v3 }
 0x167   : > { %s6683_s29 = scalar_lea.hbm %s6856_s14, %s4141_s21 }
 0x168   : > { %4256 = vmatpush3.bf16.msra.mxu1 %v4707_v39 }
 0x169   : > { %4234 = vmatpush3.bf16.msra.mxu0 %v4698_v13  ;;  %1561 = vmatprep.subr.bf16.mxu1 %v4710_v40  ;;  %v4725_v13 = vld [vmem:[%s6851_s2 + $0x34] ss:$20 sps:$4 sm:$0xff]  }
 0x16a   : > { %4235 = vmatprep.subr.bf16.mxu0 %v5560_v3 }
 0x16d   : > { %4236 = vmatpush3.bf16.msra.mxu0 %v4699_v14  ;;  %v4723_v14 = vld [vmem:[%s6851_s2 + $0x30] ss:$20 sps:$4 sm:$0xff]  }
 0x16e   : > { %4237 = vmatprep.subr.bf16.mxu0 %v5560_v3 }
 0x171   : > { %4238 = vmatpush3.bf16.msra.mxu0 %v4700_v15  ;;  %v4728_v15 = vld [vmem:[%s6851_s2 + $0x4] ss:$20 sps:$4 sm:$0xff]  }
 0x172   : > { %4239 = vmatprep.subr.bf16.mxu0 %v5560_v3 }
 0x175   : > { %4240 = vmatpush3.bf16.msra.mxu0 %v4701_v16  ;;  %v4726_v16 = vld [vmem:[%s6851_s2] ss:$20 sps:$4 sm:$0xff]  }
 0x176   : > { %4241 = vmatprep.subr.bf16.mxu0 %v5560_v3 }
 0x179   : > { %4242 = vmatpush3.bf16.msra.mxu0 %v4702_v17  ;;  %v4731_v17 = vld [vmem:[%s6851_s2 + $0xc] ss:$20 sps:$4 sm:$0xff]  }
 0x17a   : > { %4243 = vmatprep.subr.bf16.mxu0 %v5560_v3 }
 0x17d   : > { %4244 = vmatpush3.bf16.msra.mxu0 %v4703_v18  ;;  %v4729_v18 = vld [vmem:[%s6851_s2 + $0x8] ss:$20 sps:$4 sm:$0xff]  }
 0x17e   : > { %1604 = vmatprep.subr.bf16.mxu0 %v4713_v42 }
 0x1ea   : > { %v1140_v4 = vpop.xlane.xlu0 %1139 }
 0x1eb   : > { %v1144_v5 = vmul.f32 0.0078125, %v1140_v4 }
 0x1ed   : > { %v1146_v6 = vsub.f32 %v1135_v0, %v1144_v5 }
 0x1ee   : > { %v1142_v7 = vpop.xlane.xlu0 %1141 }
 0x1ef   : > { %v1145_v8 = vmul.f32 0.0078125, %v1142_v7  ;;  %v1148_v9 = vmul.f32 %v1146_v6, %v1146_v6  ;;  %v4708_v7 = vld [vmem:[%s6851_s2 + $0x78] ss:$20 sps:$4 sm:$0xff]  }
 0x1f1   : > { %v1147_v10 = vsub.f32 %v1136_v1, %v1145_v8  ;;  %1150 = vadd.xlane.f32.xlu1 %v1148_v9  ;;  %v4716_v9 = vld [vmem:[%s6851_s2 + $0x54] ss:$20 sps:$4 sm:$0xff]  }
 0x1f3   : > { %v1149_v11 = vmul.f32 %v1147_v10, %v1147_v10 }
 0x1f5   : > { %1152 = vadd.xlane.f32.xlu1 %v1149_v11  ;;  %v4722_v11 = vld [vmem:[%s6851_s2 + $0x2c] ss:$20 sps:$4 sm:$0xff]  }
 0x27a   : > { %v1151_v19 = vpop.xlane.xlu1 %1150 }
 0x27b   : > { %v1154_v20 = vmul.f32 0.0078125, %v1151_v19  ;;  %v5562_v19 = vmov 0  }
 0x27d   : > { %v1156_v21 = vadd.f32 1e-05, %v1154_v20 }
 0x27e   : > { %v1153_v22 = vpop.xlane.xlu1 %1152 }
 0x27f   : > { %4788 = vrsqrt.f32 %v1156_v21  ;;  %v1155_v23 = vmul.f32 0.0078125, %v1153_v22  ;;  %v4014_v21 = vld [vmem:[#allocation11] ss:$0 sm:$0xff] }
 0x281   : > { %v1157_v24 = vadd.f32 1e-05, %v1155_v23 }
 0x283   : > { %4790 = vrsqrt.f32 %v1157_v24 }
 0x28c   : > { %v4789_v25 = vpop.eup %4788 }
 0x28d   : > { %v1160_v26 = vmul.f32 %v4789_v25, %v1146_v6 }
 0x28f   : > { %v1168_v30 = vmul.f32 %v4003_v27, %v1160_v26 }
 0x290   : > { %v4791_v28 = vpop.eup %4790 }
 0x291   : > { %v1161_v29 = vmul.f32 %v4791_v28, %v1147_v10  ;;  %v1176_v33 = vadd.f32 %v4004_v31, %v1168_v30  ;;  %v4714_v10 = vld [vmem:[%s6851_s2 + $0x50] ss:$20 sps:$4 sm:$0xff]   ;;  %v4734_v30 = vld [vmem:[%s6851_s2 + $0x38] ss:$20 sps:$4 sm:$0xff]  }
 0x293   : > { %v1169_v32 = vmul.f32 %v4003_v27, %v1161_v29  ;;  %v4732_v27 = vld [vmem:[%s6851_s2 + $0x88] ss:$20 sps:$4 sm:$0xff]   ;;  %v4733_v29 = vld [vmem:[%s6851_s2 + $0x60] ss:$20 sps:$4 sm:$0xff]  }
 0x295   : > { %v1177_v34 = vadd.f32 %v4004_v31, %v1169_v32  ;;  %v4735_v31 = vld [vmem:[%s6851_s2 + $0x10] ss:$20 sps:$4 sm:$0xff]   ;;  %v1421_v32 = vlaneseq }
 0x297   : > { %v1195_v35 = vpack.c.bf16 %v1177_v34, %v1176_v33  ;;  %v6168_v33 = vshrl.u32 %v1421_v32, 7 }
 0x299   : > { %4246 = vmatmul.mubr.bf16.vlgmr.msra.gmra.mxu0 %v1195_v35  ;;  %v1423_v34 = vsub.s32 0, %v6168_v33  ;;  %v1431_v35 = vsub.s32 2, %v6168_v33  ;;  %v1427_v39 = vsub.s32 1, %v6168_v33  ;;  %v1435_v40 = vsub.s32 3, %v6168_v33 }
 0x29a   : > { %1605 = vmatpush1.bf16.msra.mxu0 %v4711_v41  ;;  %1628 = vmatprep.mubr.bf16.mxu0 %v5562_v19 }
 0x29b   : > { %1606 = vmatprep.subr.bf16.mxu0 %v4719_v44  ;;  %v1432_v41 = vrot.slane %v1418_v36, %v1431_v35  ;;  %v1428_v44 = vrot.slane %v1418_v36, %v1427_v39 }
 0x29e   : > { %1607 = vmatpush1.bf16.msra.mxu0 %v4717_v43 }
 0x29f   : > { %1608 = vmatprep.subr.bf16.mxu0 %v4725_v13  ;;  %v1843_v13 = vld [vmem:[%s6004_s3] sm:$0xff] }
 0x2a2   : > { %1609 = vmatpush1.bf16.msra.mxu0 %v4723_v14  ;;  %v1844_v14 = vld [vmem:[%s6004_s3 + $0x8] sm:$0xff] }
 0x2a3   : > { %1610 = vmatprep.subr.bf16.mxu0 %v4731_v17  ;;  %v1846_v17 = vld [vmem:[%s6004_s3 + $0x18] sm:$0xff] }
 0x2a6   : > { %1611 = vmatpush1.bf16.msra.mxu0 %v4729_v18  ;;  %v1847_v18 = vld [vmem:[%s6004_s3 + $0x20] sm:$0xff] }
 0x2a7   : > { %1778 = vmatprep.subr.bf16.mxu0 %v5562_v19 }
 0x359   : > { %v1284_v46 = vpop.f32.mrf.mxu0 }
 0x35a   : > { %v1285_v47 = vadd.f32 %v4005_v45, %v1284_v46 }
 0x35b   : > { %v4247_v48 = vpop.f32.mrf.mxu0 }
 0x35c   : > { %v1293_v49 = vmul.f32 0.044715, %v1285_v47  ;;  %v1291_v1 = vmul.f32 0.5, %v1285_v47 }
 0x35d   : > { %v1287_v50 = vpop.f32.mrf.mxu0 }
 0x35e   : > { %v1295_v51 = vmul.f32 %v1293_v49, %v1285_v47  ;;  %v1288_v52 = vadd.f32 %v4005_v45, %v1287_v50  ;;  %v1436_v45 = vrot.slane %v1418_v36, %v1435_v40 }
 0x35f   : > { %v4248_v53 = vpop.f32.mrf.mxu0 }
 0x360   : > { %v1297_v54 = vmul.f32 %v1295_v51, %v1285_v47  ;;  %v1294_v55 = vmul.f32 0.044715, %v1288_v52  ;;  %v1292_v2 = vmul.f32 0.5, %v1288_v52 }
 0x362   : > { %v1299_v56 = vadd.f32 %v1297_v54, %v1285_v47  ;;  %v1296_v57 = vmul.f32 %v1294_v55, %v1288_v52 }
 0x364   : > { %v1301_v58 = vmul.f32 0.7978846, %v1299_v56  ;;  %v1298_v59 = vmul.f32 %v1296_v57, %v1288_v52 }
 0x366   : > { %4792 = vtanh.f32 %v1301_v58  ;;  %v1300_v60 = vadd.f32 %v1298_v59, %v1288_v52 }
 0x368   : > { %v1302_v61 = vmul.f32 0.7978846, %v1300_v60 }
 0x36a   : > { %4794 = vtanh.f32 %v1302_v61 }
 0x373   : > { %v4793_v62 = vpop.eup %4792 }
 0x374   : > { %v1305_v63 = vadd.f32 1.0, %v4793_v62 }
 0x376   : > { %v1307_v5 = vmul.f32 %v1305_v63, %v1291_v1  ;;  %v1439_v1 = vsub.s32 4, %v6168_v33 }
 0x377   : > { %v4795_v0 = vpop.eup %4794 }
 0x378   : > { %v1306_v4 = vadd.f32 1.0, %v4795_v0 }
 0x37a   : > { %v1308_v6 = vmul.f32 %v1306_v4, %v1292_v2 }
 0x37c   : > { %v1318_v8 = vpack.c.bf16 %v1308_v6, %v1307_v5  ;;  %v1440_v5 = vrot.slane %v1418_v36, %v1439_v1 }
 0x37e   : > { %4258 = vmatmul.mubr.msk.bf16.vlgmr.msra.gmra.mxu1 %vm1349_vm1, %v1318_v8 }
 0x37f   : > { %1562 = vmatpush1.bf16.msra.mxu1 %v4708_v7  ;;  %1585 = vmatprep.mubr.bf16.mxu1 %v5562_v19 }
 0x380   : > { %1563 = vmatprep.subr.bf16.mxu1 %v4716_v9 }
 0x383   : > { %1564 = vmatpush1.bf16.msra.mxu1 %v4714_v10 }
 0x384   : > { %1565 = vmatprep.subr.bf16.mxu1 %v4722_v11 }
 0x387   : > { %1566 = vmatpush1.bf16.msra.mxu1 %v4720_v12  ;;  %v4736_v12 = vld [vmem:[%s6852_s11 + $0x4] ss:$8 sps:$4 sm:$0xff]  }
 0x388   : > { %1567 = vmatprep.subr.bf16.mxu1 %v4728_v15  ;;  %v1845_v15 = vld [vmem:[%s6004_s3 + $0x10] sm:$0xff] }
 0x38b   : > { %1568 = vmatpush1.bf16.msra.mxu1 %v4726_v16  ;;  %v4676_v16 = vpack.i.bf16 %v1844_v14, %v1843_v13 }
 0x38c   : > { %4261 = vmatprep.subr.bf16.mxu1 %v5560_v3 }
 0x43e   : > { %v1387_v20 = vpop.f32.mrf.mxu1 }
 0x43f   : > { %v1388_v24 = vadd.f32 %v4014_v21, %v1387_v20  ;;  %v1848_v20 = vld [vmem:[%s6004_s3 + $0x28] sm:$0xff] }
 0x440   : > { %v4259_v22 = vpop.f32.mrf.mxu1 }
 0x441   : > { %v1849_v22 = vld [vmem:[%s6004_s3 + $0x30] sm:$0xff] }
 0x442   : > { %v1390_v23 = vpop.f32.mrf.mxu1 }
 0x443   : > { %v1391_v25 = vadd.f32 %v4014_v21, %v1390_v23  ;;  %v4681_v21 = vpack.i.bf16 %v1846_v17, %v1845_v15  ;;  %v1850_v23 = vld [vmem:[%s6004_s3 + $0x38] sm:$0xff] }
 0x444   : > { %v4260_v26 = vpop.f32.mrf.mxu1 }
 0x445   : > { %v1419_v28 = vpack.c.bf16 %v1391_v25, %v1388_v24  ;;  %v4748_v24 = vld [vmem:[%s6853_s28 + $0x38] sm:$0xff]   ;;  %v4686_v25 = vpack.i.bf16 %v1848_v20, %v1847_v18  ;;  %v4749_v26 = vld [vmem:[%s6853_s28 + $0x30] sm:$0xff]  }
 0x447   : > { %4040 = vmatmul.mubr.msk.bf16.vlgmr.msra.gmra.mxu1 %vm1349_vm1, %v1419_v28  ;;  %4041 = vmatmul.mubr.msk.bf16.vlgmr.msra.gmra.mxu0 %vm1349_vm1, %v1419_v28 }
 0x448   : > { %4262 = vmatpush3.bf16.msra.mxu1 %v4732_v27  ;;  %4269 = vmatprep.mubr.msk.bf16.mxu1 %vm5561_vm0, %v5560_v3  ;;  %v4691_v27 = vpack.i.bf16 %v1850_v23, %v1849_v22 }
 0x449   : > { %4263 = vmatprep.subr.bf16.mxu1 %v5560_v3  ;;  %4051 = vmatprep.mubr.msk.bf16.mxu0 %vm1765_vm2, %v4736_v12 }
 0x44c   : > { %4264 = vmatpush3.bf16.msra.mxu1 %v4733_v29  ;;  %v4751_v29 = vld [vmem:[%s6853_s28 + $0x20] sm:$0xff]  }
 0x44d   : > { %4265 = vmatprep.subr.bf16.mxu1 %v5560_v3 }
 0x450   : > { %4266 = vmatpush3.bf16.msra.mxu1 %v4734_v30 }
 0x451   : > { %4267 = vmatprep.subr.bf16.mxu1 %v5560_v3  ;;  %v1424_v3 = vrot.slane %v1418_v36, %v1423_v34 }
 0x454   : > { %4268 = vmatpush3.bf16.msra.mxu1 %v4735_v31 }
 0x455   : > { %4273 = vmatprep.subr.bf16.mxu1 %v4748_v24 }
 0x457   : > { %4270 = vmatmul.mubr.msk.bf16.vlgmr.msra.gmra.mxu1 %vm1349_vm1, %v1419_v28  ;;  %v4750_v28 = vld [vmem:[%s6853_s28 + $0x28] sm:$0xff]  }
 0x458   : > { %4274 = vmatpush3.bf16.msra.mxu1 %v4748_v24 }
 0x459   : > { %4275 = vmatprep.subr.bf16.mxu1 %v4749_v26 }
 0x45c   : > { %4276 = vmatpush3.bf16.msra.mxu1 %v4749_v26 }
 0x45d   : > { %4277 = vmatprep.subr.bf16.mxu1 %v4750_v28 }
 0x460   : > { %4278 = vmatpush3.bf16.msra.mxu1 %v4750_v28 }
 0x461   : > { %4279 = vmatprep.subr.bf16.mxu1 %v4751_v29 }
 0x464   : > { %4280 = vmatpush3.bf16.msra.mxu1 %v4751_v29 }
 0x507   : > { %v1587_v37 = vpop.f32.mrf.mxu1  ;;  %v1630_v38 = vpop.f32.mrf.mxu0 }
 0x508   : > { %v6178_v48 = vadd.f32 %v1587_v37, %v1424_v3  ;;  %v6180_v49 = vadd.f32 %v1630_v38, %v1432_v41 }
 0x509   : > { %v1589_v42 = vpop.f32.mrf.mxu1  ;;  %v1632_v43 = vpop.f32.mrf.mxu0 }
 0x50a   : > { %v6192_v57 = vadd.f32 %v1589_v42, %v1428_v44  ;;  %v1633_v58 = vadd.f32 %v1632_v43, %v1436_v45 }
 0x50b   : > { %v1591_v46 = vpop.f32.mrf.mxu1  ;;  %v1634_v47 = vpop.f32.mrf.mxu0 }
 0x50c   : > { %v6182_v50 = vadd.f32 %v1591_v46, %v1424_v3  ;;  %v6184_v51 = vadd.f32 %v1634_v47, %v1432_v41 }
 0x50d   : > { %v1593_v52 = vpop.f32.mrf.mxu1  ;;  %v1636_v53 = vpop.f32.mrf.mxu0 }
 0x50e   : > { %v1720_v54 = vpack.c.bf16 %v6182_v50, %v6178_v48  ;;  %v4661_v55 = vpack.i.bf16 %v6184_v51, %v6180_v49  ;;  %v1724_v56 = vpack.c.bf16 %v6184_v51, %v6180_v49  ;;  %v6194_v59 = vadd.f32 %v1593_v52, %v1428_v44  ;;  %v4738_v49 = vld [vmem:[%s6852_s11] ss:$8 sps:$4 sm:$0xff]   ;;  %v4739_v51 = vld [vmem:[%s6852_s11 + $0x14] ss:$8 sps:$4 sm:$0xff]  }
 0x50f   : > { %v1637_v60 = vadd.f32 %v1636_v53, %v1436_v45  ;;  %v4671_v2 = vpack.i.bf16 %v6182_v50, %v6178_v48  ;;  %v4741_v48 = vld [vmem:[%s6852_s11 + $0x10] ss:$8 sps:$4 sm:$0xff]   ;;  %v4742_v50 = vld [vmem:[%s6852_s11 + $0x24] ss:$8 sps:$4 sm:$0xff]   ;;  %v4744_v52 = vld [vmem:[%s6852_s11 + $0x20] ss:$8 sps:$4 sm:$0xff]  }
 0x510   : > { %4662 = vrot.lane.b32.xlu1 %v4661_v55, %s5563_s13  ;;  %v1722_v61 = vpack.c.bf16 %v6194_v59, %v6192_v57  ;;  %v4666_v0 = vpack.i.bf16 %v6194_v59, %v6192_v57  ;;  %v4745_v53 = vld [vmem:[%s6852_s11 + $0x34] ss:$8 sps:$4 sm:$0xff]   ;;  %v4754_v57 = vld [vmem:[%s6853_s28 + $0x8] sm:$0xff]  }
 0x511   : > { %v4656_v62 = vpack.i.bf16 %v1637_v60, %v1633_v58  ;;  %v1726_v63 = vpack.c.bf16 %v1637_v60, %v1633_v58  ;;  %v4752_v55 = vld [vmem:[%s6853_s28 + $0x18] sm:$0xff]   ;;  %v4755_v58 = vld [vmem:[%s6853_s28] sm:$0xff]  }
 0x512   : > { %4281 = vmatprep.subr.bf16.mxu1 %v4752_v55 }
 0x513   : > { %4657 = vrot.lane.b32.xlu0 %v4656_v62, %s5563_s13  ;;  %4282 = vmatpush3.bf16.msra.mxu1 %v4752_v55 }
 0x514   : > { %4667 = vrot.lane.b32.xlu1 %v4666_v0, %s5563_s13 }
 0x517   : > { %v1673_v4 = vpop.f32.mrf.mxu1  ;;  %4677 = vrot.lane.b32.xlu0 %v4676_v16, %s5563_s13 }
 0x518   : > { %4672 = vrot.lane.b32.xlu1 %v4671_v2, %s5563_s13  ;;  %v6207_v8 = vadd.f32 %v1673_v4, %v1440_v5 }
 0x519   : > { %v4271_v6 = vpop.f32.mrf.mxu1 }
 0x51b   : > { %v1676_v7 = vpop.f32.mrf.mxu1  ;;  %4687 = vrot.lane.b32.xlu0 %v4686_v25, %s5563_s13 }
 0x51c   : > { %v6209_v9 = vadd.f32 %v1676_v7, %v1440_v5  ;;  %4682 = vrot.lane.b32.xlu1 %v4681_v21, %s5563_s13 }
 0x51d   : > { %v4272_v10 = vpop.f32.mrf.mxu1 }
 0x51e   : > { %v1728_v11 = vpack.c.bf16 %v6209_v9, %v6207_v8 }
 0x520   : > { %4692 = vrot.lane.b32.xlu1 %v4691_v27, %s5563_s13 }
 0x582   : > { %v4663_v36 = vpop.permute.xlu1 %4662 }
 0x583   : > { %v4665_v37 = vunpack.i.h.bf16 %v4663_v36  ;;  %v4664_v38 = vunpack.i.l.bf16 %v4663_v36 }
 0x585   : > { %v4658_v30 = vpop.permute.xlu0 %4657  ;;  %v1725_v40 = vpack.c.bf16 %v4665_v37, %v4664_v38 }
 0x586   : > { %v4660_v31 = vunpack.i.h.bf16 %v4658_v30  ;;  %v4659_v32 = vunpack.i.l.bf16 %v4658_v30  ;;  %v4668_v3 = vpop.permute.xlu1 %4667 }
 0x587   : > { %v4670_v41 = vunpack.i.h.bf16 %v4668_v3  ;;  %v4669_v42 = vunpack.i.l.bf16 %v4668_v3  ;;  %v4757_v3 = vld [vmem:[#allocation16 + $0x10] sm:$0xff]  }
 0x588   : > { %v1727_v35 = vpack.c.bf16 %v4660_v31, %v4659_v32 }
 0x589   : > { %v1723_v43 = vpack.c.bf16 %v4670_v41, %v4669_v42  ;;  %v4678_v59 = vpop.permute.xlu0 %4677  ;;  %v4758_v41 = vld [vmem:[#allocation16 + $0x8] sm:$0xff]   ;;  %v4759_v42 = vld [vmem:[#allocation16] sm:$0xff]  }
 0x58a   : > { %1779 = vmatpush1.bf16.msra.mxu0 %v1727_v35  ;;  %v4673_v44 = vpop.permute.xlu1 %4672  ;;  %v4679_v62 = vunpack.i.l.bf16 %v4678_v59 }
 0x58b   : > { %1780 = vmatprep.subr.bf16.mxu0 %v5562_v19  ;;  %v4675_v45 = vunpack.i.h.bf16 %v4673_v44  ;;  %v4674_v46 = vunpack.i.l.bf16 %v4673_v44 }
 0x58d   : > { %v1721_v47 = vpack.c.bf16 %v4675_v45, %v4674_v46  ;;  %v4688_v15 = vpop.permute.xlu0 %4687 }
 0x58e   : > { %1781 = vmatpush1.bf16.msra.mxu0 %v1726_v63  ;;  %v4683_v5 = vpop.permute.xlu1 %4682  ;;  %v4690_v18 = vunpack.i.h.bf16 %v4688_v15  ;;  %v4689_v20 = vunpack.i.l.bf16 %v4688_v15 }
 0x58f   : > { %1782 = vmatprep.subr.bf16.mxu0 %v5562_v19  ;;  %v4685_v8 = vunpack.i.h.bf16 %v4683_v5  ;;  %v4684_v9 = vunpack.i.l.bf16 %v4683_v5 }
 0x592   : > { %1783 = vmatpush1.bf16.msra.mxu0 %v1725_v40  ;;  %v4693_v26 = vpop.permute.xlu1 %4692  ;;  %v4756_v40 = vld [vmem:[#allocation16 + $0x18] sm:$0xff]  }
 0x593   : > { %1784 = vmatprep.subr.bf16.mxu0 %v5562_v19  ;;  %v4695_v29 = vunpack.i.h.bf16 %v4693_v26  ;;  %v4694_v30 = vunpack.i.l.bf16 %v4693_v26 }
 0x596   : > { %1785 = vmatpush1.bf16.msra.mxu0 %v1724_v56  ;;  %v4753_v56 = vld [vmem:[%s6853_s28 + $0x10] sm:$0xff]  }
 0x597   : > { %1786 = vmatprep.subr.bf16.mxu0 %v5562_v19  ;;  %4283 = vmatprep.subr.bf16.mxu1 %v4753_v56 }
 0x598   : > { %4284 = vmatpush3.bf16.msra.mxu1 %v4753_v56 }
 0x599   : > { %4285 = vmatprep.subr.bf16.mxu1 %v4754_v57 }
 0x59a   : > { %1787 = vmatpush1.bf16.msra.mxu0 %v1723_v43  ;;  %v4055_v43 = vld [vmem:[#allocation14] ss:$0 sm:$0xff] }
 0x59b   : > { %1788 = vmatprep.subr.bf16.mxu0 %v5562_v19 }
 0x59c   : > { %4286 = vmatpush3.bf16.msra.mxu1 %v4754_v57 }
 0x59d   : > { %4287 = vmatprep.subr.bf16.mxu1 %v4755_v58 }
 0x59e   : > { %1789 = vmatpush1.bf16.msra.mxu0 %v1722_v61  ;;  %v4680_v61 = vunpack.i.h.bf16 %v4678_v59 }
 0x59f   : > { %1790 = vmatprep.subr.bf16.mxu0 %v5562_v19 }
 0x5a0   : > { %4288 = vmatpush3.bf16.msra.mxu1 %v4755_v58 }
 0x5a1   : > { %4297 = vmatprep.subr.bf16.mxu1 %v4756_v40 }
 0x5a2   : > { %1791 = vmatpush1.bf16.msra.mxu0 %v1721_v47 }
 0x5a3   : > { %1792 = vmatprep.subr.bf16.mxu0 %v5562_v19 }
 0x5a6   : > { %1793 = vmatpush1.bf16.msra.mxu0 %v1720_v54  ;;  %v4747_v54 = vld [vmem:[%s6852_s11 + $0x30] ss:$8 sps:$4 sm:$0xff]  }
 0x5a7   : > { %1808 = vmatprep.subr.bf16.mxu0 %v5562_v19 }
 0x5aa   : > { %1809 = vmatpush2.bf16.msra.mxu0 %v1728_v11 }
 0x5ad   : > { %1811 = vmatmul.mubr.bf16.vlgmr.msra.gmra.mxu0 %v4738_v49 }
 0x5ae   : > { %4052 = vmatprep.mubr.msk.bf16.mxu0 %vm1765_vm2, %v4739_v51 }
 0x5b5   : > { %1819 = vmatmul.mubr.bf16.gmra.mxu0 %v4741_v48 }
 0x5b6   : > { %4053 = vmatprep.mubr.msk.bf16.mxu0 %vm1765_vm2, %v4742_v50 }
 0x5bd   : > { %1827 = vmatmul.mubr.bf16.gmra.mxu0 %v4744_v52 }
 0x5be   : > { %4054 = vmatprep.mubr.msk.bf16.mxu0 %vm1765_vm2, %v4745_v53 }
 0x5c5   : > { %1835 = vmatmul.mubr.bf16.gmra.mxu0 %v4747_v54 }
 0x66d   : > { %v1812_v60 = vpop.f32.mrf.mxu0 }
 0x66e   : > { %v1883_v1 = vsel %vm1349_vm1, %v1812_v60, %v4679_v62 }
 0x66f   : > { %v1814_v63 = vpop.f32.mrf.mxu0 }
 0x671   : > { %v1815_v0 = vpop.f32.mrf.mxu0 }
 0x672   : > { %v1884_v2 = vsel %vm1349_vm1, %v1815_v0, %v4680_v61 }
 0x673   : > { %v1908_v4 = vpack.c.bf16 %v1884_v2, %v1883_v1  ;;  %v1817_v6 = vpop.f32.mrf.mxu0 }
 0x675   : > { %v1820_v7 = vpop.f32.mrf.mxu0  ;;  %4289 = vmatprep.mubr.bf16.mxu1 %v1908_v4 }
 0x676   : > { %v1885_v12 = vsel %vm1349_vm1, %v1820_v7, %v4684_v9 }
 0x677   : > { %v1822_v10 = vpop.f32.mrf.mxu0 }
 0x679   : > { %v1823_v11 = vpop.f32.mrf.mxu0 }
 0x67a   : > { %v1886_v13 = vsel %vm1349_vm1, %v1823_v11, %v4685_v8 }
 0x67b   : > { %v1909_v14 = vpack.c.bf16 %v1886_v13, %v1885_v12  ;;  %v1825_v16 = vpop.f32.mrf.mxu0 }
 0x67d   : > { %v1828_v17 = vpop.f32.mrf.mxu0  ;;  %4290 = vmatmul.mubr.bf16.vlgmr.msra.gmra.mxu1 %v1909_v14 }
 0x67e   : > { %v1887_v23 = vsel %vm1349_vm1, %v1828_v17, %v4689_v20  ;;  %4298 = vmatpush3.bf16.msra.mxu1 %v4756_v40 }
 0x67f   : > { %v1830_v21 = vpop.f32.mrf.mxu0  ;;  %4299 = vmatprep.subr.bf16.mxu1 %v4757_v3 }
 0x681   : > { %v1831_v22 = vpop.f32.mrf.mxu0 }
 0x682   : > { %v1888_v24 = vsel %vm1349_vm1, %v1831_v22, %v4690_v18  ;;  %4300 = vmatpush3.bf16.msra.mxu1 %v4757_v3 }
 0x683   : > { %v1910_v25 = vpack.c.bf16 %v1888_v24, %v1887_v23  ;;  %v1833_v27 = vpop.f32.mrf.mxu0  ;;  %4301 = vmatprep.subr.bf16.mxu1 %v4758_v41 }
 0x685   : > { %v1836_v28 = vpop.f32.mrf.mxu0  ;;  %4293 = vmatprep.mubr.bf16.mxu1 %v1910_v25 }
 0x686   : > { %v1889_v35 = vsel %vm1349_vm1, %v1836_v28, %v4694_v30  ;;  %4302 = vmatpush3.bf16.msra.mxu1 %v4758_v41 }
 0x687   : > { %v1838_v31 = vpop.f32.mrf.mxu0  ;;  %4303 = vmatprep.subr.bf16.mxu1 %v4759_v42 }
 0x689   : > { %v1839_v32 = vpop.f32.mrf.mxu0 }
 0x68a   : > { %v1890_v36 = vsel %vm1349_vm1, %v1839_v32, %v4695_v29  ;;  %4304 = vmatpush3.bf16.msra.mxu1 %v4759_v42 }
 0x68b   : > { %v1911_v37 = vpack.c.bf16 %v1890_v36, %v1889_v35  ;;  %v1841_v38 = vpop.f32.mrf.mxu0 }
 0x68d   : > { %4294 = vmatmul.mubr.bf16.gmra.mxu1 %v1911_v37 }
 0x73d   : > { %v4291_v44 = vpop.f32.mrf.mxu1 }
 0x73e   : > { %v6305_v45 = vadd.f32 %v4291_v44, %v4055_v43 }
 0x73f   : > { %v2000_v46 = vpop.f32.mrf.mxu1 }
 0x740   : > { %v2041_v47 = vmul.f32 0.044715, %v6305_v45  ;;  %v6308_v49 = vadd.f32 %v4055_v43, %v2000_v46 }
 0x741   : > { %v4292_v51 = vpop.f32.mrf.mxu1 }
 0x742   : > { %v2049_v48 = vmul.f32 %v2041_v47, %v6305_v45  ;;  %v2039_v50 = vmul.f32 0.044715, %v6308_v49  ;;  %v2012_v52 = vadd.f32 %v4292_v51, %v4055_v43 }
 0x743   : > { %v2003_v53 = vpop.f32.mrf.mxu1 }
 0x744   : > { %v2057_v54 = vmul.f32 %v2049_v48, %v6305_v45  ;;  %v2047_v55 = vmul.f32 %v2039_v50, %v6308_v49  ;;  %v2042_v56 = vmul.f32 0.044715, %v2012_v52  ;;  %v2004_v57 = vadd.f32 %v4055_v43, %v2003_v53 }
 0x745   : > { %v2034_v47 = vmul.f32 0.5, %v2012_v52  ;;  %v2031_v48 = vmul.f32 0.5, %v6308_v49 }
 0x746   : > { %v2065_v58 = vadd.f32 %v2057_v54, %v6305_v45  ;;  %v2055_v59 = vmul.f32 %v2047_v55, %v6308_v49  ;;  %v2050_v60 = vmul.f32 %v2042_v56, %v2012_v52  ;;  %v2040_v61 = vmul.f32 0.044715, %v2004_v57 }
 0x747   : > { %v2032_v50 = vmul.f32 0.5, %v2004_v57  ;;  %v2033_v54 = vmul.f32 0.5, %v6305_v45 }
 0x748   : > { %v2073_v62 = vmul.f32 0.7978846, %v2065_v58  ;;  %v2063_v63 = vadd.f32 %v2055_v59, %v6308_v49  ;;  %v2058_v0 = vmul.f32 %v2050_v60, %v2012_v52  ;;  %v2048_v1 = vmul.f32 %v2040_v61, %v2004_v57 }
 0x74a   : > { %v2071_v2 = vmul.f32 0.7978846, %v2063_v63  ;;  %v2066_v4 = vadd.f32 %v2058_v0, %v2012_v52  ;;  %v2056_v5 = vmul.f32 %v2048_v1, %v2004_v57  ;;  %4796 = vtanh.f32 %v2073_v62 }
 0x74c   : > { %v2074_v6 = vmul.f32 0.7978846, %v2066_v4  ;;  %4798 = vtanh.f32 %v2071_v2  ;;  %v2064_v7 = vadd.f32 %v2056_v5, %v2004_v57 }
 0x74d   : > { %v4295_v8 = vpop.f32.mrf.mxu1 }
 0x74e   : > { %4800 = vtanh.f32 %v2074_v6  ;;  %v6317_v9 = vadd.f32 %v4295_v8, %v4055_v43  ;;  %v2072_v10 = vmul.f32 0.7978846, %v2064_v7 }
 0x74f   : > { %v2016_v11 = vpop.f32.mrf.mxu1 }
 0x750   : > { %v2045_v12 = vmul.f32 0.044715, %v6317_v9  ;;  %v2017_v13 = vadd.f32 %v4055_v43, %v2016_v11  ;;  %4802 = vtanh.f32 %v2072_v10  ;;  %v2037_v6 = vmul.f32 0.5, %v6317_v9 }
 0x751   : > { %v4296_v14 = vpop.f32.mrf.mxu1 }
 0x752   : > { %v2053_v15 = vmul.f32 %v2045_v12, %v6317_v9  ;;  %v2043_v16 = vmul.f32 0.044715, %v2017_v13  ;;  %v2028_v17 = vadd.f32 %v4296_v14, %v4055_v43  ;;  %v2035_v45 = vmul.f32 0.5, %v2017_v13 }
 0x753   : > { %v2019_v18 = vpop.f32.mrf.mxu1 }
 0x754   : > { %v2061_v20 = vmul.f32 %v2053_v15, %v6317_v9  ;;  %v2051_v21 = vmul.f32 %v2043_v16, %v2017_v13  ;;  %v2046_v22 = vmul.f32 0.044715, %v2028_v17  ;;  %v2020_v23 = vadd.f32 %v4055_v43, %v2019_v18  ;;  %v4064_v16 = vld [vmem:[#allocation17] ss:$0 sm:$0xff] }
 0x755   : > { %v2038_v1 = vmul.f32 0.5, %v2028_v17 }
 0x756   : > { %v2069_v24 = vadd.f32 %v2061_v20, %v6317_v9  ;;  %v2059_v25 = vmul.f32 %v2051_v21, %v2017_v13  ;;  %v2054_v26 = vmul.f32 %v2046_v22, %v2028_v17  ;;  %v2044_v27 = vmul.f32 0.044715, %v2020_v23 }
 0x757   : > { %v4797_v31 = vpop.eup %4796  ;;  %v2036_v4 = vmul.f32 0.5, %v2020_v23 }
 0x758   : > { %v2077_v28 = vmul.f32 0.7978846, %v2069_v24  ;;  %v2067_v29 = vadd.f32 %v2059_v25, %v2017_v13  ;;  %v2062_v30 = vmul.f32 %v2054_v26, %v2028_v17  ;;  %v2052_v32 = vmul.f32 %v2044_v27, %v2020_v23 }
 0x759   : > { %v4799_v35 = vpop.eup %4798  ;;  %v2089_v46 = vadd.f32 1.0, %v4797_v31 }
 0x75a   : > { %v2075_v36 = vmul.f32 0.7978846, %v2067_v29  ;;  %v2070_v37 = vadd.f32 %v2062_v30, %v2028_v17  ;;  %v2060_v40 = vmul.f32 %v2052_v32, %v2020_v23  ;;  %4804 = vtanh.f32 %v2077_v28 }
 0x75b   : > { %v4801_v38 = vpop.eup %4800  ;;  %v2087_v43 = vadd.f32 1.0, %v4799_v35  ;;  %v2097_v59 = vmul.f32 %v2089_v46, %v2033_v54 }
 0x75c   : > { %v2090_v3 = vadd.f32 1.0, %v4801_v38  ;;  %v2078_v41 = vmul.f32 0.7978846, %v2070_v37  ;;  %4806 = vtanh.f32 %v2075_v36  ;;  %v2068_v42 = vadd.f32 %v2060_v40, %v2020_v23 }
 0x75d   : > { %v4803_v44 = vpop.eup %4802  ;;  %v2095_v56 = vmul.f32 %v2087_v43, %v2031_v48 }
 0x75e   : > { %4808 = vtanh.f32 %v2078_v41  ;;  %v2076_v51 = vmul.f32 0.7978846, %v2068_v42  ;;  %v2088_v53 = vadd.f32 1.0, %v4803_v44  ;;  %v2098_v55 = vmul.f32 %v2090_v3, %v2034_v47 }
 0x760   : > { %4810 = vtanh.f32 %v2076_v51  ;;  %v2096_v58 = vmul.f32 %v2088_v53, %v2032_v50  ;;  %v2113_v61 = vpack.c.bf16 %v2098_v55, %v2097_v59 }
 0x762   : > { %v2112_v60 = vpack.c.bf16 %v2096_v58, %v2095_v56 }
 0x764   : > { %4305 = vmatprep.mubr.msk.bf16.mxu1 %vm1349_vm1, %v2112_v60 }
 0x765   : > { %4306 = vmatmul.mubr.msk.bf16.vlgmr.msra.gmra.mxu1 %vm1349_vm1, %v2113_v61 }
 0x767   : > { %v4805_v52 = vpop.eup %4804 }
 0x768   : > { %v2093_v2 = vadd.f32 1.0, %v4805_v52 }
 0x769   : > { %v4807_v62 = vpop.eup %4806 }
 0x76a   : > { %v2091_v49 = vadd.f32 1.0, %v4807_v62  ;;  %v2101_v11 = vmul.f32 %v2093_v2, %v2037_v6 }
 0x76b   : > { %v4809_v63 = vpop.eup %4808 }
 0x76c   : > { %v2094_v0 = vadd.f32 1.0, %v4809_v63  ;;  %v2099_v8 = vmul.f32 %v2091_v49, %v2035_v45 }
 0x76d   : > { %v4811_v57 = vpop.eup %4810 }
 0x76e   : > { %v2092_v5 = vadd.f32 1.0, %v4811_v57  ;;  %v2102_v7 = vmul.f32 %v2094_v0, %v2038_v1 }
 0x770   : > { %v2100_v10 = vmul.f32 %v2092_v5, %v2036_v4  ;;  %v2115_v14 = vpack.c.bf16 %v2102_v7, %v2101_v11 }
 0x772   : > { %v2114_v12 = vpack.c.bf16 %v2100_v10, %v2099_v8 }
 0x774   : > { %4309 = vmatprep.mubr.msk.bf16.mxu1 %vm1349_vm1, %v2114_v12 }
 0x775   : > { %4310 = vmatmul.mubr.msk.bf16.gmra.mxu1 %vm1349_vm1, %v2115_v14 }
 0x776   : > { %2466 = vmatprep.mubr.bf16.mxu1 %v5562_v19 }
 0x825   : > { %v4307_v15 = vpop.f32.mrf.mxu1 }
 0x826   : > { %v2201_v20 = vadd.f32 %v4307_v15, %v4064_v16 }
 0x827   : > { %v2192_v17 = vpop.f32.mrf.mxu1 }
 0x828   : > { %v2193_v13 = vadd.f32 %v4064_v16, %v2192_v17  ;;  %v2231_v25 = vsel %vm1349_vm1, %v2201_v20, 0.0 }
 0x829   : > { %v4308_v18 = vpop.f32.mrf.mxu1 }
 0x82a   : > { %v2225_v9 = vsel %vm1349_vm1, %v2193_v13, 0.0  ;;  %v2204_v23 = vadd.f32 %v4308_v18, %v4064_v16 }
 0x82b   : > { %v2195_v21 = vpop.f32.mrf.mxu1  ;;  %2226 = vadd.xlane.f32.xlu0 %v2225_v9  ;;  %v4760_v9 = vld [vmem:[#allocation20 + $0x30] ss:$8 sps:$4 sm:$0xff]  }
 0x82c   : > { %v2196_v22 = vadd.f32 %v4064_v16, %v2195_v21  ;;  %v2234_v26 = vsel %vm1349_vm1, %v2204_v23, 0.0  ;;  %v4765_v21 = vld [vmem:[#allocation20 + $0x24] ss:$8 sps:$4 sm:$0xff]  }
 0x82e   : > { %v2228_v24 = vsel %vm1349_vm1, %v2196_v22, 0.0 }
 0x82f   : > { %2229 = vadd.xlane.f32.xlu1 %v2228_v24  ;;  %2232 = vadd.xlane.f32.xlu0 %v2231_v25  ;;  %v4766_v24 = vld [vmem:[#allocation20 + $0x10] ss:$8 sps:$4 sm:$0xff]   ;;  %v4771_v25 = vld [vmem:[#allocation20 + $0x4] ss:$8 sps:$4 sm:$0xff]  }
 0x833   : > { %2235 = vadd.xlane.f32.xlu0 %v2234_v26  ;;  %v4769_v26 = vld [vmem:[#allocation20] ss:$8 sps:$4 sm:$0xff]  }
 0x835   : > { %v4311_v27 = vpop.f32.mrf.mxu1 }
 0x836   : > { %v2217_v31 = vadd.f32 %v4311_v27, %v4064_v16  ;;  %v4772_v27 = vld [vmem:[%s6750_s19 + $0x18] sm:$0xff]  }
 0x837   : > { %v2208_v28 = vpop.f32.mrf.mxu1  ;;  %4313 = vmatprep.subr.bf16.mxu0 %v4772_v27 }
 0x838   : > { %v2209_v29 = vadd.f32 %v4064_v16, %v2208_v28  ;;  %v2243_v40 = vsel %vm1349_vm1, %v2217_v31, 0.0  ;;  %4314 = vmatpush3.bf16.msra.mxu0 %v4772_v27 }
 0x839   : > { %v4312_v30 = vpop.f32.mrf.mxu1 }
 0x83a   : > { %v2237_v32 = vsel %vm1349_vm1, %v2209_v29, 0.0  ;;  %v2220_v37 = vadd.f32 %v4312_v30, %v4064_v16 }
 0x83b   : > { %v2211_v35 = vpop.f32.mrf.mxu1  ;;  %2238 = vadd.xlane.f32.xlu0 %v2237_v32 }
 0x83c   : > { %v2212_v36 = vadd.f32 %v4064_v16, %v2211_v35  ;;  %v2246_v3 = vsel %vm1349_vm1, %v2220_v37, 0.0 }
 0x83e   : > { %v2240_v38 = vsel %vm1349_vm1, %v2212_v36, 0.0 }
 0x83f   : > { %2241 = vadd.xlane.f32.xlu1 %v2240_v38  ;;  %2244 = vadd.xlane.f32.xlu0 %v2243_v40 }
 0x843   : > { %2247 = vadd.xlane.f32.xlu1 %v2246_v3 }
 0x8b4   : > { %v2227_v41 = vpop.xlane.xlu0 %2226 }
 0x8b5   : > { %v2250_v42 = vmul.f32 0.015625, %v2227_v41 }
 0x8b7   : > { %v6339_v43 = vsub.f32 %v2193_v13, %v2250_v42 }
 0x8b8   : > { %v2230_v44 = vpop.xlane.xlu1 %2229  ;;  %v2233_v46 = vpop.xlane.xlu0 %2232 }
 0x8b9   : > { %v2251_v47 = vmul.f32 0.015625, %v2230_v44  ;;  %v2252_v51 = vmul.f32 0.015625, %v2233_v46  ;;  %v2266_v48 = vmul.f32 %v6339_v43, %v6339_v43 }
 0x8bb   : > { %v6343_v50 = vsub.f32 %v2196_v22, %v2251_v47  ;;  %v6345_v53 = vsub.f32 %v2201_v20, %v2252_v51  ;;  %v2274_v54 = vsel %vm1349_vm1, %v2266_v48, 0.0  ;;  %v4762_v20 = vld [vmem:[#allocation20 + $0x34] ss:$8 sps:$4 sm:$0xff]   ;;  %v4763_v22 = vld [vmem:[#allocation20 + $0x20] ss:$8 sps:$4 sm:$0xff]  }
 0x8bc   : > { %v2236_v55 = vpop.xlane.xlu0 %2235  ;;  %2275 = vadd.xlane.f32.xlu0 %v2274_v54  ;;  %2442 = vmatprep.subr.bf16.mxu1 %v4762_v20  ;;  %v4073_v47 = vld [vmem:[%s6854_s16] ss:$0 sm:$0xff]  ;;  %s6855_s16 = sld [smem:[#allocation68_spill]] }
 0x8bd   : > { %v2253_v56 = vmul.f32 0.015625, %v2236_v55  ;;  %v2267_v58 = vmul.f32 %v6343_v50, %v6343_v50  ;;  %v2268_v59 = vmul.f32 %v6345_v53, %v6345_v53  ;;  %2443 = vmatpush1.bf16.msra.mxu1 %v4760_v9 }
 0x8be   : > { %2444 = vmatprep.subr.bf16.mxu1 %v4765_v21 }
 0x8bf   : > { %v6352_v60 = vsub.f32 %v2204_v23, %v2253_v56  ;;  %v2277_v61 = vsel %vm1349_vm1, %v2267_v58, 0.0  ;;  %v2280_v52 = vsel %vm1349_vm1, %v2268_v59, 0.0  ;;  %v4768_v23 = vld [vmem:[#allocation20 + $0x14] ss:$8 sps:$4 sm:$0xff]  }
 0x8c0   : > { %2278 = vadd.xlane.f32.xlu1 %v2277_v61  ;;  %2281 = vadd.xlane.f32.xlu0 %v2280_v52 }
 0x8c1   : > { %v2269_v62 = vmul.f32 %v6352_v60, %v6352_v60  ;;  %2445 = vmatpush1.bf16.msra.mxu1 %v4763_v22 }
 0x8c2   : > { %2446 = vmatprep.subr.bf16.mxu1 %v4768_v23 }
 0x8c3   : > { %v2283_v63 = vsel %vm1349_vm1, %v2269_v62, 0.0 }
 0x8c4   : > { %2284 = vadd.xlane.f32.xlu1 %v2283_v63  ;;  %v2239_v0 = vpop.xlane.xlu0 %2238 }
 0x8c5   : > { %v2254_v49 = vmul.f32 0.015625, %v2239_v0  ;;  %2447 = vmatpush1.bf16.msra.mxu1 %v4766_v24 }
 0x8c6   : > { %2448 = vmatprep.subr.bf16.mxu1 %v4771_v25 }
 0x8c7   : > { %v6359_v57 = vsub.f32 %v2209_v29, %v2254_v49  ;;  %v4074_v49 = vld [vmem:[#allocation19] ss:$0 sm:$0xff] }
 0x8c8   : > { %v2242_v1 = vpop.xlane.xlu1 %2241  ;;  %v2245_v2 = vpop.xlane.xlu0 %2244 }
 0x8c9   : > { %v2255_v45 = vmul.f32 0.015625, %v2242_v1  ;;  %v2256_v4 = vmul.f32 0.015625, %v2245_v2  ;;  %v2270_v5 = vmul.f32 %v6359_v57, %v6359_v57  ;;  %2449 = vmatpush1.bf16.msra.mxu1 %v4769_v26 }
 0x8cb   : > { %v6363_v6 = vsub.f32 %v2212_v36, %v2255_v45  ;;  %v6365_v7 = vsub.f32 %v2217_v31, %v2256_v4  ;;  %v2286_v8 = vsel %vm1349_vm1, %v2270_v5, 0.0 }
 0x8cc   : > { %v2248_v10 = vpop.xlane.xlu1 %2247  ;;  %2287 = vadd.xlane.f32.xlu0 %v2286_v8 }
 0x8cd   : > { %v2257_v11 = vmul.f32 0.015625, %v2248_v10  ;;  %v2271_v12 = vmul.f32 %v6363_v6, %v6363_v6  ;;  %v2272_v14 = vmul.f32 %v6365_v7, %v6365_v7 }
 0x8cf   : > { %v6372_v15 = vsub.f32 %v2220_v37, %v2257_v11  ;;  %v2289_v16 = vsel %vm1349_vm1, %v2271_v12, 0.0  ;;  %v2292_v17 = vsel %vm1349_vm1, %v2272_v14, 0.0 }
 0x8d0   : > { %2290 = vadd.xlane.f32.xlu1 %v2289_v16  ;;  %2293 = vadd.xlane.f32.xlu0 %v2292_v17 }
 0x8d1   : > { %v2273_v13 = vmul.f32 %v6372_v15, %v6372_v15 }
 0x8d3   : > { %v2295_v18 = vsel %vm1349_vm1, %v2273_v13, 0.0 }
 0x8d4   : > { %2296 = vadd.xlane.f32.xlu1 %v2295_v18 }
 0x945   : > { %v2276_v28 = vpop.xlane.xlu0 %2275 }
 0x946   : > { %v2298_v29 = vmul.f32 0.015625, %v2276_v28 }
 0x948   : > { %v2306_v30 = vadd.f32 1e-05, %v2298_v29 }
 0x949   : > { %v2279_v31 = vpop.xlane.xlu1 %2278  ;;  %v2282_v32 = vpop.xlane.xlu0 %2281 }
 0x94a   : > { %4812 = vrsqrt.f32 %v2306_v30  ;;  %v2299_v35 = vmul.f32 0.015625, %v2279_v31  ;;  %v2300_v36 = vmul.f32 0.015625, %v2282_v32  ;;  %v4773_v32 = vld [vmem:[%s6750_s19 + $0x10] sm:$0xff]  }
 0x94b   : > { %4315 = vmatprep.subr.bf16.mxu0 %v4773_v32 }
 0x94c   : > { %v2307_v37 = vadd.f32 1e-05, %v2299_v35  ;;  %v2308_v38 = vadd.f32 1e-05, %v2300_v36  ;;  %4316 = vmatpush3.bf16.msra.mxu0 %v4773_v32 }
 0x94d   : > { %v2285_v40 = vpop.xlane.xlu1 %2284 }
 0x94e   : > { %4814 = vrsqrt.f32 %v2307_v37  ;;  %v2301_v3 = vmul.f32 0.015625, %v2285_v40 }
 0x94f   : > { %4816 = vrsqrt.f32 %v2308_v38 }
 0x950   : > { %v2309_v41 = vadd.f32 1e-05, %v2301_v3 }
 0x952   : > { %4818 = vrsqrt.f32 %v2309_v41 }
 0x955   : > { %v2288_v42 = vpop.xlane.xlu0 %2287 }
 0x956   : > { %v2302_v44 = vmul.f32 0.015625, %v2288_v42 }
 0x957   : > { %v4813_v46 = vpop.eup %4812 }
 0x958   : > { %v2322_v51 = vmul.f32 %v4813_v46, %v6339_v43  ;;  %v2310_v48 = vadd.f32 1e-05, %v2302_v44 }
 0x959   : > { %v2291_v54 = vpop.xlane.xlu1 %2290  ;;  %v2294_v55 = vpop.xlane.xlu0 %2293 }
 0x95a   : > { %4820 = vrsqrt.f32 %v2310_v48  ;;  %v2303_v56 = vmul.f32 0.015625, %v2291_v54  ;;  %v2304_v58 = vmul.f32 0.015625, %v2294_v55  ;;  %v2336_v61 = vmul.f32 %v4073_v47, %v2322_v51 }
 0x95b   : > { %v4815_v59 = vpop.eup %4814 }
 0x95c   : > { %v4817_v52 = vpop.eup %4816  ;;  %v2323_v62 = vmul.f32 %v4815_v59, %v6343_v50  ;;  %v2311_v63 = vadd.f32 1e-05, %v2303_v56  ;;  %v2312_v0 = vadd.f32 1e-05, %v2304_v58  ;;  %v2350_v43 = vadd.f32 %v4074_v49, %v2336_v61 }
 0x95d   : > { %v2297_v1 = vpop.xlane.xlu1 %2296  ;;  %v2324_v5 = vmul.f32 %v4817_v52, %v6345_v53 }
 0x95e   : > { %v2337_v2 = vmul.f32 %v4073_v47, %v2323_v62  ;;  %4822 = vrsqrt.f32 %v2311_v63  ;;  %v2305_v45 = vmul.f32 0.015625, %v2297_v1 }
 0x95f   : > { %v4819_v4 = vpop.eup %4818  ;;  %4824 = vrsqrt.f32 %v2312_v0  ;;  %v2338_v50 = vmul.f32 %v4073_v47, %v2324_v5 }
 0x960   : > { %v2313_v8 = vadd.f32 1e-05, %v2305_v45  ;;  %v2351_v10 = vadd.f32 %v4074_v49, %v2337_v2  ;;  %v2325_v11 = vmul.f32 %v4819_v4, %v6352_v60 }
 0x961   : > { %v2352_v13 = vadd.f32 %v4074_v49, %v2338_v50 }
 0x962   : > { %4826 = vrsqrt.f32 %v2313_v8  ;;  %v2367_v12 = vpack.c.bf16 %v2351_v10, %v2350_v43  ;;  %v2339_v14 = vmul.f32 %v4073_v47, %v2325_v11 }
 0x964   : > { %4083 = vmatmul.mubr.msk.bf16.vlgmr.msra.gmra.mxu1 %vm1349_vm1, %v2367_v12  ;;  %v2353_v16 = vadd.f32 %v4074_v49, %v2339_v14 }
 0x965   : > { %2476 = vmatprep.mubr.bf16.mxu1 %v5562_v19 }
 0x966   : > { %v2368_v20 = vpack.c.bf16 %v2353_v16, %v2352_v13 }
 0x967   : > { %v4821_v17 = vpop.eup %4820 }
 0x968   : > { %v2326_v18 = vmul.f32 %v4821_v17, %v6359_v57 }
 0x96a   : > { %v2340_v60 = vmul.f32 %v4073_v47, %v2326_v18 }
 0x96b   : > { %v4823_v53 = vpop.eup %4822 }
 0x96c   : > { %4084 = vmatmul.mubr.msk.bf16.gmra.mxu1 %vm1349_vm1, %v2368_v20  ;;  %v2327_v9 = vmul.f32 %v4823_v53, %v6363_v6  ;;  %v4825_v21 = vpop.eup %4824  ;;  %v2354_v24 = vadd.f32 %v4074_v49, %v2340_v60 }
 0x96d   : > { %2486 = vmatprep.mubr.bf16.mxu1 %v5562_v19  ;;  %v2328_v26 = vmul.f32 %v4825_v21, %v6365_v7  ;;  %v4774_v7 = vld [vmem:[%s6750_s19 + $0x8] sm:$0xff]  }
 0x96e   : > { %v2341_v22 = vmul.f32 %v4073_v47, %v2327_v9  ;;  %4317 = vmatprep.subr.bf16.mxu0 %v4774_v7 }
 0x96f   : > { %v4827_v23 = vpop.eup %4826  ;;  %v2342_v29 = vmul.f32 %v4073_v47, %v2328_v26  ;;  %4318 = vmatpush3.bf16.msra.mxu0 %v4774_v7 }
 0x970   : > { %v2355_v25 = vadd.f32 %v4074_v49, %v2341_v22  ;;  %v2329_v27 = vmul.f32 %v4827_v23, %v6372_v15  ;;  %v2366_v15 = vld [vmem:[#allocation22] sm:$0x3] }
 0x971   : > { %v2356_v30 = vadd.f32 %v4074_v49, %v2342_v29  ;;  %v2375_v35 = vrot.slane %v2366_v15, %v1423_v34  ;;  %v2379_v17 = vrot.slane %v2366_v15, %v1427_v39 }
 0x972   : > { %v2369_v28 = vpack.c.bf16 %v2355_v25, %v2354_v24  ;;  %v2343_v57 = vmul.f32 %v4073_v47, %v2329_v27 }
 0x974   : > { %4085 = vmatmul.mubr.msk.bf16.gmra.mxu1 %vm1349_vm1, %v2369_v28  ;;  %v2357_v6 = vadd.f32 %v4074_v49, %v2343_v57 }
 0x975   : > { %2496 = vmatprep.mubr.bf16.mxu1 %v5562_v19  ;;  %v4775_v19 = vld [vmem:[%s6750_s19] sm:$0xff]  }
 0x976   : > { %v2370_v31 = vpack.c.bf16 %v2357_v6, %v2356_v30  ;;  %4319 = vmatprep.subr.bf16.mxu0 %v4775_v19 }
 0x977   : > { %4320 = vmatpush3.bf16.msra.mxu0 %v4775_v19 }
 0x97c   : > { %4086 = vmatmul.mubr.msk.bf16.gmra.mxu1 %vm1349_vm1, %v2370_v31 }
 0xa24   : > { %v2468_v36 = vpop.f32.mrf.mxu1 }
 0xa25   : > { %v6411_v37 = vadd.f32 %v2468_v36, %v2375_v35 }
 0xa26   : > { %v6413_v38 = vpop.f32.mrf.mxu1 }
 0xa27   : > { %v2539_v40 = vmul.f32 %v6411_v37, %v6411_v37  ;;  %v6463_v29 = vadd.f32 %v6413_v38, %v2379_v17 }
 0xa28   : > { %v2472_v3 = vpop.f32.mrf.mxu1 }
 0xa29   : > { %v6417_v41 = vadd.f32 %v2472_v3, %v2375_v35  ;;  %v2555_v42 = vsel %vm1349_vm1, %v2539_v40, 0.0 }
 0xa2a   : > { %v2474_v44 = vpop.f32.mrf.mxu1  ;;  %2556 = vadd.xlane.f32.xlu0 %v2555_v42 }
 0xa2b   : > { %v2627_v46 = vpack.c.bf16 %v6417_v41, %v6411_v37  ;;  %v2540_v34 = vmul.f32 %v6417_v41, %v6417_v41  ;;  %v6458_v28 = vadd.f32 %v2474_v44, %v2379_v17 }
 0xa2c   : > { %v2478_v47 = vpop.f32.mrf.mxu1 }
 0xa2d   : > { %v6424_v51 = vadd.f32 %v2478_v47, %v2375_v35  ;;  %4321 = vmatprep.mubr.msk.bf16.mxu0 %vm1349_vm1, %v2627_v46  ;;  %v2558_v48 = vsel %vm1349_vm1, %v2540_v34, 0.0  ;;  %v2902_v6 = vpack.c.bf16 %v6458_v28, %v6463_v29 }
 0xa2e   : > { %2559 = vadd.xlane.f32.xlu1 %v2558_v48  ;;  %v2480_v54 = vpop.f32.mrf.mxu1 }
 0xa2f   : > { %v2541_v55 = vmul.f32 %v6424_v51, %v6424_v51  ;;  %v6456_v27 = vadd.f32 %v2480_v54, %v2379_v17 }
 0xa30   : > { %v2482_v56 = vpop.f32.mrf.mxu1 }
 0xa31   : > { %v2483_v58 = vadd.f32 %v2482_v56, %v2375_v35  ;;  %v2561_v59 = vsel %vm1349_vm1, %v2541_v55, 0.0 }
 0xa32   : > { %v2484_v61 = vpop.f32.mrf.mxu1  ;;  %2562 = vadd.xlane.f32.xlu0 %v2561_v59 }
 0xa33   : > { %v2628_v52 = vpack.c.bf16 %v2483_v58, %v6424_v51  ;;  %v2542_v62 = vmul.f32 %v2483_v58, %v2483_v58  ;;  %v6452_v25 = vadd.f32 %v2484_v61, %v2379_v17 }
 0xa34   : > { %v2488_v63 = vpop.f32.mrf.mxu1 }
 0xa35   : > { %v2489_v0 = vadd.f32 %v2488_v63, %v2375_v35  ;;  %4322 = vmatmul.mubr.msk.bf16.vlgmr.msra.gmra.mxu0 %vm1349_vm1, %v2628_v52  ;;  %v2564_v49 = vsel %vm1349_vm1, %v2542_v62, 0.0  ;;  %v2903_v57 = vpack.c.bf16 %v6452_v25, %v6456_v27 }
 0xa36   : > { %2565 = vadd.xlane.f32.xlu1 %v2564_v49  ;;  %v2490_v1 = vpop.f32.mrf.mxu1 }
 0xa37   : > { %v2543_v2 = vmul.f32 %v2489_v0, %v2489_v0  ;;  %v6446_v24 = vadd.f32 %v2490_v1, %v2379_v17 }
 0xa38   : > { %v2492_v45 = vpop.f32.mrf.mxu1 }
 0xa39   : > { %v2493_v4 = vadd.f32 %v2492_v45, %v2375_v35  ;;  %v2567_v43 = vsel %vm1349_vm1, %v2543_v2, 0.0 }
 0xa3a   : > { %v2494_v5 = vpop.f32.mrf.mxu1  ;;  %2568 = vadd.xlane.f32.xlu0 %v2567_v43 }
 0xa3b   : > { %v2629_v8 = vpack.c.bf16 %v2493_v4, %v2489_v0  ;;  %v2544_v10 = vmul.f32 %v2493_v4, %v2493_v4  ;;  %v6440_v53 = vadd.f32 %v2494_v5, %v2379_v17 }
 0xa3c   : > { %v2498_v11 = vpop.f32.mrf.mxu1 }
 0xa3d   : > { %v2499_v12 = vadd.f32 %v2498_v11, %v2375_v35  ;;  %4325 = vmatprep.mubr.msk.bf16.mxu0 %vm1349_vm1, %v2629_v8  ;;  %v2570_v14 = vsel %vm1349_vm1, %v2544_v10, 0.0  ;;  %v2904_v26 = vpack.c.bf16 %v6440_v53, %v6446_v24 }
 0xa3e   : > { %2571 = vadd.xlane.f32.xlu1 %v2570_v14  ;;  %v2500_v50 = vpop.f32.mrf.mxu1 }
 0xa3f   : > { %v2545_v16 = vmul.f32 %v2499_v12, %v2499_v12  ;;  %v6442_v60 = vadd.f32 %v2500_v50, %v2379_v17 }
 0xa40   : > { %v2502_v13 = vpop.f32.mrf.mxu1 }
 0xa41   : > { %v2503_v18 = vadd.f32 %v2502_v13, %v2375_v35  ;;  %v2573_v20 = vsel %vm1349_vm1, %v2545_v16, 0.0 }
 0xa42   : > { %v2504_v9 = vpop.f32.mrf.mxu1  ;;  %2574 = vadd.xlane.f32.xlu0 %v2573_v20 }
 0xa43   : > { %v2630_v21 = vpack.c.bf16 %v2503_v18, %v2499_v12  ;;  %v6444_v22 = vadd.f32 %v2504_v9, %v2379_v17  ;;  %v2546_v23 = vmul.f32 %v2503_v18, %v2503_v18 }
 0xa45   : > { %v2905_v33 = vpack.c.bf16 %v6444_v22, %v6442_v60  ;;  %4326 = vmatmul.mubr.msk.bf16.gmra.mxu0 %vm1349_vm1, %v2630_v21  ;;  %v2576_v39 = vsel %vm1349_vm1, %v2546_v23, 0.0 }
 0xa46   : > { %2577 = vadd.xlane.f32.xlu1 %v2576_v39 }
 0xa47   : > { %4337 = vmatprep.subr.bf16.mxu0 %v2905_v33 }
 0xa48   : > { %4338 = vmatpush3.bf16.msra.mxu0 %v2905_v33 }
 0xa49   : > { %4339 = vmatprep.subr.bf16.mxu0 %v2904_v26 }
 0xa4c   : > { %4340 = vmatpush3.bf16.msra.mxu0 %v2904_v26 }
 0xa4d   : > { %4341 = vmatprep.subr.bf16.mxu0 %v2903_v57 }
 0xa50   : > { %4342 = vmatpush3.bf16.msra.mxu0 %v2903_v57 }
 0xa51   : > { %4343 = vmatprep.subr.bf16.mxu0 %v2902_v6 }
 0xa54   : > { %4344 = vmatpush3.bf16.msra.mxu0 %v2902_v6 }
 0xa57   : > { %2517 = vrot.lane.b32.xlu1 %v6417_v41, %s5563_s13 }
 0xa58   : > { %2515 = vrot.lane.b32.xlu0 %v6411_v37, %s5563_s13 }
 0xa5b   : > { %2519 = vrot.lane.b32.xlu1 %v6424_v51, %s5563_s13 }
 0xa5c   : > { %2523 = vrot.lane.b32.xlu0 %v2489_v0, %s5563_s13 }
 0xa5f   : > { %2521 = vrot.lane.b32.xlu1 %v2483_v58, %s5563_s13 }
 0xa60   : > { %2527 = vrot.lane.b32.xlu0 %v2499_v12, %s5563_s13 }
 0xa63   : > { %2525 = vrot.lane.b32.xlu1 %v2493_v4, %s5563_s13 }
 0xa67   : > { %2529 = vrot.lane.b32.xlu1 %v2503_v18, %s5563_s13  ;;  %s5430_s13 = scalar_lea.vmem %s6685_s22, 1024 }
 0xa68   : > { %p5431_p11 = scmp.ne.s32.totalorder %s6685_s22, %s5430_s13 }
 0xa6a   : > { %p5432_p13 = pnand %p5431_p11, %p6857_p0 }
 0xa6c   : > { %p5433_p8 = pneg %p5432_p13 }
 0xab3   : > { %v2557_v30 = vpop.xlane.xlu0 %2556 }
 0xab4   : > { %v2603_v4 = vmul.f32 0.5, %v2557_v30 }
 0xab7   : > { %v2560_v31 = vpop.xlane.xlu1 %2559 }
 0xab8   : > { %v2604_v12 = vmul.f32 0.5, %v2560_v31 }
 0xabb   : > { %v2563_v32 = vpop.xlane.xlu0 %2562 }
 0xabc   : > { %v2605_v2 = vmul.f32 0.5, %v2563_v32 }
 0xabf   : > { %v2566_v7 = vpop.xlane.xlu1 %2565 }
 0xac0   : > { %v2606_v8 = vmul.f32 0.5, %v2566_v7 }
 0xac3   : > { %v2569_v19 = vpop.xlane.xlu0 %2568 }
 0xac4   : > { %v2607_v23 = vmul.f32 0.5, %v2569_v19 }
 0xac7   : > { %v6478_v15 = vpop.xlane.xlu1 %2571 }
 0xac8   : > { %v2608_v31 = vmul.f32 0.5, %v6478_v15 }
 0xacb   : > { %v2575_v35 = vpop.xlane.xlu0 %2574 }
 0xacc   : > { %v2609_v9 = vmul.f32 0.5, %v2575_v35 }
 0xacf   : > { %v2578_v36 = vpop.xlane.xlu1 %2577  ;;  %v2516_v37 = vpop.permute.xlu0 %2515 }
 0xad0   : > { %v2547_v38 = vmul.f32 %v2516_v37, %v2516_v37  ;;  %v2610_v26 = vmul.f32 0.5, %v2578_v36 }
 0xad2   : > { %v2579_v40 = vsel %vm1349_vm1, %v2547_v38, 0.0 }
 0xad3   : > { %v2518_v3 = vpop.permute.xlu1 %2517  ;;  %2580 = vadd.xlane.f32.xlu1 %v2579_v40  ;;  %v2524_v34 = vpop.permute.xlu0 %2523 }
 0xad4   : > { %v2548_v41 = vmul.f32 %v2518_v3, %v2518_v3  ;;  %v2631_v42 = vpack.c.bf16 %v2518_v3, %v2516_v37  ;;  %v2551_v54 = vmul.f32 %v2524_v34, %v2524_v34 }
 0xad6   : > { %4329 = vmatprep.mubr.msk.bf16.mxu0 %vm1349_vm1, %v2631_v42  ;;  %v2582_v44 = vsel %vm1349_vm1, %v2548_v41, 0.0  ;;  %v2591_v61 = vsel %vm1349_vm1, %v2551_v54, 0.0 }
 0xad7   : > { %v6483_v46 = vpop.permute.xlu1 %2519  ;;  %2583 = vadd.xlane.f32.xlu1 %v2582_v44  ;;  %v6490_v52 = vpop.permute.xlu0 %2527 }
 0xadb   : > { %v2522_v47 = vpop.permute.xlu1 %2521 }
 0xadc   : > { %v2550_v51 = vmul.f32 %v2522_v47, %v2522_v47  ;;  %v2632_v48 = vpack.c.bf16 %v2522_v47, %v6483_v46 }
 0xade   : > { %4330 = vmatmul.mubr.msk.bf16.gmra.mxu0 %vm1349_vm1, %v2632_v48  ;;  %v2588_v55 = vsel %vm1349_vm1, %v2550_v51, 0.0 }
 0xadf   : > { %v2526_v56 = vpop.permute.xlu1 %2525  ;;  %2589 = vadd.xlane.f32.xlu1 %v2588_v55 }
 0xae0   : > { %v2633_v58 = vpack.c.bf16 %v2526_v56, %v2524_v34  ;;  %v2552_v59 = vmul.f32 %v2526_v56, %v2526_v56 }
 0xae2   : > { %4333 = vmatprep.mubr.msk.bf16.mxu0 %vm1349_vm1, %v2633_v58  ;;  %v2594_v49 = vsel %vm1349_vm1, %v2552_v59, 0.0 }
 0xae3   : > { %v2530_v62 = vpop.permute.xlu1 %2529  ;;  %2592 = vadd.xlane.f32.xlu1 %v2591_v61 }
 0xae4   : > { %v2634_v63 = vpack.c.bf16 %v2530_v62, %v6490_v52  ;;  %v2554_v0 = vmul.f32 %v2530_v62, %v2530_v62 }
 0xae6   : > { %4334 = vmatmul.mubr.msk.bf16.gmra.mxu0 %vm1349_vm1, %v2634_v63  ;;  %v2600_v1 = vsel %vm1349_vm1, %v2554_v0, 0.0 }
 0xae7   : > { %2595 = vadd.xlane.f32.xlu1 %v2594_v49 }
 0xaeb   : > { %2601 = vadd.xlane.f32.xlu1 %v2600_v1 }
 0xaf5   : > { %v4323_v45 = vpop.f32.mrf.mxu0 }
 0xaf6   : > { %v2782_v43 = vsub.f32 %v4323_v45, %v2605_v2 }
 0xaf7   : > { %v2717_v5 = vpop.f32.mrf.mxu0 }
 0xaf8   : > { %v2780_v10 = vsub.f32 %v2717_v5, %v2603_v4  ;;  %v2800_v14 = vmul.f32 1.442695, %v2782_v43 }
 0xaf9   : > { %v4324_v11 = vpop.f32.mrf.mxu0 }
 0xafa   : > { %v2796_v50 = vmul.f32 1.442695, %v2780_v10  ;;  %v2783_v16 = vsub.f32 %v4324_v11, %v2606_v8 }
 0xafb   : > { %v2720_v17 = vpop.f32.mrf.mxu0 }
 0xafc   : > { %4828 = vpow2.f32 %v2796_v50  ;;  %v2802_v13 = vmul.f32 1.442695, %v2783_v16  ;;  %v2781_v18 = vsub.f32 %v2720_v17, %v2604_v12 }
 0xafd   : > { %4830 = vpow2.f32 %v2800_v14 }
 0xafe   : > { %v2798_v20 = vmul.f32 1.442695, %v2781_v18  ;;  %4832 = vpow2.f32 %v2802_v13  ;;  %v2549_v13 = vmul.f32 %v6483_v46, %v6483_v46  ;;  %v2553_v18 = vmul.f32 %v6490_v52, %v6490_v52 }
 0xb00   : > { %4834 = vpow2.f32 %v2798_v20  ;;  %v2585_v20 = vsel %vm1349_vm1, %v2549_v13, 0.0 }
 0xb05   : > { %v4327_v21 = vpop.f32.mrf.mxu0 }
 0xb06   : > { %v2786_v33 = vsub.f32 %v4327_v21, %v2609_v9  ;;  %v2597_v9 = vsel %vm1349_vm1, %v2553_v18, 0.0 }
 0xb07   : > { %v2733_v39 = vpop.f32.mrf.mxu0 }
 0xb08   : > { %v2784_v57 = vsub.f32 %v2733_v39, %v2607_v23  ;;  %v2808_v32 = vmul.f32 1.442695, %v2786_v33 }
 0xb09   : > { %v4829_v6 = vpop.eup %4828  ;;  %v4328_v30 = vpop.f32.mrf.mxu0 }
 0xb0a   : > { %v2804_v7 = vmul.f32 1.442695, %v2784_v57  ;;  %v2787_v37 = vsub.f32 %v4328_v30, %v2610_v26  ;;  %v4831_v38 = vpop.eup %4830  ;;  %v2828_v35 = vmul.f32 0.17677669, %v4829_v6 }
 0xb0b   : > { %v2736_v40 = vpop.f32.mrf.mxu0  ;;  %v4833_v3 = vpop.eup %4832  ;;  %v2830_v19 = vmul.f32 0.17677669, %v4831_v38 }
 0xb0c   : > { %4836 = vpow2.f32 %v2804_v7  ;;  %v2810_v41 = vmul.f32 1.442695, %v2787_v37  ;;  %v2785_v42 = vsub.f32 %v2736_v40, %v2608_v31  ;;  %v2831_v47 = vmul.f32 0.17677669, %v4833_v3 }
 0xb0d   : > { %v4835_v44 = vpop.eup %4834  ;;  %4838 = vpow2.f32 %v2808_v32  ;;  %v2845_v15 = vsel %vm2844_vm3, %v2828_v35, 0.0  ;;  %v2848_v55 = vsel %vm2844_vm3, %v2830_v19, 0.0 }
 0xb0e   : > { %v2806_v34 = vmul.f32 1.442695, %v2785_v42  ;;  %v2829_v36 = vmul.f32 0.17677669, %v4835_v44  ;;  %4840 = vpow2.f32 %v2810_v41  ;;  %v2850_v58 = vsel %vm2844_vm3, %v2831_v47, 0.0 }
 0xb0f   : > { %v2899_v59 = vpack.c.bf16 %v2831_v47, %v2830_v19 }
 0xb10   : > { %4842 = vpow2.f32 %v2806_v34  ;;  %v2898_v51 = vpack.c.bf16 %v2829_v36, %v2828_v35  ;;  %v2846_v48 = vsel %vm2844_vm3, %v2829_v36, 0.0 }
 0xb11   : > { %v2847_v54 = vadd.f32 %v2846_v48, %v2845_v15 }
 0xb12   : > { %2906 = vxpose.xlu0.c.b16.start [1/4] (short) (narrow) %v2898_v51, 32 }
 0xb13   : > { %v2849_v56 = vadd.f32 %v2848_v55, %v2847_v54 }
 0xb15   : > { %v2851_v61 = vadd.f32 %v2850_v58, %v2849_v56 }
 0xb16   : > { %2907 = vxpose.xlu0.c.b16.cont [2/4] (short) (narrow) %v2899_v59, 32 }
 0xb19   : > { %v4837_v62 = vpop.eup %4836 }
 0xb1a   : > { %v2832_v63 = vmul.f32 0.17677669, %v4837_v62  ;;  %v4839_v0 = vpop.eup %4838 }
 0xb1b   : > { %v4841_v49 = vpop.eup %4840  ;;  %v2834_v4 = vmul.f32 0.17677669, %v4839_v0 }
 0xb1c   : > { %v2852_v1 = vsel %vm2844_vm3, %v2832_v63, 0.0  ;;  %v2835_v5 = vmul.f32 0.17677669, %v4841_v49 }
 0xb1d   : > { %v4843_v2 = vpop.eup %4842  ;;  %v2853_v45 = vadd.f32 %v2852_v1, %v2851_v61  ;;  %v2856_v12 = vsel %vm2844_vm3, %v2834_v4, 0.0 }
 0xb1e   : > { %v2833_v43 = vmul.f32 0.17677669, %v4843_v2  ;;  %v2858_v50 = vsel %vm2844_vm3, %v2835_v5, 0.0  ;;  %v2901_v16 = vpack.c.bf16 %v2835_v5, %v2834_v4 }
 0xb20   : > { %v2854_v8 = vsel %vm2844_vm3, %v2833_v43, 0.0  ;;  %v2900_v10 = vpack.c.bf16 %v2833_v43, %v2832_v63 }
 0xb21   : > { %v2855_v11 = vadd.f32 %v2854_v8, %v2853_v45 }
 0xb22   : > { %2908 = vxpose.xlu0.c.b16.cont [3/4] (short) (narrow) %v2900_v10, 32 }
 0xb23   : > { %v2857_v14 = vadd.f32 %v2856_v12, %v2855_v11 }
 0xb25   : > { %v2859_v17 = vadd.f32 %v2858_v50, %v2857_v14 }
 0xb26   : > { %2909 = vxpose.xlu0.c.b16.end [4/4] (short) (narrow) %v2901_v16, 32 }
 0xb27   : > { %v2860_v6 = vrot.slane %v2859_v17, 4 }
 0xb29   : > { %v2861_v38 = vadd.f32 %v2860_v6, %v2859_v17 }
 0xb2b   : > { %v2862_v36 = vrot.slane %v2861_v38, 2 }
 0xb2d   : > { %v2863_v56 = vadd.f32 %v2862_v36, %v2861_v38 }
 0xb2f   : > { %v2864_v49 = vrot.slane %v2863_v56, 1 }
 0xb31   : > { %v2865_v45 = vadd.f32 %v2864_v49, %v2863_v56  ;;  %v4778_v56 = vld [vmem:[#allocation23 + $0x8] sm:$0xff]   ;;  %v4779_v49 = vld [vmem:[#allocation23] sm:$0xff]  }
 0xb33   : > { %2586 = vadd.xlane.f32.xlu0 %v2585_v20 }
 0xb37   : > { %2598 = vadd.xlane.f32.xlu0 %v2597_v9 }
 0xb5c   : > { %v2581_v33 = vpop.xlane.xlu1 %2580 }
 0xb5d   : > { %v2611_v52 = vmul.f32 0.5, %v2581_v33 }
 0xb60   : > { %v2584_v39 = vpop.xlane.xlu1 %2583 }
 0xb61   : > { %v2612_v40 = vmul.f32 0.5, %v2584_v39 }
 0xb68   : > { %v2590_v26 = vpop.xlane.xlu1 %2589 }
 0xb69   : > { %v2614_v32 = vmul.f32 0.5, %v2590_v26 }
 0xb6c   : > { %v2593_v57 = vpop.xlane.xlu1 %2592 }
 0xb6d   : > { %v2615_v47 = vmul.f32 0.5, %v2593_v57 }
 0xb70   : > { %v2596_v30 = vpop.xlane.xlu1 %2595 }
 0xb71   : > { %v2616_v58 = vmul.f32 0.5, %v2596_v30 }
 0xb74   : > { %v2602_v19 = vpop.xlane.xlu1 %2601 }
 0xb75   : > { %v2618_v48 = vmul.f32 0.5, %v2602_v19 }
 0xb7c   : > { %v2914_v21 = vpop.trf.xlu0 }
 0xb7d   : > { %4345 = vmatprep.mubr.msk.bf16.mxu0 %vm1349_vm1, %v2914_v21 }
 0xb80   : > { %v2915_v23 = vpop.trf.xlu0 }
 0xb81   : > { %4346 = vmatmul.mubr.msk.bf16.vlgmr.msra.gmra.mxu0 %vm1349_vm1, %v2915_v23 }
 0xb9e   : > { %v6513_v46 = vpop.f32.mrf.mxu0 }
 0xba0   : > { %v2749_v31 = vpop.f32.mrf.mxu0 }
 0xba1   : > { %v2788_v7 = vsub.f32 %v2749_v31, %v2611_v52 }
 0xba2   : > { %v4332_v37 = vpop.f32.mrf.mxu0 }
 0xba3   : > { %v2812_v3 = vmul.f32 1.442695, %v2788_v7  ;;  %v2791_v41 = vsub.f32 %v4332_v37, %v2614_v32 }
 0xba4   : > { %v2752_v42 = vpop.f32.mrf.mxu0 }
 0xba5   : > { %4844 = vpow2.f32 %v2812_v3  ;;  %v2818_v35 = vmul.f32 1.442695, %v2791_v41  ;;  %v2789_v44 = vsub.f32 %v2752_v42, %v2612_v40 }
 0xba6   : > { %v4335_v34 = vpop.f32.mrf.mxu0 }
 0xba7   : > { %4846 = vpow2.f32 %v2818_v35  ;;  %v2814_v15 = vmul.f32 1.442695, %v2789_v44 }
 0xba8   : > { %v2765_v51 = vpop.f32.mrf.mxu0 }
 0xba9   : > { %4848 = vpow2.f32 %v2814_v15  ;;  %v2792_v54 = vsub.f32 %v2765_v51, %v2615_v47 }
 0xbaa   : > { %v4336_v55 = vpop.f32.mrf.mxu0 }
 0xbab   : > { %v2795_v59 = vsub.f32 %v4336_v55, %v2618_v48  ;;  %v2820_v61 = vmul.f32 1.442695, %v2792_v54  ;;  %v4776_v54 = vld [vmem:[#allocation23 + $0x18] sm:$0xff]   ;;  %v4777_v55 = vld [vmem:[#allocation23 + $0x10] sm:$0xff]  }
 0xbac   : > { %v2768_v62 = vpop.f32.mrf.mxu0  ;;  %4361 = vmatprep.subr.bf16.mxu1 %v4776_v54 }
 0xbad   : > { %v2826_v63 = vmul.f32 1.442695, %v2795_v59  ;;  %v2793_v0 = vsub.f32 %v2768_v62, %v2616_v58  ;;  %4362 = vmatpush3.bf16.msra.mxu1 %v4776_v54 }
 0xbae   : > { %4363 = vmatprep.subr.bf16.mxu1 %v4777_v55 }
 0xbaf   : > { %4850 = vpow2.f32 %v2826_v63  ;;  %v2822_v1 = vmul.f32 1.442695, %v2793_v0 }
 0xbb0   : > { %4852 = vpow2.f32 %v2820_v61 }
 0xbb1   : > { %4854 = vpow2.f32 %v2822_v1  ;;  %4364 = vmatpush3.bf16.msra.mxu1 %v4777_v55 }
 0xbb2   : > { %v4845_v2 = vpop.eup %4844  ;;  %4365 = vmatprep.subr.bf16.mxu1 %v4778_v56 }
 0xbb3   : > { %v2836_v4 = vmul.f32 0.17677669, %v4845_v2 }
 0xbb4   : > { %v4847_v43 = vpop.eup %4846 }
 0xbb5   : > { %v2866_v5 = vmul.f32 %v2865_v45, %v2836_v4  ;;  %v6516_v12 = vmul.f32 0.17677669, %v4847_v43  ;;  %4366 = vmatpush3.bf16.msra.mxu1 %v4778_v56 }
 0xbb6   : > { %v4849_v8 = vpop.eup %4848  ;;  %4367 = vmatprep.subr.bf16.mxu1 %v4779_v49 }
 0xbb7   : > { %v2837_v10 = vmul.f32 0.17677669, %v4849_v8  ;;  %v2874_v11 = vsel %vm2844_vm3, %v2866_v5, 0.0  ;;  %v2869_v17 = vmul.f32 %v2865_v45, %v6516_v12 }
 0xbb8   : > { %2875 = vadd.xlane.f32.xlu0 %v2874_v11 }
 0xbb9   : > { %v2979_v14 = vpack.c.bf16 %v2837_v10, %v2836_v4  ;;  %v2867_v50 = vmul.f32 %v2865_v45, %v2837_v10  ;;  %v2883_v33 = vsel %vm2844_vm3, %v2869_v17, 0.0  ;;  %4368 = vmatpush3.bf16.msra.mxu1 %v4779_v49 }
 0xbbb   : > { %4353 = vmatprep.mubr.msk.bf16.mxu0 %vm2844_vm3, %v2979_v14  ;;  %v2877_v16 = vsel %vm2844_vm3, %v2867_v50, 0.0 }
 0xbbc   : > { %v4851_v13 = vpop.eup %4850  ;;  %v2587_v18 = vpop.xlane.xlu0 %2586  ;;  %2878 = vadd.xlane.f32.xlu1 %v2877_v16 }
 0xbbd   : > { %v4853_v20 = vpop.eup %4852  ;;  %v2613_v9 = vmul.f32 0.5, %v2587_v18  ;;  %v2843_v26 = vmul.f32 0.17677669, %v4851_v13 }
 0xbbe   : > { %v4855_v21 = vpop.eup %4854  ;;  %v2840_v6 = vmul.f32 0.17677669, %v4853_v20 }
 0xbbf   : > { %v2790_v23 = vsub.f32 %v6513_v46, %v2613_v9  ;;  %v2841_v39 = vmul.f32 0.17677669, %v4855_v21  ;;  %v2873_v38 = vmul.f32 %v2865_v45, %v2843_v26 }
 0xbc0   : > { %v2599_v57 = vpop.xlane.xlu0 %2598  ;;  %2884 = vadd.xlane.f32.xlu1 %v2883_v33  ;;  %v2870_v36 = vmul.f32 %v2865_v45, %v2840_v6 }
 0xbc1   : > { %v2816_v52 = vmul.f32 1.442695, %v2790_v23  ;;  %v2617_v30 = vmul.f32 0.5, %v2599_v57  ;;  %v2871_v31 = vmul.f32 %v2865_v45, %v2841_v39  ;;  %v2981_v32 = vpack.c.bf16 %v2841_v39, %v2840_v6 }
 0xbc2   : > { %v2895_v46 = vsel %vm2844_vm3, %v2873_v38, 0.0  ;;  %v2886_v15 = vsel %vm2844_vm3, %v2870_v36, 0.0 }
 0xbc3   : > { %4856 = vpow2.f32 %v2816_v52  ;;  %v2794_v7 = vsub.f32 %v4335_v34, %v2617_v30  ;;  %v2889_v37 = vsel %vm2844_vm3, %v2871_v31, 0.0 }
 0xbc4   : > { %2890 = vadd.xlane.f32.xlu1 %v2889_v37 }
 0xbc5   : > { %v2824_v40 = vmul.f32 1.442695, %v2794_v7 }
 0xbc7   : > { %4858 = vpow2.f32 %v2824_v40 }
 0xbc8   : > { %2896 = vadd.xlane.f32.xlu1 %v2895_v46 }
 0xbd0   : > { %v4857_v3 = vpop.eup %4856 }
 0xbd1   : > { %v2838_v41 = vmul.f32 0.17677669, %v4857_v3 }
 0xbd3   : > { %v2868_v42 = vmul.f32 %v2865_v45, %v2838_v41  ;;  %v2980_v35 = vpack.c.bf16 %v6516_v12, %v2838_v41 }
 0xbd4   : > { %v4859_v44 = vpop.eup %4858 }
 0xbd5   : > { %v2880_v19 = vsel %vm2844_vm3, %v2868_v42, 0.0  ;;  %v2842_v47 = vmul.f32 0.17677669, %v4859_v44 }
 0xbd6   : > { %2881 = vadd.xlane.f32.xlu0 %v2880_v19 }
 0xbd7   : > { %v2982_v34 = vpack.c.bf16 %v2843_v26, %v2842_v47  ;;  %v2872_v51 = vmul.f32 %v2865_v45, %v2842_v47 }
 0xbd9   : > { %v2892_v48 = vsel %vm2844_vm3, %v2872_v51, 0.0 }
 0xbda   : > { %2887 = vadd.xlane.f32.xlu0 %v2886_v15 }
 0xbde   : > { %2893 = vadd.xlane.f32.xlu0 %v2892_v48  ;;  %v4105_v48 = vld [vmem:[#allocation25] ss:$0 sm:$0xff] }
 0xc41   : > { %v4347_v58 = vpop.f32.mrf.mxu0  ;;  %v2876_v2 = vpop.xlane.xlu0 %2875 }
 0xc42   : > { %v3060_v43 = vadd.f32 1e-08, %v2876_v2 }
 0xc43   : > { %v2962_v59 = vpop.f32.mrf.mxu0 }
 0xc44   : > { %4860 = vrcp.f32 %v3060_v43 }
 0xc45   : > { %v4348_v61 = vpop.f32.mrf.mxu0  ;;  %v2879_v1 = vpop.xlane.xlu1 %2878 }
 0xc46   : > { %v2978_v62 = vpack.c.bf16 %v4348_v61, %v4347_v58  ;;  %v3061_v10 = vadd.f32 1e-08, %v2879_v1 }
 0xc47   : > { %v2965_v63 = vpop.f32.mrf.mxu0 }
 0xc48   : > { %v2977_v0 = vpack.c.bf16 %v2965_v63, %v2962_v59  ;;  %4349 = vmatprep.subr.bf16.mxu0 %v2978_v62 }
 0xc49   : > { %4350 = vmatpush3.bf16.msra.mxu0 %v2978_v62  ;;  %v2885_v45 = vpop.xlane.xlu1 %2884 }
 0xc4a   : > { %4351 = vmatprep.subr.bf16.mxu0 %v2977_v0  ;;  %v3063_v8 = vadd.f32 1e-08, %v2885_v45 }
 0xc4c   : > { %4862 = vrcp.f32 %v3063_v8 }
 0xc4d   : > { %4352 = vmatpush3.bf16.msra.mxu0 %v2977_v0  ;;  %v2891_v5 = vpop.xlane.xlu1 %2890  ;;  %4864 = vrcp.f32 %v3061_v10 }
 0xc4e   : > { %v3065_v50 = vadd.f32 1e-08, %v2891_v5 }
 0xc50   : > { %4354 = vmatmul.mubr.msk.bf16.vlgmr.msra.gmra.mxu0 %vm2844_vm3, %v2980_v35 }
 0xc51   : > { %4357 = vmatprep.mubr.msk.bf16.mxu0 %vm2844_vm3, %v2981_v32  ;;  %v2897_v14 = vpop.xlane.xlu1 %2896  ;;  %v4861_v21 = vpop.eup %4860 }
 0xc52   : > { %v3067_v17 = vadd.f32 1e-08, %v2897_v14 }
 0xc58   : > { %4358 = vmatmul.mubr.msk.bf16.gmra.mxu0 %vm2844_vm3, %v2982_v34 }
 0xc59   : > { %v4863_v33 = vpop.eup %4862 }
 0xc5a   : > { %v4865_v39 = vpop.eup %4864 }
 0xc5f   : > { %v2882_v4 = vpop.xlane.xlu0 %2881 }
 0xc60   : > { %v3062_v12 = vadd.f32 1e-08, %v2882_v4 }
 0xc62   : > { %4866 = vrcp.f32 %v3062_v12 }
 0xc63   : > { %v2888_v11 = vpop.xlane.xlu0 %2887  ;;  %4868 = vrcp.f32 %v3065_v50 }
 0xc64   : > { %v3064_v13 = vadd.f32 1e-08, %v2888_v11  ;;  %4870 = vrcp.f32 %v3067_v17 }
 0xc66   : > { %4872 = vrcp.f32 %v3064_v13 }
 0xc67   : > { %v2894_v16 = vpop.xlane.xlu0 %2893 }
 0xc68   : > { %v3066_v18 = vadd.f32 1e-08, %v2894_v16 }
 0xc6a   : > { %4874 = vrcp.f32 %v3066_v18 }
 0xc6f   : > { %v4867_v6 = vpop.eup %4866 }
 0xc70   : > { %v4869_v40 = vpop.eup %4868 }
 0xc71   : > { %v4871_v3 = vpop.eup %4870 }
 0xc73   : > { %v4873_v41 = vpop.eup %4872 }
 0xc77   : > { %v4875_v44 = vpop.eup %4874 }
 0xd10   : > { %v4355_v20 = vpop.f32.mrf.mxu0 }
 0xd11   : > { %v3073_v31 = vmul.f32 %v4867_v6, %v4355_v20 }
 0xd12   : > { %v3029_v9 = vpop.f32.mrf.mxu0 }
 0xd13   : > { %v3069_v52 = vmul.f32 %v4861_v21, %v3029_v9 }
 0xd14   : > { %v4356_v23 = vpop.f32.mrf.mxu0 }
 0xd15   : > { %v3075_v26 = vmul.f32 %v4863_v33, %v4356_v23 }
 0xd16   : > { %v3032_v57 = vpop.f32.mrf.mxu0 }
 0xd17   : > { %v3071_v30 = vmul.f32 %v4865_v39, %v3032_v57  ;;  %v3094_v37 = vpack.c.bf16 %v3075_v26, %v3073_v31 }
 0xd18   : > { %v4359_v32 = vpop.f32.mrf.mxu0 }
 0xd19   : > { %v3093_v7 = vpack.c.bf16 %v3071_v30, %v3069_v52  ;;  %v3081_v47 = vmul.f32 %v4875_v44, %v4359_v32 }
 0xd1a   : > { %v3045_v38 = vpop.f32.mrf.mxu0 }
 0xd1b   : > { %4369 = vmatprep.mubr.msk.bf16.mxu1 %vm1349_vm1, %v3093_v7  ;;  %v3077_v19 = vmul.f32 %v4873_v41, %v3045_v38 }
 0xd1c   : > { %v4360_v46 = vpop.f32.mrf.mxu0  ;;  %4370 = vmatmul.mubr.msk.bf16.vlgmr.msra.gmra.mxu1 %vm1349_vm1, %v3094_v37 }
 0xd1d   : > { %v3083_v42 = vmul.f32 %v4871_v3, %v4360_v46 }
 0xd1e   : > { %v3048_v35 = vpop.f32.mrf.mxu0 }
 0xd1f   : > { %v3079_v36 = vmul.f32 %v4869_v40, %v3048_v35  ;;  %v3096_v15 = vpack.c.bf16 %v3083_v42, %v3081_v47 }
 0xd21   : > { %v3095_v34 = vpack.c.bf16 %v3079_v36, %v3077_v19 }
 0xd23   : > { %4373 = vmatprep.mubr.msk.bf16.mxu1 %vm1349_vm1, %v3095_v34 }
 0xd24   : > { %4374 = vmatmul.mubr.msk.bf16.gmra.mxu1 %vm1349_vm1, %v3096_v15 }
 0xddc   : > { %v4371_v51 = vpop.f32.mrf.mxu1 }
 0xddd   : > { %v3182_v55 = vadd.f32 %v4371_v51, %v4105_v48 }
 0xdde   : > { %v3173_v54 = vpop.f32.mrf.mxu1 }
 0xddf   : > { %v3174_v56 = vadd.f32 %v4105_v48, %v3173_v54  ;;  %v6540_v63 = vadd.f32 %v3182_v55, %v6456_v27 }
 0xde0   : > { %v4372_v58 = vpop.f32.mrf.mxu1 }
 0xde1   : > { %v6537_v59 = vadd.f32 %v3174_v56, %v6463_v29  ;;  %v3185_v61 = vadd.f32 %v4372_v58, %v4105_v48  ;;  %v3220_v5 = vsel %vm1349_vm1, %v6540_v63, 0.0 }
 0xde2   : > { %v3176_v62 = vpop.f32.mrf.mxu1 }
 0xde3   : > { %v3177_v0 = vadd.f32 %v4105_v48, %v3176_v62  ;;  %v3214_v49 = vsel %vm1349_vm1, %v6537_v59, 0.0  ;;  %v6548_v45 = vadd.f32 %v3185_v61, %v6452_v25 }
 0xde4   : > { %3215 = vadd.xlane.f32.xlu0 %v3214_v49  ;;  %v4375_v1 = vpop.f32.mrf.mxu1  ;;  %v4780_v49 = vld [vmem:[#allocation28 + $0x18] sm:$0xff]  }
 0xde5   : > { %v6545_v2 = vadd.f32 %v3177_v0, %v6458_v28  ;;  %v3198_v29 = vadd.f32 %v4375_v1, %v4105_v48  ;;  %v3223_v25 = vsel %vm1349_vm1, %v6548_v45, 0.0  ;;  %4377 = vmatprep.subr.bf16.mxu0 %v4780_v49  ;;  %v4781_v1 = vld [vmem:[#allocation28 + $0x10] sm:$0xff]  }
 0xde6   : > { %v3189_v4 = vpop.f32.mrf.mxu1  ;;  %4378 = vmatpush3.bf16.msra.mxu0 %v4780_v49 }
 0xde7   : > { %v3190_v43 = vadd.f32 %v4105_v48, %v3189_v4  ;;  %v3217_v27 = vsel %vm1349_vm1, %v6545_v2, 0.0  ;;  %v6560_v11 = vadd.f32 %v3198_v29, %v6442_v60  ;;  %4379 = vmatprep.subr.bf16.mxu0 %v4781_v1  ;;  %v4782_v4 = vld [vmem:[#allocation28 + $0x8] sm:$0xff]   ;;  %v4783_v29 = vld [vmem:[#allocation28] sm:$0xff]  }
 0xde8   : > { %3221 = vadd.xlane.f32.xlu0 %v3220_v5  ;;  %3218 = vadd.xlane.f32.xlu1 %v3217_v27  ;;  %v4376_v8 = vpop.f32.mrf.mxu1 }
 0xde9   : > { %v6555_v10 = vadd.f32 %v3190_v43, %v6446_v24  ;;  %v3201_v12 = vadd.f32 %v4376_v8, %v4105_v48  ;;  %v3232_v60 = vsel %vm1349_vm1, %v6560_v11, 0.0 }
 0xdea   : > { %v3192_v28 = vpop.f32.mrf.mxu1  ;;  %4380 = vmatpush3.bf16.msra.mxu0 %v4781_v1 }
 0xdeb   : > { %v3193_v14 = vadd.f32 %v4105_v48, %v3192_v28  ;;  %v3226_v50 = vsel %vm1349_vm1, %v6555_v10, 0.0  ;;  %v6568_v24 = vadd.f32 %v3201_v12, %v6444_v22  ;;  %4381 = vmatprep.subr.bf16.mxu0 %v4782_v4 }
 0xdec   : > { %3224 = vadd.xlane.f32.xlu1 %v3223_v25  ;;  %3227 = vadd.xlane.f32.xlu0 %v3226_v50 }
 0xded   : > { %v6565_v16 = vadd.f32 %v3193_v14, %v6440_v53  ;;  %v3235_v13 = vsel %vm1349_vm1, %v6568_v24, 0.0 }
 0xdee   : > { %4382 = vmatpush3.bf16.msra.mxu0 %v4782_v4 }
 0xdef   : > { %v3229_v17 = vsel %vm1349_vm1, %v6565_v16, 0.0  ;;  %4383 = vmatprep.subr.bf16.mxu0 %v4783_v29 }
 0xdf0   : > { %3230 = vadd.xlane.f32.xlu1 %v3229_v17  ;;  %3233 = vadd.xlane.f32.xlu0 %v3232_v60 }
 0xdf2   : > { %4384 = vmatpush3.bf16.msra.mxu0 %v4783_v29 }
 0xdf4   : > { %3236 = vadd.xlane.f32.xlu1 %v3235_v13 }
 0xe6d   : > { %v3216_v18 = vpop.xlane.xlu0 %3215 }
 0xe6e   : > { %v3238_v20 = vmul.f32 0.015625, %v3216_v18 }
 0xe70   : > { %v6577_v53 = vsub.f32 %v6537_v59, %v3238_v20 }
 0xe71   : > { %v3222_v9 = vpop.xlane.xlu0 %3221  ;;  %v3219_v22 = vpop.xlane.xlu1 %3218 }
 0xe72   : > { %v3240_v21 = vmul.f32 0.015625, %v3222_v9  ;;  %v3239_v23 = vmul.f32 0.015625, %v3219_v22  ;;  %v3254_v33 = vmul.f32 %v6577_v53, %v6577_v53 }
 0xe74   : > { %v6582_v39 = vsub.f32 %v6540_v63, %v3240_v21  ;;  %v6585_v26 = vsub.f32 %v6545_v2, %v3239_v23  ;;  %v3262_v57 = vsel %vm1349_vm1, %v3254_v33, 0.0 }
 0xe75   : > { %3263 = vadd.xlane.f32.xlu0 %v3262_v57  ;;  %v3228_v6 = vpop.xlane.xlu0 %3227  ;;  %v3225_v52 = vpop.xlane.xlu1 %3224 }
 0xe76   : > { %v3242_v30 = vmul.f32 0.015625, %v3228_v6  ;;  %v3241_v31 = vmul.f32 0.015625, %v3225_v52  ;;  %v3256_v32 = vmul.f32 %v6582_v39, %v6582_v39  ;;  %v3255_v7 = vmul.f32 %v6585_v26, %v6585_v26 }
 0xe78   : > { %v6593_v37 = vsub.f32 %v6555_v10, %v3242_v30  ;;  %v6596_v38 = vsub.f32 %v6548_v45, %v3241_v31  ;;  %v3268_v40 = vsel %vm1349_vm1, %v3256_v32, 0.0  ;;  %v3265_v46 = vsel %vm1349_vm1, %v3255_v7, 0.0 }
 0xe79   : > { %3269 = vadd.xlane.f32.xlu0 %v3268_v40  ;;  %v3234_v3 = vpop.xlane.xlu0 %3233  ;;  %3266 = vadd.xlane.f32.xlu1 %v3265_v46  ;;  %v3231_v41 = vpop.xlane.xlu1 %3230  ;;  %v4114_v40 = vld [vmem:[%s6855_s16] ss:$0 sm:$0xff]  ;;  %s5434_s16 = sshll.u32 %s5564_s1, 4  ;;  %s5435_s16 = int_to_ptr.vmem [resolvable:$false] %s5434_s16 }
 0xe7a   : > { %v3244_v42 = vmul.f32 0.015625, %v3234_v3  ;;  %v3243_v35 = vmul.f32 0.015625, %v3231_v41  ;;  %v3258_v44 = vmul.f32 %v6593_v37, %v6593_v37  ;;  %v3257_v19 = vmul.f32 %v6596_v38, %v6596_v38  ;;  %s5436_s21 = scalar_lea.vmem %s5435_s16, 2048  ;;  %p5437_p9 = scmp.lt.s32.totalorder %s6685_s22, %s5435_s16 }
 0xe7b   : > { %p5438_p7 = scmp.lt.s32.totalorder %s5436_s21, %s5430_s13 }
 0xe7c   : > { %v6605_v36 = vsub.f32 %v6560_v11, %v3244_v42  ;;  %v6608_v47 = vsub.f32 %v6565_v16, %v3243_v35  ;;  %v3274_v34 = vsel %vm1349_vm1, %v3258_v44, 0.0  ;;  %v3271_v15 = vsel %vm1349_vm1, %v3257_v19, 0.0  ;;  %v4115_v35 = vld [vmem:[#allocation26] ss:$0 sm:$0xff] }
 0xe7d   : > { %3275 = vadd.xlane.f32.xlu0 %v3274_v34  ;;  %3272 = vadd.xlane.f32.xlu1 %v3271_v15  ;;  %v3237_v51 = vpop.xlane.xlu1 %3236  ;;  %p5439_p12 = por %p5438_p7, %p5437_p9 }
 0xe7e   : > { %v3245_v48 = vmul.f32 0.015625, %v3237_v51  ;;  %v3260_v54 = vmul.f32 %v6605_v36, %v6605_v36  ;;  %v3259_v55 = vmul.f32 %v6608_v47, %v6608_v47 }
 0xe7f   : > { %p5440_p6 = pnand %p5439_p12, %p5433_p8 }
 0xe80   : > { %v6617_v56 = vsub.f32 %v6568_v24, %v3245_v48  ;;  %v3280_v58 = vsel %vm1349_vm1, %v3260_v54, 0.0  ;;  %v3277_v61 = vsel %vm1349_vm1, %v3259_v55, 0.0 }
 0xe81   : > { %3281 = vadd.xlane.f32.xlu0 %v3280_v58  ;;  %3278 = vadd.xlane.f32.xlu1 %v3277_v61 }
 0xe82   : > { %v3261_v62 = vmul.f32 %v6617_v56, %v6617_v56 }
 0xe84   : > { %v3283_v0 = vsel %vm1349_vm1, %v3261_v62, 0.0 }
 0xe85   : > { %3284 = vadd.xlane.f32.xlu1 %v3283_v0 }
 0xefe   : > { %v3264_v43 = vpop.xlane.xlu0 %3263 }
 0xeff   : > { %v3286_v5 = vmul.f32 0.015625, %v3264_v43 }
 0xf01   : > { %v3294_v27 = vadd.f32 1e-05, %v3286_v5 }
 0xf02   : > { %v3270_v8 = vpop.xlane.xlu0 %3269  ;;  %v3267_v28 = vpop.xlane.xlu1 %3266 }
 0xf03   : > { %4876 = vrsqrt.f32 %v3294_v27  ;;  %v3288_v25 = vmul.f32 0.015625, %v3270_v8  ;;  %v3287_v12 = vmul.f32 0.015625, %v3267_v28 }
 0xf05   : > { %v3296_v14 = vadd.f32 1e-05, %v3288_v25  ;;  %v3295_v50 = vadd.f32 1e-05, %v3287_v12 }
 0xf06   : > { %v3276_v17 = vpop.xlane.xlu0 %3275  ;;  %v3273_v60 = vpop.xlane.xlu1 %3272 }
 0xf07   : > { %4878 = vrsqrt.f32 %v3296_v14  ;;  %v3290_v13 = vmul.f32 0.015625, %v3276_v17  ;;  %v3289_v18 = vmul.f32 0.015625, %v3273_v60  ;;  %v4787_v17 = vld [vmem:[#allocation31] sm:$0xff]   ;;  %v4116_v60 = vld [vmem:[#allocation29] ss:$0 sm:$0xff] }
 0xf08   : > { %4880 = vrsqrt.f32 %v3295_v50  ;;  %v4785_v50 = vld [vmem:[#allocation31 + $0x10] sm:$0xff]  }
 0xf09   : > { %v3298_v20 = vadd.f32 1e-05, %v3290_v13  ;;  %v3297_v9 = vadd.f32 1e-05, %v3289_v18 }
 0xf0a   : > { %v3282_v22 = vpop.xlane.xlu0 %3281  ;;  %v3279_v21 = vpop.xlane.xlu1 %3278 }
 0xf0b   : > { %4882 = vrsqrt.f32 %v3298_v20  ;;  %v3292_v23 = vmul.f32 0.015625, %v3282_v22  ;;  %v3291_v33 = vmul.f32 0.015625, %v3279_v21 }
 0xf0c   : > { %4884 = vrsqrt.f32 %v3297_v9 }
 0xf0d   : > { %v3300_v57 = vadd.f32 1e-05, %v3292_v23  ;;  %v3299_v6 = vadd.f32 1e-05, %v3291_v33 }
 0xf0e   : > { %v3285_v52 = vpop.xlane.xlu1 %3284 }
 0xf0f   : > { %4886 = vrsqrt.f32 %v3300_v57  ;;  %v3293_v30 = vmul.f32 0.015625, %v3285_v52 }
 0xf10   : > { %v4877_v31 = vpop.eup %4876  ;;  %4888 = vrsqrt.f32 %v3299_v6 }
 0xf11   : > { %v3301_v32 = vadd.f32 1e-05, %v3293_v30  ;;  %v3310_v7 = vmul.f32 %v4877_v31, %v6577_v53 }
 0xf13   : > { %4890 = vrsqrt.f32 %v3301_v32  ;;  %v3324_v41 = vmul.f32 %v4114_v40, %v3310_v7 }
 0xf14   : > { %v4879_v46 = vpop.eup %4878 }
 0xf15   : > { %v4881_v3 = vpop.eup %4880  ;;  %v3312_v42 = vmul.f32 %v4879_v46, %v6582_v39  ;;  %v3338_v51 = vadd.f32 %v4115_v35, %v3324_v41 }
 0xf16   : > { %v3311_v44 = vmul.f32 %v4881_v3, %v6585_v26 }
 0xf17   : > { %v3326_v48 = vmul.f32 %v4114_v40, %v3312_v42 }
 0xf18   : > { %v4883_v19 = vpop.eup %4882  ;;  %v3325_v34 = vmul.f32 %v4114_v40, %v3311_v44 }
 0xf19   : > { %v4885_v15 = vpop.eup %4884  ;;  %v3314_v55 = vmul.f32 %v4883_v19, %v6593_v37  ;;  %v3340_v39 = vadd.f32 %v4115_v35, %v3326_v48 }
 0xf1a   : > { %v3313_v53 = vmul.f32 %v4885_v15, %v6596_v38  ;;  %v3339_v54 = vadd.f32 %v4115_v35, %v3325_v34 }
 0xf1b   : > { %v3328_v4 = vmul.f32 %v4114_v40, %v3314_v55 }
 0xf1c   : > { %v4887_v58 = vpop.eup %4886  ;;  %v3327_v61 = vmul.f32 %v4114_v40, %v3313_v53  ;;  %v3355_v62 = vpack.c.bf16 %v3339_v54, %v3338_v51 }
 0xf1d   : > { %v4889_v0 = vpop.eup %4888  ;;  %v3316_v49 = vmul.f32 %v4887_v58, %v6605_v36  ;;  %v3342_v37 = vadd.f32 %v4115_v35, %v3328_v4 }
 0xf1e   : > { %4385 = vmatprep.mubr.msk.bf16.mxu0 %vm1349_vm1, %v3355_v62  ;;  %v3341_v26 = vadd.f32 %v4115_v35, %v3327_v61  ;;  %v3315_v1 = vmul.f32 %v4889_v0, %v6608_v47  ;;  %v4784_v47 = vld [vmem:[#allocation31 + $0x18] sm:$0xff]  }
 0xf1f   : > { %v3330_v27 = vmul.f32 %v4114_v40, %v3316_v49  ;;  %4393 = vmatprep.subr.bf16.mxu1 %v4784_v47 }
 0xf20   : > { %v4891_v29 = vpop.eup %4890  ;;  %v3356_v43 = vpack.c.bf16 %v3341_v26, %v3340_v39  ;;  %v3329_v5 = vmul.f32 %v4114_v40, %v3315_v1  ;;  %4394 = vmatpush3.bf16.msra.mxu1 %v4784_v47 }
 0xf21   : > { %v3317_v38 = vmul.f32 %v4891_v29, %v6617_v56  ;;  %v3344_v36 = vadd.f32 %v4115_v35, %v3330_v27  ;;  %4395 = vmatprep.subr.bf16.mxu1 %v4785_v50  ;;  %v4786_v56 = vld [vmem:[#allocation31 + $0x8] sm:$0xff]  }
 0xf22   : > { %4386 = vmatmul.mubr.msk.bf16.vlgmr.msra.gmra.mxu0 %vm1349_vm1, %v3356_v43  ;;  %v3343_v8 = vadd.f32 %v4115_v35, %v3329_v5 }
 0xf23   : > { %v3331_v28 = vmul.f32 %v4114_v40, %v3317_v38 }
 0xf24   : > { %v3357_v25 = vpack.c.bf16 %v3343_v8, %v3342_v37  ;;  %4396 = vmatpush3.bf16.msra.mxu1 %v4785_v50 }
 0xf25   : > { %v3345_v12 = vadd.f32 %v4115_v35, %v3331_v28  ;;  %4397 = vmatprep.subr.bf16.mxu1 %v4786_v56 }
 0xf26   : > { %4389 = vmatprep.mubr.msk.bf16.mxu0 %vm1349_vm1, %v3357_v25 }
 0xf27   : > { %v3358_v14 = vpack.c.bf16 %v3345_v12, %v3344_v36 }
 0xf28   : > { %4398 = vmatpush3.bf16.msra.mxu1 %v4786_v56 }
 0xf29   : > { %4399 = vmatprep.subr.bf16.mxu1 %v4787_v17 }
 0xf2a   : > { %4390 = vmatmul.mubr.msk.bf16.gmra.mxu0 %vm1349_vm1, %v3358_v14 }
 0xf2c   : > { %4400 = vmatpush3.bf16.msra.mxu1 %v4787_v17 }
 0xfe2   : > { %v4387_v13 = vpop.f32.mrf.mxu0 }
 0xfe3   : > { %v6639_v18 = vadd.f32 %v4387_v13, %v4116_v60 }
 0xfe4   : > { %v3435_v20 = vpop.f32.mrf.mxu0 }
 0xfe5   : > { %v3476_v9 = vmul.f32 0.044715, %v6639_v18  ;;  %v6642_v22 = vadd.f32 %v4116_v60, %v3435_v20 }
 0xfe6   : > { %v4388_v21 = vpop.f32.mrf.mxu0 }
 0xfe7   : > { %v3484_v23 = vmul.f32 %v3476_v9, %v6639_v18  ;;  %v3474_v33 = vmul.f32 0.044715, %v6642_v22  ;;  %v3447_v57 = vadd.f32 %v4388_v21, %v4116_v60 }
 0xfe8   : > { %v3438_v6 = vpop.f32.mrf.mxu0 }
 0xfe9   : > { %v3492_v52 = vmul.f32 %v3484_v23, %v6639_v18  ;;  %v3482_v30 = vmul.f32 %v3474_v33, %v6642_v22  ;;  %v3477_v31 = vmul.f32 0.044715, %v3447_v57  ;;  %v3439_v32 = vadd.f32 %v4116_v60, %v3438_v6 }
 0xfea   : > { %v4391_v7 = vpop.f32.mrf.mxu0 }
 0xfeb   : > { %v3500_v40 = vadd.f32 %v3492_v52, %v6639_v18  ;;  %v3490_v46 = vmul.f32 %v3482_v30, %v6642_v22  ;;  %v3485_v3 = vmul.f32 %v3477_v31, %v3447_v57  ;;  %v6650_v41 = vadd.f32 %v4391_v7, %v4116_v60 }
 0xfec   : > { %v3475_v42 = vmul.f32 0.044715, %v3439_v32  ;;  %v3451_v35 = vpop.f32.mrf.mxu0  ;;  %v3469_v52 = vmul.f32 0.5, %v3447_v57  ;;  %v3466_v30 = vmul.f32 0.5, %v6642_v22  ;;  %v3467_v31 = vmul.f32 0.5, %v3439_v32 }
 0xfed   : > { %v3508_v44 = vmul.f32 0.7978846, %v3500_v40  ;;  %v3498_v19 = vadd.f32 %v3490_v46, %v6642_v22  ;;  %v3493_v34 = vmul.f32 %v3485_v3, %v3447_v57  ;;  %v3480_v15 = vmul.f32 0.044715, %v6650_v41 }
 0xfee   : > { %v3483_v51 = vmul.f32 %v3475_v42, %v3439_v32  ;;  %v3452_v48 = vadd.f32 %v4116_v60, %v3451_v35  ;;  %v4392_v53 = vpop.f32.mrf.mxu0  ;;  %v3468_v40 = vmul.f32 0.5, %v6639_v18 }
 0xfef   : > { %v3506_v54 = vmul.f32 0.7978846, %v3498_v19  ;;  %v3501_v55 = vadd.f32 %v3493_v34, %v3447_v57  ;;  %v3488_v58 = vmul.f32 %v3480_v15, %v6650_v41  ;;  %v3463_v0 = vadd.f32 %v4392_v53, %v4116_v60 }
 0xff0   : > { %v3491_v61 = vmul.f32 %v3483_v51, %v3439_v32  ;;  %v3478_v62 = vmul.f32 0.044715, %v3452_v48  ;;  %v3454_v49 = vpop.f32.mrf.mxu0  ;;  %4892 = vtanh.f32 %v3508_v44  ;;  %v3470_v57 = vmul.f32 0.5, %v3452_v48 }
 0xff1   : > { %v3509_v39 = vmul.f32 0.7978846, %v3501_v55  ;;  %v3496_v26 = vmul.f32 %v3488_v58, %v6650_v41  ;;  %v3455_v1 = vadd.f32 %v4116_v60, %v3454_v49  ;;  %4894 = vtanh.f32 %v3506_v54 }
 0xff2   : > { %v3499_v4 = vadd.f32 %v3491_v61, %v3439_v32  ;;  %v3486_v29 = vmul.f32 %v3478_v62, %v3452_v48  ;;  %v3481_v43 = vmul.f32 0.044715, %v3463_v0  ;;  %v3473_v18 = vmul.f32 0.5, %v3463_v0 }
 0xff3   : > { %4896 = vtanh.f32 %v3509_v39  ;;  %v3504_v5 = vadd.f32 %v3496_v26, %v6650_v41  ;;  %v3479_v38 = vmul.f32 0.044715, %v3455_v1  ;;  %v3471_v22 = vmul.f32 0.5, %v3455_v1 }
 0xff4   : > { %v3507_v27 = vmul.f32 0.7978846, %v3499_v4  ;;  %v3494_v37 = vmul.f32 %v3486_v29, %v3452_v48  ;;  %v3489_v8 = vmul.f32 %v3481_v43, %v3463_v0  ;;  %v3472_v49 = vmul.f32 0.5, %v6650_v41 }
 0xff5   : > { %v3487_v28 = vmul.f32 %v3479_v38, %v3455_v1  ;;  %v3512_v12 = vmul.f32 0.7978846, %v3504_v5 }
 0xff6   : > { %4898 = vtanh.f32 %v3507_v27  ;;  %v3502_v25 = vadd.f32 %v3494_v37, %v3452_v48  ;;  %v3497_v36 = vmul.f32 %v3489_v8, %v3463_v0  ;;  %v4125_v48 = vld [vmem:[#allocation32] ss:$0 sm:$0xff] }
 0xff7   : > { %v3495_v14 = vmul.f32 %v3487_v28, %v3455_v1 }
 0xff8   : > { %v3510_v47 = vmul.f32 0.7978846, %v3502_v25  ;;  %v3505_v50 = vadd.f32 %v3497_v36, %v3463_v0 }
 0xff9   : > { %v3503_v56 = vadd.f32 %v3495_v14, %v3455_v1 }
 0xffa   : > { %4900 = vtanh.f32 %v3510_v47  ;;  %v3513_v17 = vmul.f32 0.7978846, %v3505_v50 }
 0xffb   : > { %4902 = vtanh.f32 %v3512_v12  ;;  %v3511_v60 = vmul.f32 0.7978846, %v3503_v56 }
 0xffc   : > { %4904 = vtanh.f32 %v3513_v17 }
 0xffd   : > { %4906 = vtanh.f32 %v3511_v60  ;;  %v4893_v13 = vpop.eup %4892 }
 0xffe   : > { %v4895_v20 = vpop.eup %4894  ;;  %v3524_v6 = vadd.f32 1.0, %v4893_v13 }
 0xfff   : > { %v3522_v23 = vadd.f32 1.0, %v4895_v20 }
0x1000   : > { %v4897_v9 = vpop.eup %4896  ;;  %v3532_v44 = vmul.f32 %v3524_v6, %v3468_v40 }
0x1001   : > { %v3525_v21 = vadd.f32 1.0, %v4897_v9  ;;  %v3530_v3 = vmul.f32 %v3522_v23, %v3466_v30 }
0x1003   : > { %v4899_v33 = vpop.eup %4898  ;;  %v3533_v46 = vmul.f32 %v3525_v21, %v3469_v52 }
0x1004   : > { %v3523_v7 = vadd.f32 1.0, %v4899_v33 }
0x1005   : > { %v3548_v51 = vpack.c.bf16 %v3533_v46, %v3532_v44 }
0x1006   : > { %v3531_v42 = vmul.f32 %v3523_v7, %v3467_v31 }
0x1007   : > { %v4901_v35 = vpop.eup %4900 }
0x1008   : > { %v4903_v19 = vpop.eup %4902  ;;  %v3547_v34 = vpack.c.bf16 %v3531_v42, %v3530_v3  ;;  %v3526_v53 = vadd.f32 1.0, %v4901_v35 }
0x1009   : > { %v4905_v15 = vpop.eup %4904  ;;  %v3528_v58 = vadd.f32 1.0, %v4903_v19 }
0x100a   : > { %v4907_v54 = vpop.eup %4906  ;;  %4401 = vmatprep.mubr.msk.bf16.mxu1 %vm1349_vm1, %v3547_v34  ;;  %v3529_v55 = vadd.f32 1.0, %v4905_v15  ;;  %v3534_v61 = vmul.f32 %v3526_v53, %v3470_v57 }
0x100b   : > { %4402 = vmatmul.mubr.msk.bf16.vlgmr.msra.gmra.mxu1 %vm1349_vm1, %v3548_v51  ;;  %v3527_v32 = vadd.f32 1.0, %v4907_v54  ;;  %v3536_v4 = vmul.f32 %v3528_v58, %v3472_v49 }
0x100c   : > { %v3537_v39 = vmul.f32 %v3529_v55, %v3473_v18 }
0x100d   : > { %v3535_v62 = vmul.f32 %v3527_v32, %v3471_v22 }
0x100e   : > { %v3550_v29 = vpack.c.bf16 %v3537_v39, %v3536_v4 }
0x100f   : > { %v3549_v26 = vpack.c.bf16 %v3535_v62, %v3534_v61 }
0x1011   : > { %4405 = vmatprep.mubr.msk.bf16.mxu1 %vm1349_vm1, %v3549_v26 }
0x1013   : > { %4406 = vmatmul.mubr.msk.bf16.gmra.mxu1 %vm1349_vm1, %v3550_v29 }
0x10cb   : > { %v4403_v43 = vpop.f32.mrf.mxu1 }
0x10cc   : > { %v3636_v5 = vadd.f32 %v4403_v43, %v4125_v48 }
0x10cd   : > { %v3627_v1 = vpop.f32.mrf.mxu1 }
0x10ce   : > { %v3660_v0 = vadd.f32 %v3636_v5, %v6540_v63  ;;  %v3628_v38 = vadd.f32 %v4125_v48, %v3627_v1 }
0x10cf   : > { %v4404_v27 = vpop.f32.mrf.mxu1 }
0x10d0   : > { %3668 = vst.msk [vmem:[%s1128_s15 + $0x10] sm:$0xff] %vm1349_vm1, %v3660_v0  ;;  %v3658_v41 = vadd.f32 %v3628_v38, %v6537_v59  ;;  %v3639_v37 = vadd.f32 %v4404_v27, %v4125_v48 }
0x10d1   : > { %v3630_v8 = vpop.f32.mrf.mxu1 }
0x10d2   : > { %3666 = vst.msk [vmem:[%s1128_s15] sm:$0xff] %vm1349_vm1, %v3658_v41  ;;  %v3661_v28 = vadd.f32 %v3639_v37, %v6548_v45  ;;  %v3631_v25 = vadd.f32 %v4125_v48, %v3630_v8 }
0x10d3   : > { %v4407_v36 = vpop.f32.mrf.mxu1 }
0x10d4   : > { %3669 = vst.msk [vmem:[%s1128_s15 + $0x18] sm:$0xff] %vm1349_vm1, %v3661_v28  ;;  %v3659_v63 = vadd.f32 %v3631_v25, %v6545_v2  ;;  %v3652_v12 = vadd.f32 %v4407_v36, %v4125_v48 }
0x10d5   : > { %v3643_v14 = vpop.f32.mrf.mxu1 }
0x10d6   : > { %3667 = vst.msk [vmem:[%s1128_s15 + $0x8] sm:$0xff] %vm1349_vm1, %v3659_v63  ;;  %v3664_v47 = vadd.f32 %v3652_v12, %v6560_v11  ;;  %v3644_v59 = vadd.f32 %v4125_v48, %v3643_v14 }
0x10d7   : > { %v4408_v50 = vpop.f32.mrf.mxu1 }
0x10d8   : > { %3672 = vst.msk [vmem:[%s1128_s15 + $0x30] sm:$0xff] %vm1349_vm1, %v3664_v47  ;;  %v3662_v56 = vadd.f32 %v3644_v59, %v6555_v10  ;;  %v3655_v45 = vadd.f32 %v4408_v50, %v4125_v48 }
0x10d9   : > { %v3646_v17 = vpop.f32.mrf.mxu1 }
0x10da   : > { %3670 = vst.msk [vmem:[%s1128_s15 + $0x20] sm:$0xff] %vm1349_vm1, %v3662_v56  ;;  %v3665_v2 = vadd.f32 %v3655_v45, %v6568_v24  ;;  %v3647_v60 = vadd.f32 %v4125_v48, %v3646_v17 }
0x10dc   : > { %3673 = vst.msk [vmem:[%s1128_s15 + $0x38] sm:$0xff] %vm1349_vm1, %v3665_v2  ;;  %v3663_v10 = vadd.f32 %v3647_v60, %v6565_v16 }
0x10de   : > { %3671 = vst.msk [vmem:[%s1128_s15 + $0x28] sm:$0xff] %vm1349_vm1, %v3663_v10 }
0x10df   : > { %5443 = shalt.err (!%p5440_p6)
}
0x10e0   : > { %s5444_s15 = scalar_lea.hbm %s6683_s29, 1024  ;;  %s5448_s1 = scalar_lea.hbm %s6856_s14, 2048 }
0x10e1   : > { %p5445_p2 = scmp.ne.s32.totalorder %s6683_s29, %s5444_s15  ;;  %p5449_p4 = scmp.lt.s32.totalorder %s6683_s29, %s6856_s14 }
0x10e2   : > { %p5450_p1 = scmp.lt.s32.totalorder %s5448_s1, %s5444_s15 }
0x10e3   : > { %p5446_p5 = pnand %p5445_p2, %p6857_p0 }
0x10e4   : > { %p5451_p10 = por %p5450_p1, %p5449_p4 }
0x10e5   : > { %p5447_p3 = pneg %p5446_p5 }
0x10e7   : > { %p5452_p11 = pnand %p5451_p10, %p5447_p3 }
0x10e9   : > { %5455 = shalt.err (!%p5452_p11)
}
0x10ea   : > { %s5565_s13 = smov 128   ;;  %s5566_s16 = smov 8  }
0x10eb   : > { %s6858_s21 = scalar_lea.sflag [#allocation4], %s5998_s18 }
0x10ec   : > { %4487 = dma.vmem_to_hbm [thread:$0]  (%p6857_p0), %s6685_s22, 1024, %s6683_s29, %s6858_s21, %s5565_s13, %s5565_s13, %s5566_s16  }
0x10ed PF: > { %s3703_s0 = sand.u32 1, %s5522_s8   ;;  %p6859_p13 = scmp.ne.s32.totalorder %s6822_s20, 0 }
0x10ee   : > { %p6860_p8 = scmp.ge.s32.totalorder %s5534_s30, 2  ;;  %s3704_s2 = scalar_lea.sflag [#allocation4], %s3703_s0 }
0x10f0   : > { %p4552_p9 = pnand %p6860_p8, %p6859_p13 }
0x10f2   : > { %p4553_p7 = pneg %p4552_p9 }
0x10f4   : > { %5517 = dma.done.wait (%p4553_p7), %s3704_s2, 1024  }
0x10f5   : > { %5519 = vsyncadd (%p4553_p7), %s3704_s2, 4294966272  ;;  %p51_p12 = scmp.ge.s32.totalorder %s5929_s12, 4   ;;  %s6861_s8 = smov %s5526_s5 }
0x10f6   : > { %s6862_s5 = smov %s5530_s9  ;;  %s6863_s9 = smov %s5941_s17 }
0x10f7   : > { %s6864_s30 = smov %s5929_s12  ;;  %53 = sbr.rel (!%p51_p12) target bundleno = 39 (0x27), region = 256 }
0x10fc   :  { %3709 = vsyncpa [#allocation3], 1 }
0x10fd   :  { %3711 = vsyncpa [#allocation3 + $0x1], 1 }
0x10fe   :  { %3712 = vsyncpa [#allocation6], 1 }
0x10ff   :  { %3713 = vsyncpa [#allocation9], 1 }
0x1100   :  { %3714 = vsyncpa [#allocation12], 1 }
0x1101   :  { %3715 = vsyncpa [#allocation15], 1 }
0x1102   :  { %3716 = vsyncpa [#allocation18], 1 }
0x1103   :  { %3717 = vsyncpa [#allocation21], 1 }
0x1104   :  { %3718 = vsyncpa [#allocation24], 1 }
0x1105   :  { %3719 = vsyncpa [#allocation27], 1 }
0x1106   :  { %3720 = vsyncpa [#allocation30], 1 }
0x1107   :  { %3721 = vsyncpa [#allocation33], 1 }
0x1108   :  { %3722 = vsyncpa [#allocation4], 1 }
0x1109   :  { %3724 = vsyncpa [#allocation4 + $0x1], 1 }

</bundles_post_ra>
